<compile_context>
chip_gen: v7x
topology: tpu7x:2x2x1
jax: 0.10.0
libtpu: 0.0.40
codegen_flags: <defaults>
</compile_context>

<pallas_src>
from functools import partial

import jax
import jax.numpy as jnp
from jax import lax
from jax.experimental import pallas as pl
from jax.experimental.pallas import tpu as pltpu

_VMEM_LIMIT = 32 * 1024 * 1024  # v7x-safe scoped-VMEM budget


def _pick_rows(h, target):
    """Largest divisor of h that is <= target (row-tile size)."""
    t = max(1, min(target, h))
    while h % t:
        t -= 1
    return t


# ---------------------------------------------------------------------------
# Kernel A: ConvTranspose2d(k=2, s=2) as a tiled channel matmul, pixel-shuffle
# fused into the output layout (N, H, 2, W, 2*Chalf).
# ---------------------------------------------------------------------------
def _up_kernel(x_ref, w_ref, b_ref, o_ref):
    th, w, cin = x_ref.shape[1], x_ref.shape[2], x_ref.shape[3]
    x2d = x_ref[0].reshape(th * w, cin).astype(jnp.bfloat16)
    for kh in range(2):
        acc = jnp.dot(x2d, w_ref[kh], preferred_element_type=jnp.float32)
        acc = acc + b_ref[...]
        o_ref[0, :, kh, :, :] = acc.reshape(th, w, acc.shape[-1]).astype(o_ref.dtype)


def conv_transpose_2x2(x_nhwc, w_up, b_up, *, th):
    # x_nhwc: (N, H, W, Cin), w_up (PyTorch): (Cin, Chalf, 2, 2), b_up: (Chalf,)
    N, H, W, Cin = x_nhwc.shape
    Chalf = w_up.shape[1]
    # (Cin, Chalf, kh, kw) -> (kh, Cin, kw, Chalf) -> (2, Cin, 2*Chalf); lane order (kw, co)
    w_k = jnp.transpose(w_up, (2, 0, 3, 1)).reshape(2, Cin, 2 * Chalf).astype(jnp.bfloat16)
    b_k = jnp.tile(b_up, 2).reshape(1, 2 * Chalf).astype(jnp.float32)
    R = H // th
    out = pl.pallas_call(
        _up_kernel,
        grid=(N, R),
        in_specs=[
            pl.BlockSpec((1, th, W, Cin), lambda n, r: (n, r, 0, 0)),
            pl.BlockSpec((2, Cin, 2 * Chalf), lambda n, r: (0, 0, 0)),
            pl.BlockSpec((1, 2 * Chalf), lambda n, r: (0, 0)),
        ],
        out_specs=pl.BlockSpec((1, th, 2, W, 2 * Chalf), lambda n, r: (n, r, 0, 0, 0)),
        out_shape=jax.ShapeDtypeStruct((N, H, 2, W, 2 * Chalf), jnp.bfloat16),
        compiler_params=pltpu.CompilerParams(
            dimension_semantics=("parallel", "parallel"),
            vmem_limit_bytes=_VMEM_LIMIT),
    )(x_nhwc, w_k, b_k)
    # (N, H, 2, W, 2*Chalf) -> (N, 2H, 2W, Chalf): contiguous reshape, no transpose.
    return out.reshape(N, 2 * H, 2 * W, Chalf)


# ---------------------------------------------------------------------------
# Kernel B: 3x3 "SAME" conv over the channel-concat of n_in inputs, single
# K=9*sum(Cin) matmul, in-kernel halo padding, optional fused input BN+ReLU,
# per-tile BN statistics in the epilogue.
# ---------------------------------------------------------------------------
def _conv3x3_cat_kernel(*refs, n_in, cins, th, wf, cout, in_norm):
    idx = 0
    xs, halos = [], []
    for _ in range(n_in):
        xs.append(refs[idx]); halos.append(refs[idx + 1]); idx += 2
    scales, shifts = [], []
    if in_norm:
        for _ in range(n_in):
            scales.append(refs[idx]); shifts.append(refs[idx + 1]); idx += 2
    w_ref, b_ref = refs[idx], refs[idx + 1]; idx += 2
    o_ref, st_ref = refs[idx], refs[idx + 1]; idx += 2
    pads = [refs[idx + i] for i in range(n_in)]; idx += n_in
    patch_ref = refs[idx]

    r = pl.program_id(1)
    last_r = pl.num_programs(1) - 1

    col = 0
    for i in range(n_in):
        cin = cins[i]
        pad = pads[i]
        # zero borders act as the conv's 1-pixel zero padding
        pad[...] = jnp.zeros(pad.shape, pad.dtype)
        if in_norm:
            sc = scales[i][...]
            sh = shifts[i][...]
            body = jnp.maximum(xs[i][0].astype(jnp.float32) * sc + sh, 0.0)
            top = jnp.maximum(halos[i][0, 0, 0].astype(jnp.float32) * sc + sh, 0.0)
            bot = jnp.maximum(halos[i][0, 0, 1].astype(jnp.float32) * sc + sh, 0.0)
            # halo rows beyond the image must remain zero (conv padding of h1)
            top = jnp.where(r > 0, top, 0.0)
            bot = jnp.where(r < last_r, bot, 0.0)
        else:
            body = xs[i][0]
            top = halos[i][0, 0, 0]
            bot = halos[i][0, 0, 1]
        pad[1:th + 1, 1:wf + 1, :] = body.astype(pad.dtype)
        pad[0, 1:wf + 1, :] = top.astype(pad.dtype)
        pad[th + 1, 1:wf + 1, :] = bot.astype(pad.dtype)
        # im2col into the shared patch slab; K order = (input, dh, dw, cin)
        for dh in range(3):
            for dw in range(3):
                tap = pad[dh:dh + th, dw:dw + wf, :].reshape(th * wf, cin)
                patch_ref[:, col:col + cin] = tap.astype(patch_ref.dtype)
                col += cin

    acc = jnp.dot(patch_ref[...], w_ref[...], preferred_element_type=jnp.float32)
    acc = acc + b_ref[...]
    o_ref[...] = acc.reshape(1, th, wf, cout).astype(o_ref.dtype)
    # partial BatchNorm statistics of the pre-activation conv output
    st_ref[0, 0, 0:1, :] = jnp.sum(acc, axis=0, keepdims=True)
    st_ref[0, 0, 1:2, :] = jnp.sum(acc * acc, axis=0, keepdims=True)


def _build_halo(x, th):
    """Halo rows (row above / row below each row-tile), zeros at image borders.
    x: (N, Hf, Wf, C) -> (N, R, 2, Wf, C).  Costs ~2/th of a full copy, replacing
    the full jnp.pad copy of the activation."""
    N, Hf, Wf, C = x.shape
    zero = jnp.zeros((N, 1, Wf, C), x.dtype)
    tops = x[:, th - 1:Hf - 1:th]   # rows r*th - 1, r = 1..R-1
    bots = x[:, th:Hf:th]           # rows (r+1)*th, r = 0..R-2
    top_full = jnp.concatenate([zero, tops], axis=1)
    bot_full = jnp.concatenate([bots, zero], axis=1)
    return jnp.stack([top_full, bot_full], axis=2)


def conv3x3_bn_stats(xs, halos, w_mat, bias, *, cout, out_dtype, th,
                     in_norm=False, norms=None):
    # TODO(synk): for very large W / C, additionally tile the width and the K/Cout dims.
    n_in = len(xs)
    N, Hf, Wf, _ = xs[0].shape
    R = Hf // th
    cins = tuple(int(x.shape[-1]) for x in xs)
    ktot = 9 * sum(cins)

    inputs, in_specs = [], []
    for i in range(n_in):
        in_specs.append(pl.BlockSpec((1, th, Wf, cins[i]), lambda n, r: (n, r, 0, 0)))
        in_specs.append(pl.BlockSpec((1, 1, 2, Wf, cins[i]), lambda n, r: (n, r, 0, 0, 0)))
        inputs += [xs[i], halos[i]]
    if in_norm:
        for i in range(n_in):
            sc, sh = norms[i]
            in_specs.append(pl.BlockSpec((1, cins[i]), lambda n, r: (0, 0)))
            in_specs.append(pl.BlockSpec((1, cins[i]), lambda n, r: (0, 0)))
            inputs += [sc, sh]
    in_specs.append(pl.BlockSpec((ktot, cout), lambda n, r: (0, 0)))
    in_specs.append(pl.BlockSpec((1, cout), lambda n, r: (0, 0)))
    inputs += [w_mat, bias.reshape(1, cout).astype(jnp.float32)]

    out_shape = (jax.ShapeDtypeStruct((N, Hf, Wf, cout), out_dtype),
                 jax.ShapeDtypeStruct((N, R, 2, cout), jnp.float32))
    out_specs = (pl.BlockSpec((1, th, Wf, cout), lambda n, r: (n, r, 0, 0)),
                 pl.BlockSpec((1, 1, 2, cout), lambda n, r: (n, r, 0, 0)))

    scratch = [pltpu.VMEM((th + 2, Wf + 2, cins[i]), jnp.float32) for i in range(n_in)]
    scratch.append(pltpu.VMEM((th * Wf, ktot), jnp.bfloat16))

    kern = partial(_conv3x3_cat_kernel, n_in=n_in, cins=cins, th=th, wf=Wf,
                   cout=cout, in_norm=in_norm)
    return pl.pallas_call(
        kern,
        grid=(N, R),
        in_specs=in_specs,
        out_specs=out_specs,
        out_shape=out_shape,
        scratch_shapes=scratch,
        compiler_params=pltpu.CompilerParams(
            dimension_semantics=("parallel", "parallel"),
            vmem_limit_bytes=_VMEM_LIMIT),
    )(*inputs)


# ---------------------------------------------------------------------------
# Kernel C: tiled elementwise BatchNorm apply (precomputed scale/shift) + ReLU
# ---------------------------------------------------------------------------
def _bn_relu_kernel(x_ref, sc_ref, sh_ref, o_ref):
    x = x_ref[...].astype(jnp.float32)
    o_ref[...] = jnp.maximum(x * sc_ref[...] + sh_ref[...], 0.0).astype(o_ref.dtype)


def bn_relu_apply(x, scale, shift, out_dtype, th):
    N, Hf, Wf, C = x.shape
    R = Hf // th
    return pl.pallas_call(
        _bn_relu_kernel,
        grid=(N, R),
        in_specs=[
            pl.BlockSpec((1, th, Wf, C), lambda n, r: (n, r, 0, 0)),
            pl.BlockSpec((1, C), lambda n, r: (0, 0)),
            pl.BlockSpec((1, C), lambda n, r: (0, 0)),
        ],
        out_specs=pl.BlockSpec((1, th, Wf, C), lambda n, r: (n, r, 0, 0)),
        out_shape=jax.ShapeDtypeStruct((N, Hf, Wf, C), out_dtype),
        compiler_params=pltpu.CompilerParams(
            dimension_semantics=("parallel", "parallel"),
            vmem_limit_bytes=_VMEM_LIMIT),
    )(x, scale, shift)


def _bn_scale_shift(stats, gamma, beta, count, eps):
    """Reduce per-tile partial sums to train-mode BN scale/shift (biased var)."""
    s = jnp.sum(stats[:, :, 0, :], axis=(0, 1))
    ss = jnp.sum(stats[:, :, 1, :], axis=(0, 1))
    mean = s / count
    var = jnp.maximum(ss / count - mean * mean, 0.0)
    scale = gamma * lax.rsqrt(var + eps)
    shift = beta - mean * scale
    C = gamma.shape[0]
    return scale.reshape(1, C), shift.reshape(1, C)


# ---------------------------------------------------------------------------
# UpBlock forward (params kept in PyTorch layouts, converted here)
# ---------------------------------------------------------------------------
def up_block_forward(x_nchw, skip_nchw, params, *, eps=1e-5):
    N, Cin, H, W = x_nchw.shape
    Chalf = Cin // 2
    Cout = params["conv1_w"].shape[0]

    x = jnp.transpose(x_nchw, (0, 2, 3, 1))          # (N, H, W, Cin)
    skip = jnp.transpose(skip_nchw, (0, 2, 3, 1))    # (N, 2H, 2W, Chalf)

    # --- ConvTranspose2d(Cin, Cin//2, k=2, s=2), pixel shuffle fused ---
    th_up = _pick_rows(H, 4)
    y_up = conv_transpose_2x2(x, params["up_w"], params["up_b"], th=th_up)  # bf16 (N,2H,2W,Chalf)

    Hf, Wf = 2 * H, 2 * W
    th = _pick_rows(Hf, 8)

    # --- conv1 over the *virtual* concat([y_up, skip]) (no concat materialised) ---
    w1 = jnp.transpose(params["conv1_w"], (2, 3, 1, 0))            # (3,3,Cin,Cout) HWIO
    w1a = w1[:, :, :Chalf, :].reshape(9 * Chalf, Cout)             # rows: (dh, dw, ci)
    w1b = w1[:, :, Chalf:, :].reshape(9 * Chalf, Cout)
    w1_mat = jnp.concatenate([w1a, w1b], axis=0).astype(jnp.bfloat16)

    halos1 = [_build_halo(y_up, th), _build_halo(skip, th)]
    c1, stats1 = conv3x3_bn_stats([y_up, skip], halos1, w1_mat, params["conv1_b"],
                                  cout=Cout, out_dtype=jnp.bfloat16, th=th)
    sc1, sh1 = _bn_scale_shift(stats1, params["bn1_g"], params["bn1_b"],
                               count=N * Hf * Wf, eps=eps)

    # --- conv2 with BN1 + ReLU folded into its input stage ---
    w2_mat = jnp.transpose(params["conv2_w"], (2, 3, 1, 0)).reshape(9 * Cout, Cout)
    w2_mat = w2_mat.astype(jnp.bfloat16)
    halos2 = [_build_halo(c1, th)]
    c2, stats2 = conv3x3_bn_stats([c1], halos2, w2_mat, params["conv2_b"],
                                  cout=Cout, out_dtype=jnp.float32, th=th,
                                  in_norm=True, norms=[(sc1, sh1)])
    sc2, sh2 = _bn_scale_shift(stats2, params["bn2_g"], params["bn2_b"],
                               count=N * Hf * Wf, eps=eps)

    out = bn_relu_apply(c2, sc2, sh2, jnp.float32, th)
    return jnp.transpose(out, (0, 3, 1, 2))          # back to NCHW


def init_params(key, in_channels, out_channels):
    chalf = in_channels // 2
    ks = jax.random.split(key, 6)
    return {
        "up_w": 0.1 * jax.random.normal(ks[0], (in_channels, chalf, 2, 2), jnp.float32),
        "up_b": 0.1 * jax.random.normal(ks[1], (chalf,), jnp.float32),
        "conv1_w": 0.1 * jax.random.normal(ks[2], (out_channels, in_channels, 3, 3), jnp.float32),
        "conv1_b": 0.1 * jax.random.normal(ks[3], (out_channels,), jnp.float32),
        "conv2_w": 0.1 * jax.random.normal(ks[4], (out_channels, out_channels, 3, 3), jnp.float32),
        "conv2_b": 0.1 * jax.random.normal(ks[5], (out_channels,), jnp.float32),
        "bn1_g": jnp.ones((out_channels,), jnp.float32),
        "bn1_b": jnp.zeros((out_channels,), jnp.float32),
        "bn2_g": jnp.ones((out_channels,), jnp.float32),
        "bn2_b": jnp.zeros((out_channels,), jnp.float32),
    }


# Pure-JAX (XLA) reference of the PyTorch module, for a loose sanity check.
def _ref_forward(x, skip, params, eps=1e-5):
    up_w, up_b = params["up_w"], params["up_b"]
    N, C, H, W = x.shape
    y = jnp.einsum("nchw,codf->nohdwf", x, up_w)
    y = y.reshape(N, up_w.shape[1], 2 * H, 2 * W) + up_b.reshape(1, -1, 1, 1)
    z = jnp.concatenate([y, skip], axis=1)

    def conv_bn_relu(z, w, b, g, bt):
        c = lax.conv_general_dilated(z, w, (1, 1), "SAME",
                                     dimension_numbers=("NCHW", "OIHW", "NCHW"))
        c = c + b.reshape(1, -1, 1, 1)
        m = jnp.mean(c, axis=(0, 2, 3), keepdims=True)
        v = jnp.mean((c - m) ** 2, axis=(0, 2, 3), keepdims=True)
        cn = (c - m) * lax.rsqrt(v + eps)
        return jnp.maximum(cn * g.reshape(1, -1, 1, 1) + bt.reshape(1, -1, 1, 1), 0.0)

    h1 = conv_bn_relu(z, params["conv1_w"], params["conv1_b"], params["bn1_g"], params["bn1_b"])
    h2 = conv_bn_relu(h1, params["conv2_w"], params["conv2_b"], params["bn2_g"], params["bn2_b"])
    return h2


if __name__ == "__main__":
    in_channels, out_channels = 8, 8
    N, H, W = 2, 8, 8

    key = jax.random.PRNGKey(0)
    kx, ks, kp = jax.random.split(key, 3)
    x = jax.random.normal(kx, (N, in_channels, H, W), jnp.float32)
    skip_x = jax.random.normal(ks, (N, in_channels // 2, 2 * H, 2 * W), jnp.float32)
    params = init_params(kp, in_channels, out_channels)

    out = jax.jit(up_block_forward)(x, skip_x, params)
    out = jax.block_until_ready(out)
    assert out.shape == (N, out_channels, 2 * H, 2 * W), out.shape
    assert bool(jnp.all(jnp.isfinite(out)))

    # loose check vs XLA reference (kernels use bf16 MXU feeds, f32 accumulation)
    ref = _ref_forward(x, skip_x, params)
    err = float(jnp.max(jnp.abs(out - ref)))
    assert err < 0.5, f"max abs diff vs reference too large: {err}"

    print("KERNEL_OK")
</pallas_src>

<mosaic_0001>
module attributes {stable_mosaic.version = 11 : i64} {
  func.func @_up_kernel(%arg0: i32, %arg1: i32, %arg2: memref<1x4x8x8xf32, #tpu.memory_space<vmem>>, %arg3: memref<2x8x8xbf16, #tpu.memory_space<vmem>>, %arg4: memref<1x8xf32, #tpu.memory_space<vmem>>, %arg5: memref<1x4x2x8x8xbf16, #tpu.memory_space<vmem>>) attributes {dimension_semantics = [#tpu.dimension_semantics<parallel>, #tpu.dimension_semantics<parallel>], iteration_bounds = array<i64: 2, 2>, scalar_prefetch = 0 : i64, scratch_operands = 0 : i64, tpu.core_type = #tpu.core_type<tc>, window_params = [{transform_indices = @transform_0, window_bounds = array<i64: 1, 4, 8, 8>}, {pipeline_mode = #tpu.pipeline_mode<synchronous>, transform_indices = @transform_1, window_bounds = array<i64: 2, 8, 8>}, {pipeline_mode = #tpu.pipeline_mode<synchronous>, transform_indices = @transform_2, window_bounds = array<i64: 1, 8>}, {transform_indices = @transform_3, window_bounds = array<i64: 1, 4, 2, 8, 8>}]} {
    %c0 = arith.constant 0 : index
    %c0_0 = arith.constant 0 : index
    %c0_1 = arith.constant 0 : index
    %c0_2 = arith.constant 0 : index
    %0 = vector.load %arg2[%c0, %c0_0, %c0_1, %c0_2] : memref<1x4x8x8xf32, #tpu.memory_space<vmem>>, vector<1x4x8x8xf32>
    %1 = vector.shape_cast %0 : vector<1x4x8x8xf32> to vector<4x8x8xf32>
    %2 = vector.shape_cast %1 : vector<4x8x8xf32> to vector<32x8xf32>
    %3 = arith.truncf %2 : vector<32x8xf32> to vector<32x8xbf16>
    %c0_3 = arith.constant 0 : index
    %c0_4 = arith.constant 0 : index
    %c0_5 = arith.constant 0 : index
    %4 = vector.load %arg3[%c0_3, %c0_4, %c0_5] : memref<2x8x8xbf16, #tpu.memory_space<vmem>>, vector<1x8x8xbf16>
    %5 = vector.shape_cast %4 : vector<1x8x8xbf16> to vector<8x8xbf16>
    %cst = arith.constant dense<0.000000e+00> : vector<32x8xf32>
    %6 = tpu.matmul %3, %5, %cst {dimension_numbers = #tpu.dot_dimension_numbers<[1], [0], [0], [1], [0, 0, 1, 1], [], []>} : vector<32x8xbf16>, vector<8x8xbf16>, vector<32x8xf32> -> vector<32x8xf32>
    %c0_6 = arith.constant 0 : index
    %c0_7 = arith.constant 0 : index
    %7 = vector.load %arg4[%c0_6, %c0_7] : memref<1x8xf32, #tpu.memory_space<vmem>>, vector<1x8xf32>
    %8 = vector.broadcast %7 : vector<1x8xf32> to vector<32x8xf32>
    %9 = arith.addf %6, %8 : vector<32x8xf32>
    %10 = vector.shape_cast %9 : vector<32x8xf32> to vector<4x8x8xf32>
    %11 = arith.truncf %10 : vector<4x8x8xf32> to vector<4x8x8xbf16>
    %c0_8 = arith.constant 0 : index
    %c0_9 = arith.constant 0 : index
    %c0_10 = arith.constant 0 : index
    %c0_11 = arith.constant 0 : index
    %c0_12 = arith.constant 0 : index
    %12 = vector.load %arg5[%c0_8, %c0_9, %c0_10, %c0_11, %c0_12] : memref<1x4x2x8x8xbf16, #tpu.memory_space<vmem>>, vector<1x4x1x8x8xbf16>
    %13 = vector.shape_cast %12 : vector<1x4x1x8x8xbf16> to vector<4x8x8xbf16>
    %14 = vector.shape_cast %11 : vector<4x8x8xbf16> to vector<1x4x1x8x8xbf16>
    tpu.vector_store %arg5[%c0_8, %c0_9, %c0_10, %c0_11, %c0_12], %14 {strides = array<i32>} : memref<1x4x2x8x8xbf16, #tpu.memory_space<vmem>>, vector<1x4x1x8x8xbf16>,
    %c1 = arith.constant 1 : index
    %c0_13 = arith.constant 0 : index
    %c0_14 = arith.constant 0 : index
    %15 = vector.load %arg3[%c1, %c0_13, %c0_14] : memref<2x8x8xbf16, #tpu.memory_space<vmem>>, vector<1x8x8xbf16>
    %16 = vector.shape_cast %15 : vector<1x8x8xbf16> to vector<8x8xbf16>
    %cst_15 = arith.constant dense<0.000000e+00> : vector<32x8xf32>
    %17 = tpu.matmul %3, %16, %cst_15 {dimension_numbers = #tpu.dot_dimension_numbers<[1], [0], [0], [1], [0, 0, 1, 1], [], []>} : vector<32x8xbf16>, vector<8x8xbf16>, vector<32x8xf32> -> vector<32x8xf32>
    %c0_16 = arith.constant 0 : index
    %c0_17 = arith.constant 0 : index
    %18 = vector.load %arg4[%c0_16, %c0_17] : memref<1x8xf32, #tpu.memory_space<vmem>>, vector<1x8xf32>
    %19 = vector.broadcast %18 : vector<1x8xf32> to vector<32x8xf32>
    %20 = arith.addf %17, %19 : vector<32x8xf32>
    %21 = vector.shape_cast %20 : vector<32x8xf32> to vector<4x8x8xf32>
    %22 = arith.truncf %21 : vector<4x8x8xf32> to vector<4x8x8xbf16>
    %c0_18 = arith.constant 0 : index
    %c0_19 = arith.constant 0 : index
    %c1_20 = arith.constant 1 : index
    %c0_21 = arith.constant 0 : index
    %c0_22 = arith.constant 0 : index
    %23 = vector.load %arg5[%c0_18, %c0_19, %c1_20, %c0_21, %c0_22] : memref<1x4x2x8x8xbf16, #tpu.memory_space<vmem>>, vector<1x4x1x8x8xbf16>
    %24 = vector.shape_cast %23 : vector<1x4x1x8x8xbf16> to vector<4x8x8xbf16>
    %25 = vector.shape_cast %22 : vector<4x8x8xbf16> to vector<1x4x1x8x8xbf16>
    tpu.vector_store %arg5[%c0_18, %c0_19, %c1_20, %c0_21, %c0_22], %25 {strides = array<i32>} : memref<1x4x2x8x8xbf16, #tpu.memory_space<vmem>>, vector<1x4x1x8x8xbf16>,
    return
  }
  func.func @transform_0(%arg0: i32, %arg1: i32) -> (i32, i32, i32, i32) {
    %c0_i32 = arith.constant 0 : i32
    %c0_i32_0 = arith.constant 0 : i32
    %c0_i32_1 = arith.constant 0 : i32
    return %arg0, %arg1, %c0_i32, %c0_i32_0 : i32, i32, i32, i32
  }
  func.func @transform_1(%arg0: i32, %arg1: i32) -> (i32, i32, i32) {
    %c0_i32 = arith.constant 0 : i32
    %c0_i32_0 = arith.constant 0 : i32
    %c0_i32_1 = arith.constant 0 : i32
    %c0_i32_2 = arith.constant 0 : i32
    return %c0_i32, %c0_i32_0, %c0_i32_1 : i32, i32, i32
  }
  func.func @transform_2(%arg0: i32, %arg1: i32) -> (i32, i32) {
    %c0_i32 = arith.constant 0 : i32
    %c0_i32_0 = arith.constant 0 : i32
    %c0_i32_1 = arith.constant 0 : i32
    return %c0_i32, %c0_i32_0 : i32, i32
  }
  func.func @transform_3(%arg0: i32, %arg1: i32) -> (i32, i32, i32, i32, i32) {
    %c0_i32 = arith.constant 0 : i32
    %c0_i32_0 = arith.constant 0 : i32
    %c0_i32_1 = arith.constant 0 : i32
    %c0_i32_2 = arith.constant 0 : i32
    return %arg0, %arg1, %c0_i32, %c0_i32_0, %c0_i32_1 : i32, i32, i32, i32, i32
  }
}

module attributes {stable_mosaic.version = 11 : i64} {
  func.func @_conv3x3_cat_kernel(%arg0: i32, %arg1: i32, %arg2: memref<1x8x16x4xbf16, #tpu.memory_space<vmem>>, %arg3: memref<1x1x2x16x4xbf16, #tpu.memory_space<vmem>>, %arg4: memref<1x8x16x4xf32, #tpu.memory_space<vmem>>, %arg5: memref<1x1x2x16x4xf32, #tpu.memory_space<vmem>>, %arg6: memref<72x8xbf16, #tpu.memory_space<vmem>>, %arg7: memref<1x8xf32, #tpu.memory_space<vmem>>, %arg8: memref<1x8x16x8xbf16, #tpu.memory_space<vmem>>, %arg9: memref<1x1x2x8xf32, #tpu.memory_space<vmem>>, %arg10: memref<10x18x4xf32, #tpu.memory_space<vmem>>, %arg11: memref<10x18x4xf32, #tpu.memory_space<vmem>>, %arg12: memref<128x72xbf16, #tpu.memory_space<vmem>>) attributes {dimension_semantics = [#tpu.dimension_semantics<parallel>, #tpu.dimension_semantics<parallel>], iteration_bounds = array<i64: 2, 2>, scalar_prefetch = 0 : i64, scratch_operands = 3 : i64, tpu.core_type = #tpu.core_type<tc>, window_params = [{transform_indices = @transform_0, window_bounds = array<i64: 1, 8, 16, 4>}, {transform_indices = @transform_1, window_bounds = array<i64: 1, 1, 2, 16, 4>}, {transform_indices = @transform_2, window_bounds = array<i64: 1, 8, 16, 4>}, {transform_indices = @transform_3, window_bounds = array<i64: 1, 1, 2, 16, 4>}, {pipeline_mode = #tpu.pipeline_mode<synchronous>, transform_indices = @transform_4, window_bounds = array<i64: 72, 8>}, {pipeline_mode = #tpu.pipeline_mode<synchronous>, transform_indices = @transform_5, window_bounds = array<i64: 1, 8>}, {transform_indices = @transform_6, window_bounds = array<i64: 1, 8, 16, 8>}, {transform_indices = @transform_7, window_bounds = array<i64: 1, 1, 2, 8>}]} {
    %cst = arith.constant 0.000000e+00 : f32
    %0 = vector.broadcast %cst : f32 to vector<10x18x4xf32>
    %c0 = arith.constant 0 : index
    %c0_0 = arith.constant 0 : index
    %c0_1 = arith.constant 0 : index
    %1 = vector.load %arg10[%c0, %c0_0, %c0_1] : memref<10x18x4xf32, #tpu.memory_space<vmem>>, vector<10x18x4xf32>
    tpu.vector_store %arg10[%c0, %c0_0, %c0_1], %0 {strides = array<i32>} : memref<10x18x4xf32, #tpu.memory_space<vmem>>, vector<10x18x4xf32>,
    %c0_2 = arith.constant 0 : index
    %c0_3 = arith.constant 0 : index
    %c0_4 = arith.constant 0 : index
    %c0_5 = arith.constant 0 : index
    %2 = vector.load %arg2[%c0_2, %c0_3, %c0_4, %c0_5] : memref<1x8x16x4xbf16, #tpu.memory_space<vmem>>, vector<1x8x16x4xbf16>
    %3 = vector.shape_cast %2 : vector<1x8x16x4xbf16> to vector<8x16x4xbf16>
    %c0_6 = arith.constant 0 : index
    %c0_7 = arith.constant 0 : index
    %c0_8 = arith.constant 0 : index
    %c0_9 = arith.constant 0 : index
    %c0_10 = arith.constant 0 : index
    %4 = vector.load %arg3[%c0_6, %c0_7, %c0_8, %c0_9, %c0_10] : memref<1x1x2x16x4xbf16, #tpu.memory_space<vmem>>, vector<1x1x1x16x4xbf16>
    %5 = vector.shape_cast %4 : vector<1x1x1x16x4xbf16> to vector<16x4xbf16>
    %c0_11 = arith.constant 0 : index
    %c0_12 = arith.constant 0 : index
    %c1 = arith.constant 1 : index
    %c0_13 = arith.constant 0 : index
    %c0_14 = arith.constant 0 : index
    %6 = vector.load %arg3[%c0_11, %c0_12, %c1, %c0_13, %c0_14] : memref<1x1x2x16x4xbf16, #tpu.memory_space<vmem>>, vector<1x1x1x16x4xbf16>
    %7 = vector.shape_cast %6 : vector<1x1x1x16x4xbf16> to vector<16x4xbf16>
    %8 = arith.extf %3 : vector<8x16x4xbf16> to vector<8x16x4xf32>
    %c1_15 = arith.constant 1 : index
    %c1_16 = arith.constant 1 : index
    %c0_17 = arith.constant 0 : index
    %9 = vector.load %arg10[%c1_15, %c1_16, %c0_17] : memref<10x18x4xf32, #tpu.memory_space<vmem>>, vector<8x16x4xf32>
    tpu.vector_store %arg10[%c1_15, %c1_16, %c0_17], %8 {strides = array<i32>} : memref<10x18x4xf32, #tpu.memory_space<vmem>>, vector<8x16x4xf32>,
    %10 = arith.extf %5 : vector<16x4xbf16> to vector<16x4xf32>
    %c0_18 = arith.constant 0 : index
    %c1_19 = arith.constant 1 : index
    %c0_20 = arith.constant 0 : index
    %11 = vector.load %arg10[%c0_18, %c1_19, %c0_20] : memref<10x18x4xf32, #tpu.memory_space<vmem>>, vector<1x16x4xf32>
    %12 = vector.shape_cast %11 : vector<1x16x4xf32> to vector<16x4xf32>
    %13 = vector.shape_cast %10 : vector<16x4xf32> to vector<1x16x4xf32>
    tpu.vector_store %arg10[%c0_18, %c1_19, %c0_20], %13 {strides = array<i32>} : memref<10x18x4xf32, #tpu.memory_space<vmem>>, vector<1x16x4xf32>,
    %14 = arith.extf %7 : vector<16x4xbf16> to vector<16x4xf32>
    %c9 = arith.constant 9 : index
    %c1_21 = arith.constant 1 : index
    %c0_22 = arith.constant 0 : index
    %15 = vector.load %arg10[%c9, %c1_21, %c0_22] : memref<10x18x4xf32, #tpu.memory_space<vmem>>, vector<1x16x4xf32>
    %16 = vector.shape_cast %15 : vector<1x16x4xf32> to vector<16x4xf32>
    %17 = vector.shape_cast %14 : vector<16x4xf32> to vector<1x16x4xf32>
    tpu.vector_store %arg10[%c9, %c1_21, %c0_22], %17 {strides = array<i32>} : memref<10x18x4xf32, #tpu.memory_space<vmem>>, vector<1x16x4xf32>,
    %c0_23 = arith.constant 0 : index
    %c0_24 = arith.constant 0 : index
    %c0_25 = arith.constant 0 : index
    %18 = vector.load %arg10[%c0_23, %c0_24, %c0_25] : memref<10x18x4xf32, #tpu.memory_space<vmem>>, vector<8x16x4xf32>
    %19 = vector.shape_cast %18 : vector<8x16x4xf32> to vector<128x4xf32>
    %20 = arith.truncf %19 : vector<128x4xf32> to vector<128x4xbf16>
    %c0_26 = arith.constant 0 : index
    %c0_27 = arith.constant 0 : index
    %21 = vector.load %arg12[%c0_26, %c0_27] : memref<128x72xbf16, #tpu.memory_space<vmem>>, vector<128x4xbf16>
    tpu.vector_store %arg12[%c0_26, %c0_27], %20 {strides = array<i32>} : memref<128x72xbf16, #tpu.memory_space<vmem>>, vector<128x4xbf16>,
    %c0_28 = arith.constant 0 : index
    %c1_29 = arith.constant 1 : index
    %c0_30 = arith.constant 0 : index
    %22 = vector.load %arg10[%c0_28, %c1_29, %c0_30] : memref<10x18x4xf32, #tpu.memory_space<vmem>>, vector<8x16x4xf32>
    %23 = vector.shape_cast %22 : vector<8x16x4xf32> to vector<128x4xf32>
    %24 = arith.truncf %23 : vector<128x4xf32> to vector<128x4xbf16>
    %c0_31 = arith.constant 0 : index
    %c4 = arith.constant 4 : index
    %25 = vector.load %arg12[%c0_31, %c4] : memref<128x72xbf16, #tpu.memory_space<vmem>>, vector<128x4xbf16>
    tpu.vector_store %arg12[%c0_31, %c4], %24 {strides = array<i32>} : memref<128x72xbf16, #tpu.memory_space<vmem>>, vector<128x4xbf16>,
    %c0_32 = arith.constant 0 : index
    %c2 = arith.constant 2 : index
    %c0_33 = arith.constant 0 : index
    %26 = vector.load %arg10[%c0_32, %c2, %c0_33] : memref<10x18x4xf32, #tpu.memory_space<vmem>>, vector<8x16x4xf32>
    %27 = vector.shape_cast %26 : vector<8x16x4xf32> to vector<128x4xf32>
    %28 = arith.truncf %27 : vector<128x4xf32> to vector<128x4xbf16>
    %c0_34 = arith.constant 0 : index
    %c8 = arith.constant 8 : index
    %29 = vector.load %arg12[%c0_34, %c8] : memref<128x72xbf16, #tpu.memory_space<vmem>>, vector<128x4xbf16>
    tpu.vector_store %arg12[%c0_34, %c8], %28 {strides = array<i32>} : memref<128x72xbf16, #tpu.memory_space<vmem>>, vector<128x4xbf16>,
    %c1_35 = arith.constant 1 : index
    %c0_36 = arith.constant 0 : index
    %c0_37 = arith.constant 0 : index
    %30 = vector.load %arg10[%c1_35, %c0_36, %c0_37] : memref<10x18x4xf32, #tpu.memory_space<vmem>>, vector<8x16x4xf32>
    %31 = vector.shape_cast %30 : vector<8x16x4xf32> to vector<128x4xf32>
    %32 = arith.truncf %31 : vector<128x4xf32> to vector<128x4xbf16>
    %c0_38 = arith.constant 0 : index
    %c12 = arith.constant 12 : index
    %33 = vector.load %arg12[%c0_38, %c12] : memref<128x72xbf16, #tpu.memory_space<vmem>>, vector<128x4xbf16>
    tpu.vector_store %arg12[%c0_38, %c12], %32 {strides = array<i32>} : memref<128x72xbf16, #tpu.memory_space<vmem>>, vector<128x4xbf16>,
    %c1_39 = arith.constant 1 : index
    %c1_40 = arith.constant 1 : index
    %c0_41 = arith.constant 0 : index
    %34 = vector.load %arg10[%c1_39, %c1_40, %c0_41] : memref<10x18x4xf32, #tpu.memory_space<vmem>>, vector<8x16x4xf32>
    %35 = vector.shape_cast %34 : vector<8x16x4xf32> to vector<128x4xf32>
    %36 = arith.truncf %35 : vector<128x4xf32> to vector<128x4xbf16>
    %c0_42 = arith.constant 0 : index
    %c16 = arith.constant 16 : index
    %37 = vector.load %arg12[%c0_42, %c16] : memref<128x72xbf16, #tpu.memory_space<vmem>>, vector<128x4xbf16>
    tpu.vector_store %arg12[%c0_42, %c16], %36 {strides = array<i32>} : memref<128x72xbf16, #tpu.memory_space<vmem>>, vector<128x4xbf16>,
    %c1_43 = arith.constant 1 : index
    %c2_44 = arith.constant 2 : index
    %c0_45 = arith.constant 0 : index
    %38 = vector.load %arg10[%c1_43, %c2_44, %c0_45] : memref<10x18x4xf32, #tpu.memory_space<vmem>>, vector<8x16x4xf32>
    %39 = vector.shape_cast %38 : vector<8x16x4xf32> to vector<128x4xf32>
    %40 = arith.truncf %39 : vector<128x4xf32> to vector<128x4xbf16>
    %c0_46 = arith.constant 0 : index
    %c20 = arith.constant 20 : index
    %41 = vector.load %arg12[%c0_46, %c20] : memref<128x72xbf16, #tpu.memory_space<vmem>>, vector<128x4xbf16>
    tpu.vector_store %arg12[%c0_46, %c20], %40 {strides = array<i32>} : memref<128x72xbf16, #tpu.memory_space<vmem>>, vector<128x4xbf16>,
    %c2_47 = arith.constant 2 : index
    %c0_48 = arith.constant 0 : index
    %c0_49 = arith.constant 0 : index
    %42 = vector.load %arg10[%c2_47, %c0_48, %c0_49] : memref<10x18x4xf32, #tpu.memory_space<vmem>>, vector<8x16x4xf32>
    %43 = vector.shape_cast %42 : vector<8x16x4xf32> to vector<128x4xf32>
    %44 = arith.truncf %43 : vector<128x4xf32> to vector<128x4xbf16>
    %c0_50 = arith.constant 0 : index
    %c24 = arith.constant 24 : index
    %45 = vector.load %arg12[%c0_50, %c24] : memref<128x72xbf16, #tpu.memory_space<vmem>>, vector<128x4xbf16>
    tpu.vector_store %arg12[%c0_50, %c24], %44 {strides = array<i32>} : memref<128x72xbf16, #tpu.memory_space<vmem>>, vector<128x4xbf16>,
    %c2_51 = arith.constant 2 : index
    %c1_52 = arith.constant 1 : index
    %c0_53 = arith.constant 0 : index
    %46 = vector.load %arg10[%c2_51, %c1_52, %c0_53] : memref<10x18x4xf32, #tpu.memory_space<vmem>>, vector<8x16x4xf32>
    %47 = vector.shape_cast %46 : vector<8x16x4xf32> to vector<128x4xf32>
    %48 = arith.truncf %47 : vector<128x4xf32> to vector<128x4xbf16>
    %c0_54 = arith.constant 0 : index
    %c28 = arith.constant 28 : index
    %49 = vector.load %arg12[%c0_54, %c28] : memref<128x72xbf16, #tpu.memory_space<vmem>>, vector<128x4xbf16>
    tpu.vector_store %arg12[%c0_54, %c28], %48 {strides = array<i32>} : memref<128x72xbf16, #tpu.memory_space<vmem>>, vector<128x4xbf16>,
    %c2_55 = arith.constant 2 : index
    %c2_56 = arith.constant 2 : index
    %c0_57 = arith.constant 0 : index
    %50 = vector.load %arg10[%c2_55, %c2_56, %c0_57] : memref<10x18x4xf32, #tpu.memory_space<vmem>>, vector<8x16x4xf32>
    %51 = vector.shape_cast %50 : vector<8x16x4xf32> to vector<128x4xf32>
    %52 = arith.truncf %51 : vector<128x4xf32> to vector<128x4xbf16>
    %c0_58 = arith.constant 0 : index
    %c32 = arith.constant 32 : index
    %53 = vector.load %arg12[%c0_58, %c32] : memref<128x72xbf16, #tpu.memory_space<vmem>>, vector<128x4xbf16>
    tpu.vector_store %arg12[%c0_58, %c32], %52 {strides = array<i32>} : memref<128x72xbf16, #tpu.memory_space<vmem>>, vector<128x4xbf16>,
    %cst_59 = arith.constant 0.000000e+00 : f32
    %54 = vector.broadcast %cst_59 : f32 to vector<10x18x4xf32>
    %c0_60 = arith.constant 0 : index
    %c0_61 = arith.constant 0 : index
    %c0_62 = arith.constant 0 : index
    %55 = vector.load %arg11[%c0_60, %c0_61, %c0_62] : memref<10x18x4xf32, #tpu.memory_space<vmem>>, vector<10x18x4xf32>
    tpu.vector_store %arg11[%c0_60, %c0_61, %c0_62], %54 {strides = array<i32>} : memref<10x18x4xf32, #tpu.memory_space<vmem>>, vector<10x18x4xf32>,
    %c0_63 = arith.constant 0 : index
    %c0_64 = arith.constant 0 : index
    %c0_65 = arith.constant 0 : index
    %c0_66 = arith.constant 0 : index
    %56 = vector.load %arg4[%c0_63, %c0_64, %c0_65, %c0_66] : memref<1x8x16x4xf32, #tpu.memory_space<vmem>>, vector<1x8x16x4xf32>
    %57 = vector.shape_cast %56 : vector<1x8x16x4xf32> to vector<8x16x4xf32>
    %c0_67 = arith.constant 0 : index
    %c0_68 = arith.constant 0 : index
    %c0_69 = arith.constant 0 : index
    %c0_70 = arith.constant 0 : index
    %c0_71 = arith.constant 0 : index
    %58 = vector.load %arg5[%c0_67, %c0_68, %c0_69, %c0_70, %c0_71] : memref<1x1x2x16x4xf32, #tpu.memory_space<vmem>>, vector<1x1x1x16x4xf32>
    %59 = vector.shape_cast %58 : vector<1x1x1x16x4xf32> to vector<16x4xf32>
    %c0_72 = arith.constant 0 : index
    %c0_73 = arith.constant 0 : index
    %c1_74 = arith.constant 1 : index
    %c0_75 = arith.constant 0 : index
    %c0_76 = arith.constant 0 : index
    %60 = vector.load %arg5[%c0_72, %c0_73, %c1_74, %c0_75, %c0_76] : memref<1x1x2x16x4xf32, #tpu.memory_space<vmem>>, vector<1x1x1x16x4xf32>
    %61 = vector.shape_cast %60 : vector<1x1x1x16x4xf32> to vector<16x4xf32>
    %c1_77 = arith.constant 1 : index
    %c1_78 = arith.constant 1 : index
    %c0_79 = arith.constant 0 : index
    %62 = vector.load %arg11[%c1_77, %c1_78, %c0_79] : memref<10x18x4xf32, #tpu.memory_space<vmem>>, vector<8x16x4xf32>
    tpu.vector_store %arg11[%c1_77, %c1_78, %c0_79], %57 {strides = array<i32>} : memref<10x18x4xf32, #tpu.memory_space<vmem>>, vector<8x16x4xf32>,
    %c0_80 = arith.constant 0 : index
    %c1_81 = arith.constant 1 : index
    %c0_82 = arith.constant 0 : index
    %63 = vector.load %arg11[%c0_80, %c1_81, %c0_82] : memref<10x18x4xf32, #tpu.memory_space<vmem>>, vector<1x16x4xf32>
    %64 = vector.shape_cast %63 : vector<1x16x4xf32> to vector<16x4xf32>
    %65 = vector.shape_cast %59 : vector<16x4xf32> to vector<1x16x4xf32>
    tpu.vector_store %arg11[%c0_80, %c1_81, %c0_82], %65 {strides = array<i32>} : memref<10x18x4xf32, #tpu.memory_space<vmem>>, vector<1x16x4xf32>,
    %c9_83 = arith.constant 9 : index
    %c1_84 = arith.constant 1 : index
    %c0_85 = arith.constant 0 : index
    %66 = vector.load %arg11[%c9_83, %c1_84, %c0_85] : memref<10x18x4xf32, #tpu.memory_space<vmem>>, vector<1x16x4xf32>
    %67 = vector.shape_cast %66 : vector<1x16x4xf32> to vector<16x4xf32>
    %68 = vector.shape_cast %61 : vector<16x4xf32> to vector<1x16x4xf32>
    tpu.vector_store %arg11[%c9_83, %c1_84, %c0_85], %68 {strides = array<i32>} : memref<10x18x4xf32, #tpu.memory_space<vmem>>, vector<1x16x4xf32>,
    %c0_86 = arith.constant 0 : index
    %c0_87 = arith.constant 0 : index
    %c0_88 = arith.constant 0 : index
    %69 = vector.load %arg11[%c0_86, %c0_87, %c0_88] : memref<10x18x4xf32, #tpu.memory_space<vmem>>, vector<8x16x4xf32>
    %70 = vector.shape_cast %69 : vector<8x16x4xf32> to vector<128x4xf32>
    %71 = arith.truncf %70 : vector<128x4xf32> to vector<128x4xbf16>
    %c0_89 = arith.constant 0 : index
    %c36 = arith.constant 36 : index
    %72 = vector.load %arg12[%c0_89, %c36] : memref<128x72xbf16, #tpu.memory_space<vmem>>, vector<128x4xbf16>
    tpu.vector_store %arg12[%c0_89, %c36], %71 {strides = array<i32>} : memref<128x72xbf16, #tpu.memory_space<vmem>>, vector<128x4xbf16>,
    %c0_90 = arith.constant 0 : index
    %c1_91 = arith.constant 1 : index
    %c0_92 = arith.constant 0 : index
    %73 = vector.load %arg11[%c0_90, %c1_91, %c0_92] : memref<10x18x4xf32, #tpu.memory_space<vmem>>, vector<8x16x4xf32>
    %74 = vector.shape_cast %73 : vector<8x16x4xf32> to vector<128x4xf32>
    %75 = arith.truncf %74 : vector<128x4xf32> to vector<128x4xbf16>
    %c0_93 = arith.constant 0 : index
    %c40 = arith.constant 40 : index
    %76 = vector.load %arg12[%c0_93, %c40] : memref<128x72xbf16, #tpu.memory_space<vmem>>, vector<128x4xbf16>
    tpu.vector_store %arg12[%c0_93, %c40], %75 {strides = array<i32>} : memref<128x72xbf16, #tpu.memory_space<vmem>>, vector<128x4xbf16>,
    %c0_94 = arith.constant 0 : index
    %c2_95 = arith.constant 2 : index
    %c0_96 = arith.constant 0 : index
    %77 = vector.load %arg11[%c0_94, %c2_95, %c0_96] : memref<10x18x4xf32, #tpu.memory_space<vmem>>, vector<8x16x4xf32>
    %78 = vector.shape_cast %77 : vector<8x16x4xf32> to vector<128x4xf32>
    %79 = arith.truncf %78 : vector<128x4xf32> to vector<128x4xbf16>
    %c0_97 = arith.constant 0 : index
    %c44 = arith.constant 44 : index
    %80 = vector.load %arg12[%c0_97, %c44] : memref<128x72xbf16, #tpu.memory_space<vmem>>, vector<128x4xbf16>
    tpu.vector_store %arg12[%c0_97, %c44], %79 {strides = array<i32>} : memref<128x72xbf16, #tpu.memory_space<vmem>>, vector<128x4xbf16>,
    %c1_98 = arith.constant 1 : index
    %c0_99 = arith.constant 0 : index
    %c0_100 = arith.constant 0 : index
    %81 = vector.load %arg11[%c1_98, %c0_99, %c0_100] : memref<10x18x4xf32, #tpu.memory_space<vmem>>, vector<8x16x4xf32>
    %82 = vector.shape_cast %81 : vector<8x16x4xf32> to vector<128x4xf32>
    %83 = arith.truncf %82 : vector<128x4xf32> to vector<128x4xbf16>
    %c0_101 = arith.constant 0 : index
    %c48 = arith.constant 48 : index
    %84 = vector.load %arg12[%c0_101, %c48] : memref<128x72xbf16, #tpu.memory_space<vmem>>, vector<128x4xbf16>
    tpu.vector_store %arg12[%c0_101, %c48], %83 {strides = array<i32>} : memref<128x72xbf16, #tpu.memory_space<vmem>>, vector<128x4xbf16>,
    %c1_102 = arith.constant 1 : index
    %c1_103 = arith.constant 1 : index
    %c0_104 = arith.constant 0 : index
    %85 = vector.load %arg11[%c1_102, %c1_103, %c0_104] : memref<10x18x4xf32, #tpu.memory_space<vmem>>, vector<8x16x4xf32>
    %86 = vector.shape_cast %85 : vector<8x16x4xf32> to vector<128x4xf32>
    %87 = arith.truncf %86 : vector<128x4xf32> to vector<128x4xbf16>
    %c0_105 = arith.constant 0 : index
    %c52 = arith.constant 52 : index
    %88 = vector.load %arg12[%c0_105, %c52] : memref<128x72xbf16, #tpu.memory_space<vmem>>, vector<128x4xbf16>
    tpu.vector_store %arg12[%c0_105, %c52], %87 {strides = array<i32>} : memref<128x72xbf16, #tpu.memory_space<vmem>>, vector<128x4xbf16>,
    %c1_106 = arith.constant 1 : index
    %c2_107 = arith.constant 2 : index
    %c0_108 = arith.constant 0 : index
    %89 = vector.load %arg11[%c1_106, %c2_107, %c0_108] : memref<10x18x4xf32, #tpu.memory_space<vmem>>, vector<8x16x4xf32>
    %90 = vector.shape_cast %89 : vector<8x16x4xf32> to vector<128x4xf32>
    %91 = arith.truncf %90 : vector<128x4xf32> to vector<128x4xbf16>
    %c0_109 = arith.constant 0 : index
    %c56 = arith.constant 56 : index
    %92 = vector.load %arg12[%c0_109, %c56] : memref<128x72xbf16, #tpu.memory_space<vmem>>, vector<128x4xbf16>
    tpu.vector_store %arg12[%c0_109, %c56], %91 {strides = array<i32>} : memref<128x72xbf16, #tpu.memory_space<vmem>>, vector<128x4xbf16>,
    %c2_110 = arith.constant 2 : index
    %c0_111 = arith.constant 0 : index
    %c0_112 = arith.constant 0 : index
    %93 = vector.load %arg11[%c2_110, %c0_111, %c0_112] : memref<10x18x4xf32, #tpu.memory_space<vmem>>, vector<8x16x4xf32>
    %94 = vector.shape_cast %93 : vector<8x16x4xf32> to vector<128x4xf32>
    %95 = arith.truncf %94 : vector<128x4xf32> to vector<128x4xbf16>
    %c0_113 = arith.constant 0 : index
    %c60 = arith.constant 60 : index
    %96 = vector.load %arg12[%c0_113, %c60] : memref<128x72xbf16, #tpu.memory_space<vmem>>, vector<128x4xbf16>
    tpu.vector_store %arg12[%c0_113, %c60], %95 {strides = array<i32>} : memref<128x72xbf16, #tpu.memory_space<vmem>>, vector<128x4xbf16>,
    %c2_114 = arith.constant 2 : index
    %c1_115 = arith.constant 1 : index
    %c0_116 = arith.constant 0 : index
    %97 = vector.load %arg11[%c2_114, %c1_115, %c0_116] : memref<10x18x4xf32, #tpu.memory_space<vmem>>, vector<8x16x4xf32>
    %98 = vector.shape_cast %97 : vector<8x16x4xf32> to vector<128x4xf32>
    %99 = arith.truncf %98 : vector<128x4xf32> to vector<128x4xbf16>
    %c0_117 = arith.constant 0 : index
    %c64 = arith.constant 64 : index
    %100 = vector.load %arg12[%c0_117, %c64] : memref<128x72xbf16, #tpu.memory_space<vmem>>, vector<128x4xbf16>
    tpu.vector_store %arg12[%c0_117, %c64], %99 {strides = array<i32>} : memref<128x72xbf16, #tpu.memory_space<vmem>>, vector<128x4xbf16>,
    %c2_118 = arith.constant 2 : index
    %c2_119 = arith.constant 2 : index
    %c0_120 = arith.constant 0 : index
    %101 = vector.load %arg11[%c2_118, %c2_119, %c0_120] : memref<10x18x4xf32, #tpu.memory_space<vmem>>, vector<8x16x4xf32>
    %102 = vector.shape_cast %101 : vector<8x16x4xf32> to vector<128x4xf32>
    %103 = arith.truncf %102 : vector<128x4xf32> to vector<128x4xbf16>
    %c0_121 = arith.constant 0 : index
    %c68 = arith.constant 68 : index
    %104 = vector.load %arg12[%c0_121, %c68] : memref<128x72xbf16, #tpu.memory_space<vmem>>, vector<128x4xbf16>
    tpu.vector_store %arg12[%c0_121, %c68], %103 {strides = array<i32>} : memref<128x72xbf16, #tpu.memory_space<vmem>>, vector<128x4xbf16>,
    %c0_122 = arith.constant 0 : index
    %c0_123 = arith.constant 0 : index
    %105 = vector.load %arg12[%c0_122, %c0_123] : memref<128x72xbf16, #tpu.memory_space<vmem>>, vector<128x72xbf16>
    %c0_124 = arith.constant 0 : index
    %c0_125 = arith.constant 0 : index
    %106 = vector.load %arg6[%c0_124, %c0_125] : memref<72x8xbf16, #tpu.memory_space<vmem>>, vector<72x8xbf16>
    %cst_126 = arith.constant dense<0.000000e+00> : vector<128x8xf32>
    %107 = tpu.matmul %105, %106, %cst_126 {dimension_numbers = #tpu.dot_dimension_numbers<[1], [0], [0], [1], [0, 0, 1, 1], [], []>} : vector<128x72xbf16>, vector<72x8xbf16>, vector<128x8xf32> -> vector<128x8xf32>
    %c0_127 = arith.constant 0 : index
    %c0_128 = arith.constant 0 : index
    %108 = vector.load %arg7[%c0_127, %c0_128] : memref<1x8xf32, #tpu.memory_space<vmem>>, vector<1x8xf32>
    %109 = vector.broadcast %108 : vector<1x8xf32> to vector<128x8xf32>
    %110 = arith.addf %107, %109 : vector<128x8xf32>
    %111 = vector.shape_cast %110 : vector<128x8xf32> to vector<1x8x16x8xf32>
    %112 = arith.truncf %111 : vector<1x8x16x8xf32> to vector<1x8x16x8xbf16>
    %c0_129 = arith.constant 0 : index
    %c0_130 = arith.constant 0 : index
    %c0_131 = arith.constant 0 : index
    %c0_132 = arith.constant 0 : index
    %113 = vector.load %arg8[%c0_129, %c0_130, %c0_131, %c0_132] : memref<1x8x16x8xbf16, #tpu.memory_space<vmem>>, vector<1x8x16x8xbf16>
    tpu.vector_store %arg8[%c0_129, %c0_130, %c0_131, %c0_132], %112 {strides = array<i32>} : memref<1x8x16x8xbf16, #tpu.memory_space<vmem>>, vector<1x8x16x8xbf16>,
    %cst_133 = arith.constant dense<0.000000e+00> : vector<8xf32>
    %114 = vector.multi_reduction <add>, %110, %cst_133 [0] : vector<128x8xf32> to vector<8xf32>
    %115 = vector.shape_cast %114 : vector<8xf32> to vector<1x8xf32>
    %c0_134 = arith.constant 0 : index
    %c0_135 = arith.constant 0 : index
    %c0_136 = arith.constant 0 : index
    %c0_137 = arith.constant 0 : index
    %116 = vector.load %arg9[%c0_134, %c0_135, %c0_136, %c0_137] : memref<1x1x2x8xf32, #tpu.memory_space<vmem>>, vector<1x1x1x8xf32>
    %117 = vector.shape_cast %116 : vector<1x1x1x8xf32> to vector<1x8xf32>
    %118 = vector.shape_cast %115 : vector<1x8xf32> to vector<1x1x1x8xf32>
    tpu.vector_store %arg9[%c0_134, %c0_135, %c0_136, %c0_137], %118 {strides = array<i32>} : memref<1x1x2x8xf32, #tpu.memory_space<vmem>>, vector<1x1x1x8xf32>,
    %119 = arith.mulf %110, %110 : vector<128x8xf32>
    %cst_138 = arith.constant dense<0.000000e+00> : vector<8xf32>
    %120 = vector.multi_reduction <add>, %119, %cst_138 [0] : vector<128x8xf32> to vector<8xf32>
    %121 = vector.shape_cast %120 : vector<8xf32> to vector<1x8xf32>
    %c0_139 = arith.constant 0 : index
    %c0_140 = arith.constant 0 : index
    %c1_141 = arith.constant 1 : index
    %c0_142 = arith.constant 0 : index
    %122 = vector.load %arg9[%c0_139, %c0_140, %c1_141, %c0_142] : memref<1x1x2x8xf32, #tpu.memory_space<vmem>>, vector<1x1x1x8xf32>
    %123 = vector.shape_cast %122 : vector<1x1x1x8xf32> to vector<1x8xf32>
    %124 = vector.shape_cast %121 : vector<1x8xf32> to vector<1x1x1x8xf32>
    tpu.vector_store %arg9[%c0_139, %c0_140, %c1_141, %c0_142], %124 {strides = array<i32>} : memref<1x1x2x8xf32, #tpu.memory_space<vmem>>, vector<1x1x1x8xf32>,
    return
  }
  func.func @transform_0(%arg0: i32, %arg1: i32) -> (i32, i32, i32, i32) {
    %c0_i32 = arith.constant 0 : i32
    %c0_i32_0 = arith.constant 0 : i32
    %c0_i32_1 = arith.constant 0 : i32
    return %arg0, %arg1, %c0_i32, %c0_i32_0 : i32, i32, i32, i32
  }
  func.func @transform_1(%arg0: i32, %arg1: i32) -> (i32, i32, i32, i32, i32) {
    %c0_i32 = arith.constant 0 : i32
    %c0_i32_0 = arith.constant 0 : i32
    %c0_i32_1 = arith.constant 0 : i32
    %c0_i32_2 = arith.constant 0 : i32
    return %arg0, %arg1, %c0_i32, %c0_i32_0, %c0_i32_1 : i32, i32, i32, i32, i32
  }
  func.func @transform_2(%arg0: i32, %arg1: i32) -> (i32, i32, i32, i32) {
    %c0_i32 = arith.constant 0 : i32
    %c0_i32_0 = arith.constant 0 : i32
    %c0_i32_1 = arith.constant 0 : i32
    return %arg0, %arg1, %c0_i32, %c0_i32_0 : i32, i32, i32, i32
  }
  func.func @transform_3(%arg0: i32, %arg1: i32) -> (i32, i32, i32, i32, i32) {
    %c0_i32 = arith.constant 0 : i32
    %c0_i32_0 = arith.constant 0 : i32
    %c0_i32_1 = arith.constant 0 : i32
    %c0_i32_2 = arith.constant 0 : i32
    return %arg0, %arg1, %c0_i32, %c0_i32_0, %c0_i32_1 : i32, i32, i32, i32, i32
  }
  func.func @transform_4(%arg0: i32, %arg1: i32) -> (i32, i32) {
    %c0_i32 = arith.constant 0 : i32
    %c0_i32_0 = arith.constant 0 : i32
    %c0_i32_1 = arith.constant 0 : i32
    return %c0_i32, %c0_i32_0 : i32, i32
  }
  func.func @transform_5(%arg0: i32, %arg1: i32) -> (i32, i32) {
    %c0_i32 = arith.constant 0 : i32
    %c0_i32_0 = arith.constant 0 : i32
    %c0_i32_1 = arith.constant 0 : i32
    return %c0_i32, %c0_i32_0 : i32, i32
  }
  func.func @transform_6(%arg0: i32, %arg1: i32) -> (i32, i32, i32, i32) {
    %c0_i32 = arith.constant 0 : i32
    %c0_i32_0 = arith.constant 0 : i32
    %c0_i32_1 = arith.constant 0 : i32
    return %arg0, %arg1, %c0_i32, %c0_i32_0 : i32, i32, i32, i32
  }
  func.func @transform_7(%arg0: i32, %arg1: i32) -> (i32, i32, i32, i32) {
    %c0_i32 = arith.constant 0 : i32
    %c0_i32_0 = arith.constant 0 : i32
    %c0_i32_1 = arith.constant 0 : i32
    return %arg0, %arg1, %c0_i32, %c0_i32_0 : i32, i32, i32, i32
  }
}

module attributes {stable_mosaic.version = 11 : i64} {
  func.func @_conv3x3_cat_kernel(%arg0: i32, %arg1: i32, %arg2: memref<1x8x16x8xbf16, #tpu.memory_space<vmem>>, %arg3: memref<1x1x2x16x8xbf16, #tpu.memory_space<vmem>>, %arg4: memref<1x8xf32, #tpu.memory_space<vmem>>, %arg5: memref<1x8xf32, #tpu.memory_space<vmem>>, %arg6: memref<72x8xbf16, #tpu.memory_space<vmem>>, %arg7: memref<1x8xf32, #tpu.memory_space<vmem>>, %arg8: memref<1x8x16x8xf32, #tpu.memory_space<vmem>>, %arg9: memref<1x1x2x8xf32, #tpu.memory_space<vmem>>, %arg10: memref<10x18x8xf32, #tpu.memory_space<vmem>>, %arg11: memref<128x72xbf16, #tpu.memory_space<vmem>>) attributes {dimension_semantics = [#tpu.dimension_semantics<parallel>, #tpu.dimension_semantics<parallel>], iteration_bounds = array<i64: 2, 2>, scalar_prefetch = 0 : i64, scratch_operands = 2 : i64, tpu.core_type = #tpu.core_type<tc>, window_params = [{transform_indices = @transform_0, window_bounds = array<i64: 1, 8, 16, 8>}, {transform_indices = @transform_1, window_bounds = array<i64: 1, 1, 2, 16, 8>}, {pipeline_mode = #tpu.pipeline_mode<synchronous>, transform_indices = @transform_2, window_bounds = array<i64: 1, 8>}, {pipeline_mode = #tpu.pipeline_mode<synchronous>, transform_indices = @transform_3, window_bounds = array<i64: 1, 8>}, {pipeline_mode = #tpu.pipeline_mode<synchronous>, transform_indices = @transform_4, window_bounds = array<i64: 72, 8>}, {pipeline_mode = #tpu.pipeline_mode<synchronous>, transform_indices = @transform_5, window_bounds = array<i64: 1, 8>}, {transform_indices = @transform_6, window_bounds = array<i64: 1, 8, 16, 8>}, {transform_indices = @transform_7, window_bounds = array<i64: 1, 1, 2, 8>}]} {
    %cst = arith.constant 0.000000e+00 : f32
    %0 = vector.broadcast %cst : f32 to vector<10x18x8xf32>
    %c0 = arith.constant 0 : index
    %c0_0 = arith.constant 0 : index
    %c0_1 = arith.constant 0 : index
    %1 = vector.load %arg10[%c0, %c0_0, %c0_1] : memref<10x18x8xf32, #tpu.memory_space<vmem>>, vector<10x18x8xf32>
    tpu.vector_store %arg10[%c0, %c0_0, %c0_1], %0 {strides = array<i32>} : memref<10x18x8xf32, #tpu.memory_space<vmem>>, vector<10x18x8xf32>,
    %c0_2 = arith.constant 0 : index
    %c0_3 = arith.constant 0 : index
    %2 = vector.load %arg4[%c0_2, %c0_3] : memref<1x8xf32, #tpu.memory_space<vmem>>, vector<1x8xf32>
    %c0_4 = arith.constant 0 : index
    %c0_5 = arith.constant 0 : index
    %3 = vector.load %arg5[%c0_4, %c0_5] : memref<1x8xf32, #tpu.memory_space<vmem>>, vector<1x8xf32>
    %c0_6 = arith.constant 0 : index
    %c0_7 = arith.constant 0 : index
    %c0_8 = arith.constant 0 : index
    %c0_9 = arith.constant 0 : index
    %4 = vector.load %arg2[%c0_6, %c0_7, %c0_8, %c0_9] : memref<1x8x16x8xbf16, #tpu.memory_space<vmem>>, vector<1x8x16x8xbf16>
    %5 = vector.shape_cast %4 : vector<1x8x16x8xbf16> to vector<8x16x8xbf16>
    %6 = arith.extf %5 : vector<8x16x8xbf16> to vector<8x16x8xf32>
    %7 = vector.shape_cast %2 : vector<1x8xf32> to vector<1x1x8xf32>
    %8 = vector.broadcast %7 : vector<1x1x8xf32> to vector<8x16x8xf32>
    %9 = arith.mulf %6, %8 : vector<8x16x8xf32>
    %10 = vector.shape_cast %3 : vector<1x8xf32> to vector<1x1x8xf32>
    %11 = vector.broadcast %10 : vector<1x1x8xf32> to vector<8x16x8xf32>
    %12 = arith.addf %9, %11 : vector<8x16x8xf32>
    %cst_10 = arith.constant 0.000000e+00 : f32
    %13 = vector.broadcast %cst_10 : f32 to vector<8x16x8xf32>
    %14 = arith.maximumf %12, %13 : vector<8x16x8xf32>
    %c0_11 = arith.constant 0 : index
    %c0_12 = arith.constant 0 : index
    %c0_13 = arith.constant 0 : index
    %c0_14 = arith.constant 0 : index
    %c0_15 = arith.constant 0 : index
    %15 = vector.load %arg3[%c0_11, %c0_12, %c0_13, %c0_14, %c0_15] : memref<1x1x2x16x8xbf16, #tpu.memory_space<vmem>>, vector<1x1x1x16x8xbf16>
    %16 = vector.shape_cast %15 : vector<1x1x1x16x8xbf16> to vector<16x8xbf16>
    %17 = arith.extf %16 : vector<16x8xbf16> to vector<16x8xf32>
    %18 = vector.broadcast %2 : vector<1x8xf32> to vector<16x8xf32>
    %19 = arith.mulf %17, %18 : vector<16x8xf32>
    %20 = vector.broadcast %3 : vector<1x8xf32> to vector<16x8xf32>
    %21 = arith.addf %19, %20 : vector<16x8xf32>
    %cst_16 = arith.constant 0.000000e+00 : f32
    %22 = vector.broadcast %cst_16 : f32 to vector<16x8xf32>
    %23 = arith.maximumf %21, %22 : vector<16x8xf32>
    %c0_17 = arith.constant 0 : index
    %c0_18 = arith.constant 0 : index
    %c1 = arith.constant 1 : index
    %c0_19 = arith.constant 0 : index
    %c0_20 = arith.constant 0 : index
    %24 = vector.load %arg3[%c0_17, %c0_18, %c1, %c0_19, %c0_20] : memref<1x1x2x16x8xbf16, #tpu.memory_space<vmem>>, vector<1x1x1x16x8xbf16>
    %25 = vector.shape_cast %24 : vector<1x1x1x16x8xbf16> to vector<16x8xbf16>
    %26 = arith.extf %25 : vector<16x8xbf16> to vector<16x8xf32>
    %27 = vector.broadcast %2 : vector<1x8xf32> to vector<16x8xf32>
    %28 = arith.mulf %26, %27 : vector<16x8xf32>
    %29 = vector.broadcast %3 : vector<1x8xf32> to vector<16x8xf32>
    %30 = arith.addf %28, %29 : vector<16x8xf32>
    %cst_21 = arith.constant 0.000000e+00 : f32
    %31 = vector.broadcast %cst_21 : f32 to vector<16x8xf32>
    %32 = arith.maximumf %30, %31 : vector<16x8xf32>
    %c0_i32 = arith.constant 0 : i32
    %33 = arith.cmpi sgt, %arg1, %c0_i32 : i32
    %cst_22 = arith.constant 0.000000e+00 : f32
    %34 = vector.broadcast %cst_22 : f32 to vector<16x8xf32>
    %35 = arith.select %33, %23, %34 : vector<16x8xf32>
    %c1_i32 = arith.constant 1 : i32
    %36 = arith.cmpi slt, %arg1, %c1_i32 : i32
    %cst_23 = arith.constant 0.000000e+00 : f32
    %37 = vector.broadcast %cst_23 : f32 to vector<16x8xf32>
    %38 = arith.select %36, %32, %37 : vector<16x8xf32>
    %c1_24 = arith.constant 1 : index
    %c1_25 = arith.constant 1 : index
    %c0_26 = arith.constant 0 : index
    %39 = vector.load %arg10[%c1_24, %c1_25, %c0_26] : memref<10x18x8xf32, #tpu.memory_space<vmem>>, vector<8x16x8xf32>
    tpu.vector_store %arg10[%c1_24, %c1_25, %c0_26], %14 {strides = array<i32>} : memref<10x18x8xf32, #tpu.memory_space<vmem>>, vector<8x16x8xf32>,
    %c0_27 = arith.constant 0 : index
    %c1_28 = arith.constant 1 : index
    %c0_29 = arith.constant 0 : index
    %40 = vector.load %arg10[%c0_27, %c1_28, %c0_29] : memref<10x18x8xf32, #tpu.memory_space<vmem>>, vector<1x16x8xf32>
    %41 = vector.shape_cast %40 : vector<1x16x8xf32> to vector<16x8xf32>
    %42 = vector.shape_cast %35 : vector<16x8xf32> to vector<1x16x8xf32>
    tpu.vector_store %arg10[%c0_27, %c1_28, %c0_29], %42 {strides = array<i32>} : memref<10x18x8xf32, #tpu.memory_space<vmem>>, vector<1x16x8xf32>,
    %c9 = arith.constant 9 : index
    %c1_30 = arith.constant 1 : index
    %c0_31 = arith.constant 0 : index
    %43 = vector.load %arg10[%c9, %c1_30, %c0_31] : memref<10x18x8xf32, #tpu.memory_space<vmem>>, vector<1x16x8xf32>
    %44 = vector.shape_cast %43 : vector<1x16x8xf32> to vector<16x8xf32>
    %45 = vector.shape_cast %38 : vector<16x8xf32> to vector<1x16x8xf32>
    tpu.vector_store %arg10[%c9, %c1_30, %c0_31], %45 {strides = array<i32>} : memref<10x18x8xf32, #tpu.memory_space<vmem>>, vector<1x16x8xf32>,
    %c0_32 = arith.constant 0 : index
    %c0_33 = arith.constant 0 : index
    %c0_34 = arith.constant 0 : index
    %46 = vector.load %arg10[%c0_32, %c0_33, %c0_34] : memref<10x18x8xf32, #tpu.memory_space<vmem>>, vector<8x16x8xf32>
    %47 = vector.shape_cast %46 : vector<8x16x8xf32> to vector<128x8xf32>
    %48 = arith.truncf %47 : vector<128x8xf32> to vector<128x8xbf16>
    %c0_35 = arith.constant 0 : index
    %c0_36 = arith.constant 0 : index
    %49 = vector.load %arg11[%c0_35, %c0_36] : memref<128x72xbf16, #tpu.memory_space<vmem>>, vector<128x8xbf16>
    tpu.vector_store %arg11[%c0_35, %c0_36], %48 {strides = array<i32>} : memref<128x72xbf16, #tpu.memory_space<vmem>>, vector<128x8xbf16>,
    %c0_37 = arith.constant 0 : index
    %c1_38 = arith.constant 1 : index
    %c0_39 = arith.constant 0 : index
    %50 = vector.load %arg10[%c0_37, %c1_38, %c0_39] : memref<10x18x8xf32, #tpu.memory_space<vmem>>, vector<8x16x8xf32>
    %51 = vector.shape_cast %50 : vector<8x16x8xf32> to vector<128x8xf32>
    %52 = arith.truncf %51 : vector<128x8xf32> to vector<128x8xbf16>
    %c0_40 = arith.constant 0 : index
    %c8 = arith.constant 8 : index
    %53 = vector.load %arg11[%c0_40, %c8] : memref<128x72xbf16, #tpu.memory_space<vmem>>, vector<128x8xbf16>
    tpu.vector_store %arg11[%c0_40, %c8], %52 {strides = array<i32>} : memref<128x72xbf16, #tpu.memory_space<vmem>>, vector<128x8xbf16>,
    %c0_41 = arith.constant 0 : index
    %c2 = arith.constant 2 : index
    %c0_42 = arith.constant 0 : index
    %54 = vector.load %arg10[%c0_41, %c2, %c0_42] : memref<10x18x8xf32, #tpu.memory_space<vmem>>, vector<8x16x8xf32>
    %55 = vector.shape_cast %54 : vector<8x16x8xf32> to vector<128x8xf32>
    %56 = arith.truncf %55 : vector<128x8xf32> to vector<128x8xbf16>
    %c0_43 = arith.constant 0 : index
    %c16 = arith.constant 16 : index
    %57 = vector.load %arg11[%c0_43, %c16] : memref<128x72xbf16, #tpu.memory_space<vmem>>, vector<128x8xbf16>
    tpu.vector_store %arg11[%c0_43, %c16], %56 {strides = array<i32>} : memref<128x72xbf16, #tpu.memory_space<vmem>>, vector<128x8xbf16>,
    %c1_44 = arith.constant 1 : index
    %c0_45 = arith.constant 0 : index
    %c0_46 = arith.constant 0 : index
    %58 = vector.load %arg10[%c1_44, %c0_45, %c0_46] : memref<10x18x8xf32, #tpu.memory_space<vmem>>, vector<8x16x8xf32>
    %59 = vector.shape_cast %58 : vector<8x16x8xf32> to vector<128x8xf32>
    %60 = arith.truncf %59 : vector<128x8xf32> to vector<128x8xbf16>
    %c0_47 = arith.constant 0 : index
    %c24 = arith.constant 24 : index
    %61 = vector.load %arg11[%c0_47, %c24] : memref<128x72xbf16, #tpu.memory_space<vmem>>, vector<128x8xbf16>
    tpu.vector_store %arg11[%c0_47, %c24], %60 {strides = array<i32>} : memref<128x72xbf16, #tpu.memory_space<vmem>>, vector<128x8xbf16>,
    %c1_48 = arith.constant 1 : index
    %c1_49 = arith.constant 1 : index
    %c0_50 = arith.constant 0 : index
    %62 = vector.load %arg10[%c1_48, %c1_49, %c0_50] : memref<10x18x8xf32, #tpu.memory_space<vmem>>, vector<8x16x8xf32>
    %63 = vector.shape_cast %62 : vector<8x16x8xf32> to vector<128x8xf32>
    %64 = arith.truncf %63 : vector<128x8xf32> to vector<128x8xbf16>
    %c0_51 = arith.constant 0 : index
    %c32 = arith.constant 32 : index
    %65 = vector.load %arg11[%c0_51, %c32] : memref<128x72xbf16, #tpu.memory_space<vmem>>, vector<128x8xbf16>
    tpu.vector_store %arg11[%c0_51, %c32], %64 {strides = array<i32>} : memref<128x72xbf16, #tpu.memory_space<vmem>>, vector<128x8xbf16>,
    %c1_52 = arith.constant 1 : index
    %c2_53 = arith.constant 2 : index
    %c0_54 = arith.constant 0 : index
    %66 = vector.load %arg10[%c1_52, %c2_53, %c0_54] : memref<10x18x8xf32, #tpu.memory_space<vmem>>, vector<8x16x8xf32>
    %67 = vector.shape_cast %66 : vector<8x16x8xf32> to vector<128x8xf32>
    %68 = arith.truncf %67 : vector<128x8xf32> to vector<128x8xbf16>
    %c0_55 = arith.constant 0 : index
    %c40 = arith.constant 40 : index
    %69 = vector.load %arg11[%c0_55, %c40] : memref<128x72xbf16, #tpu.memory_space<vmem>>, vector<128x8xbf16>
    tpu.vector_store %arg11[%c0_55, %c40], %68 {strides = array<i32>} : memref<128x72xbf16, #tpu.memory_space<vmem>>, vector<128x8xbf16>,
    %c2_56 = arith.constant 2 : index
    %c0_57 = arith.constant 0 : index
    %c0_58 = arith.constant 0 : index
    %70 = vector.load %arg10[%c2_56, %c0_57, %c0_58] : memref<10x18x8xf32, #tpu.memory_space<vmem>>, vector<8x16x8xf32>
    %71 = vector.shape_cast %70 : vector<8x16x8xf32> to vector<128x8xf32>
    %72 = arith.truncf %71 : vector<128x8xf32> to vector<128x8xbf16>
    %c0_59 = arith.constant 0 : index
    %c48 = arith.constant 48 : index
    %73 = vector.load %arg11[%c0_59, %c48] : memref<128x72xbf16, #tpu.memory_space<vmem>>, vector<128x8xbf16>
    tpu.vector_store %arg11[%c0_59, %c48], %72 {strides = array<i32>} : memref<128x72xbf16, #tpu.memory_space<vmem>>, vector<128x8xbf16>,
    %c2_60 = arith.constant 2 : index
    %c1_61 = arith.constant 1 : index
    %c0_62 = arith.constant 0 : index
    %74 = vector.load %arg10[%c2_60, %c1_61, %c0_62] : memref<10x18x8xf32, #tpu.memory_space<vmem>>, vector<8x16x8xf32>
    %75 = vector.shape_cast %74 : vector<8x16x8xf32> to vector<128x8xf32>
    %76 = arith.truncf %75 : vector<128x8xf32> to vector<128x8xbf16>
    %c0_63 = arith.constant 0 : index
    %c56 = arith.constant 56 : index
    %77 = vector.load %arg11[%c0_63, %c56] : memref<128x72xbf16, #tpu.memory_space<vmem>>, vector<128x8xbf16>
    tpu.vector_store %arg11[%c0_63, %c56], %76 {strides = array<i32>} : memref<128x72xbf16, #tpu.memory_space<vmem>>, vector<128x8xbf16>,
    %c2_64 = arith.constant 2 : index
    %c2_65 = arith.constant 2 : index
    %c0_66 = arith.constant 0 : index
    %78 = vector.load %arg10[%c2_64, %c2_65, %c0_66] : memref<10x18x8xf32, #tpu.memory_space<vmem>>, vector<8x16x8xf32>
    %79 = vector.shape_cast %78 : vector<8x16x8xf32> to vector<128x8xf32>
    %80 = arith.truncf %79 : vector<128x8xf32> to vector<128x8xbf16>
    %c0_67 = arith.constant 0 : index
    %c64 = arith.constant 64 : index
    %81 = vector.load %arg11[%c0_67, %c64] : memref<128x72xbf16, #tpu.memory_space<vmem>>, vector<128x8xbf16>
    tpu.vector_store %arg11[%c0_67, %c64], %80 {strides = array<i32>} : memref<128x72xbf16, #tpu.memory_space<vmem>>, vector<128x8xbf16>,
    %c0_68 = arith.constant 0 : index
    %c0_69 = arith.constant 0 : index
    %82 = vector.load %arg11[%c0_68, %c0_69] : memref<128x72xbf16, #tpu.memory_space<vmem>>, vector<128x72xbf16>
    %c0_70 = arith.constant 0 : index
    %c0_71 = arith.constant 0 : index
    %83 = vector.load %arg6[%c0_70, %c0_71] : memref<72x8xbf16, #tpu.memory_space<vmem>>, vector<72x8xbf16>
    %cst_72 = arith.constant dense<0.000000e+00> : vector<128x8xf32>
    %84 = tpu.matmul %82, %83, %cst_72 {dimension_numbers = #tpu.dot_dimension_numbers<[1], [0], [0], [1], [0, 0, 1, 1], [], []>} : vector<128x72xbf16>, vector<72x8xbf16>, vector<128x8xf32> -> vector<128x8xf32>
    %c0_73 = arith.constant 0 : index
    %c0_74 = arith.constant 0 : index
    %85 = vector.load %arg7[%c0_73, %c0_74] : memref<1x8xf32, #tpu.memory_space<vmem>>, vector<1x8xf32>
    %86 = vector.broadcast %85 : vector<1x8xf32> to vector<128x8xf32>
    %87 = arith.addf %84, %86 : vector<128x8xf32>
    %88 = vector.shape_cast %87 : vector<128x8xf32> to vector<1x8x16x8xf32>
    %c0_75 = arith.constant 0 : index
    %c0_76 = arith.constant 0 : index
    %c0_77 = arith.constant 0 : index
    %c0_78 = arith.constant 0 : index
    %89 = vector.load %arg8[%c0_75, %c0_76, %c0_77, %c0_78] : memref<1x8x16x8xf32, #tpu.memory_space<vmem>>, vector<1x8x16x8xf32>
    tpu.vector_store %arg8[%c0_75, %c0_76, %c0_77, %c0_78], %88 {strides = array<i32>} : memref<1x8x16x8xf32, #tpu.memory_space<vmem>>, vector<1x8x16x8xf32>,
    %cst_79 = arith.constant dense<0.000000e+00> : vector<8xf32>
    %90 = vector.multi_reduction <add>, %87, %cst_79 [0] : vector<128x8xf32> to vector<8xf32>
    %91 = vector.shape_cast %90 : vector<8xf32> to vector<1x8xf32>
    %c0_80 = arith.constant 0 : index
    %c0_81 = arith.constant 0 : index
    %c0_82 = arith.constant 0 : index
    %c0_83 = arith.constant 0 : index
    %92 = vector.load %arg9[%c0_80, %c0_81, %c0_82, %c0_83] : memref<1x1x2x8xf32, #tpu.memory_space<vmem>>, vector<1x1x1x8xf32>
    %93 = vector.shape_cast %92 : vector<1x1x1x8xf32> to vector<1x8xf32>
    %94 = vector.shape_cast %91 : vector<1x8xf32> to vector<1x1x1x8xf32>
    tpu.vector_store %arg9[%c0_80, %c0_81, %c0_82, %c0_83], %94 {strides = array<i32>} : memref<1x1x2x8xf32, #tpu.memory_space<vmem>>, vector<1x1x1x8xf32>,
    %95 = arith.mulf %87, %87 : vector<128x8xf32>
    %cst_84 = arith.constant dense<0.000000e+00> : vector<8xf32>
    %96 = vector.multi_reduction <add>, %95, %cst_84 [0] : vector<128x8xf32> to vector<8xf32>
    %97 = vector.shape_cast %96 : vector<8xf32> to vector<1x8xf32>
    %c0_85 = arith.constant 0 : index
    %c0_86 = arith.constant 0 : index
    %c1_87 = arith.constant 1 : index
    %c0_88 = arith.constant 0 : index
    %98 = vector.load %arg9[%c0_85, %c0_86, %c1_87, %c0_88] : memref<1x1x2x8xf32, #tpu.memory_space<vmem>>, vector<1x1x1x8xf32>
    %99 = vector.shape_cast %98 : vector<1x1x1x8xf32> to vector<1x8xf32>
    %100 = vector.shape_cast %97 : vector<1x8xf32> to vector<1x1x1x8xf32>
    tpu.vector_store %arg9[%c0_85, %c0_86, %c1_87, %c0_88], %100 {strides = array<i32>} : memref<1x1x2x8xf32, #tpu.memory_space<vmem>>, vector<1x1x1x8xf32>,
    return
  }
  func.func @transform_0(%arg0: i32, %arg1: i32) -> (i32, i32, i32, i32) {
    %c0_i32 = arith.constant 0 : i32
    %c0_i32_0 = arith.constant 0 : i32
    %c0_i32_1 = arith.constant 0 : i32
    return %arg0, %arg1, %c0_i32, %c0_i32_0 : i32, i32, i32, i32
  }
  func.func @transform_1(%arg0: i32, %arg1: i32) -> (i32, i32, i32, i32, i32) {
    %c0_i32 = arith.constant 0 : i32
    %c0_i32_0 = arith.constant 0 : i32
    %c0_i32_1 = arith.constant 0 : i32
    %c0_i32_2 = arith.constant 0 : i32
    return %arg0, %arg1, %c0_i32, %c0_i32_0, %c0_i32_1 : i32, i32, i32, i32, i32
  }
  func.func @transform_2(%arg0: i32, %arg1: i32) -> (i32, i32) {
    %c0_i32 = arith.constant 0 : i32
    %c0_i32_0 = arith.constant 0 : i32
    %c0_i32_1 = arith.constant 0 : i32
    return %c0_i32, %c0_i32_0 : i32, i32
  }
  func.func @transform_3(%arg0: i32, %arg1: i32) -> (i32, i32) {
    %c0_i32 = arith.constant 0 : i32
    %c0_i32_0 = arith.constant 0 : i32
    %c0_i32_1 = arith.constant 0 : i32
    return %c0_i32, %c0_i32_0 : i32, i32
  }
  func.func @transform_4(%arg0: i32, %arg1: i32) -> (i32, i32) {
    %c0_i32 = arith.constant 0 : i32
    %c0_i32_0 = arith.constant 0 : i32
    %c0_i32_1 = arith.constant 0 : i32
    return %c0_i32, %c0_i32_0 : i32, i32
  }
  func.func @transform_5(%arg0: i32, %arg1: i32) -> (i32, i32) {
    %c0_i32 = arith.constant 0 : i32
    %c0_i32_0 = arith.constant 0 : i32
    %c0_i32_1 = arith.constant 0 : i32
    return %c0_i32, %c0_i32_0 : i32, i32
  }
  func.func @transform_6(%arg0: i32, %arg1: i32) -> (i32, i32, i32, i32) {
    %c0_i32 = arith.constant 0 : i32
    %c0_i32_0 = arith.constant 0 : i32
    %c0_i32_1 = arith.constant 0 : i32
    return %arg0, %arg1, %c0_i32, %c0_i32_0 : i32, i32, i32, i32
  }
  func.func @transform_7(%arg0: i32, %arg1: i32) -> (i32, i32, i32, i32) {
    %c0_i32 = arith.constant 0 : i32
    %c0_i32_0 = arith.constant 0 : i32
    %c0_i32_1 = arith.constant 0 : i32
    return %arg0, %arg1, %c0_i32, %c0_i32_0 : i32, i32, i32, i32
  }
}

module attributes {stable_mosaic.version = 11 : i64} {
  func.func @_bn_relu_kernel(%arg0: i32, %arg1: i32, %arg2: memref<1x8x16x8xf32, #tpu.memory_space<vmem>>, %arg3: memref<1x8xf32, #tpu.memory_space<vmem>>, %arg4: memref<1x8xf32, #tpu.memory_space<vmem>>, %arg5: memref<1x8x16x8xf32, #tpu.memory_space<vmem>>) attributes {dimension_semantics = [#tpu.dimension_semantics<parallel>, #tpu.dimension_semantics<parallel>], iteration_bounds = array<i64: 2, 2>, scalar_prefetch = 0 : i64, scratch_operands = 0 : i64, tpu.core_type = #tpu.core_type<tc>, window_params = [{transform_indices = @transform_0, window_bounds = array<i64: 1, 8, 16, 8>}, {pipeline_mode = #tpu.pipeline_mode<synchronous>, transform_indices = @transform_1, window_bounds = array<i64: 1, 8>}, {pipeline_mode = #tpu.pipeline_mode<synchronous>, transform_indices = @transform_2, window_bounds = array<i64: 1, 8>}, {transform_indices = @transform_3, window_bounds = array<i64: 1, 8, 16, 8>}]} {
    %c0 = arith.constant 0 : index
    %c0_0 = arith.constant 0 : index
    %c0_1 = arith.constant 0 : index
    %c0_2 = arith.constant 0 : index
    %0 = vector.load %arg2[%c0, %c0_0, %c0_1, %c0_2] : memref<1x8x16x8xf32, #tpu.memory_space<vmem>>, vector<1x8x16x8xf32>
    %c0_3 = arith.constant 0 : index
    %c0_4 = arith.constant 0 : index
    %1 = vector.load %arg3[%c0_3, %c0_4] : memref<1x8xf32, #tpu.memory_space<vmem>>, vector<1x8xf32>
    %2 = vector.shape_cast %1 : vector<1x8xf32> to vector<1x1x1x8xf32>
    %3 = vector.broadcast %2 : vector<1x1x1x8xf32> to vector<1x8x16x8xf32>
    %4 = arith.mulf %0, %3 : vector<1x8x16x8xf32>
    %c0_5 = arith.constant 0 : index
    %c0_6 = arith.constant 0 : index
    %5 = vector.load %arg4[%c0_5, %c0_6] : memref<1x8xf32, #tpu.memory_space<vmem>>, vector<1x8xf32>
    %6 = vector.shape_cast %5 : vector<1x8xf32> to vector<1x1x1x8xf32>
    %7 = vector.broadcast %6 : vector<1x1x1x8xf32> to vector<1x8x16x8xf32>
    %8 = arith.addf %4, %7 : vector<1x8x16x8xf32>
    %cst = arith.constant 0.000000e+00 : f32
    %9 = vector.broadcast %cst : f32 to vector<1x8x16x8xf32>
    %10 = arith.maximumf %8, %9 : vector<1x8x16x8xf32>
    %c0_7 = arith.constant 0 : index
    %c0_8 = arith.constant 0 : index
    %c0_9 = arith.constant 0 : index
    %c0_10 = arith.constant 0 : index
    %11 = vector.load %arg5[%c0_7, %c0_8, %c0_9, %c0_10] : memref<1x8x16x8xf32, #tpu.memory_space<vmem>>, vector<1x8x16x8xf32>
    tpu.vector_store %arg5[%c0_7, %c0_8, %c0_9, %c0_10], %10 {strides = array<i32>} : memref<1x8x16x8xf32, #tpu.memory_space<vmem>>, vector<1x8x16x8xf32>,
    return
  }
  func.func @transform_0(%arg0: i32, %arg1: i32) -> (i32, i32, i32, i32) {
    %c0_i32 = arith.constant 0 : i32
    %c0_i32_0 = arith.constant 0 : i32
    %c0_i32_1 = arith.constant 0 : i32
    return %arg0, %arg1, %c0_i32, %c0_i32_0 : i32, i32, i32, i32
  }
  func.func @transform_1(%arg0: i32, %arg1: i32) -> (i32, i32) {
    %c0_i32 = arith.constant 0 : i32
    %c0_i32_0 = arith.constant 0 : i32
    %c0_i32_1 = arith.constant 0 : i32
    return %c0_i32, %c0_i32_0 : i32, i32
  }
  func.func @transform_2(%arg0: i32, %arg1: i32) -> (i32, i32) {
    %c0_i32 = arith.constant 0 : i32
    %c0_i32_0 = arith.constant 0 : i32
    %c0_i32_1 = arith.constant 0 : i32
    return %c0_i32, %c0_i32_0 : i32, i32
  }
  func.func @transform_3(%arg0: i32, %arg1: i32) -> (i32, i32, i32, i32) {
    %c0_i32 = arith.constant 0 : i32
    %c0_i32_0 = arith.constant 0 : i32
    %c0_i32_1 = arith.constant 0 : i32
    return %arg0, %arg1, %c0_i32, %c0_i32_0 : i32, i32, i32, i32
  }
}

</mosaic_0001>

<bundles_post_ra>
// kernel: tile.8
= control target key start
LH: loop header
LB: loop body
LE: loop exit
PB: predicated region body
PF: predicated region fallthrough
CT: control target
= control target key end

     0   :  { %s22_s0 = inlined_call_operand.vmem [shape: f32[4], index: 0, kind: input, shape index: {}]   ;;  %s23_s1 = inlined_call_operand.vmem [shape: f32[2,4], index: 1, kind: output, shape index: {}]  }
   0x1   :  { %v4_v0 = vld [vmem:[%s22_s0] ss:$0 sm:$0xff] }
   0x2   :  { %5 = vst [vmem:[%s23_s1] sm:$0x3] %v4_v0 }

// kernel: tile.9
= control target key start
LH: loop header
LB: loop body
LE: loop exit
PB: predicated region body
PF: predicated region fallthrough
CT: control target
= control target key end

     0   :  { %vm7_vm0 = vcmask 31744   ;;  %vm13_vm1 = vcmask 64544   ;;  %s39_s0 = inlined_call_operand.vmem [shape: f32[2,4], index: 0, kind: input, shape index: {}]   ;;  %s40_s1 = inlined_call_operand.vmem [shape: f32[1,8], index: 1, kind: output, shape index: {}]  }
   0x1   :  { %v4_v0 = vld [vmem:[%s39_s0] sm:$0x3]  ;;  %s22_s0 = smov 4  }
   0x2   :  { %5 = vst [vmem:[#allocation1] sm:$0x3] %v4_v0 }
   0x9   :  { %v10_v1 = vld [vmem:[#allocation1 + $0x1] sm:$0x1]   ;;  %v6_v2 = vld [vmem:[#allocation1] sm:$0x1]  }
   0xa   :  { %11 = vrot.lane.b32.xlu0 %v10_v1, %s22_s0  ;;  %8 = vst.msk [vmem:[#allocation0] sm:$0x1] %vm7_vm0, %v6_v2  }
  0x7c   :  { %v12_v3 = vpop.permute.xlu0 %11  }
  0x7d   :  { %14 = vst.msk [vmem:[#allocation0] sm:$0x1] %vm13_vm1, %v12_v3  }
  0x84   :  { %v18_v4 = vld [vmem:[#allocation0] sm:$0x1] }
  0x85   :  { %20 = vst [vmem:[%s40_s1] sm:$0x1] %v18_v4 }

// kernel: up_block_forward.4
= control target key start
LH: loop header
LB: loop body
LE: loop exit
PB: predicated region body
PF: predicated region fallthrough
CT: control target
= control target key end

     0   :  { %s607_s12 = smov 0   ;;  %s609_s13 = smov 0   ;;  %s678_s0 = inlined_call_operand.vmem [shape: f32[2,8,8,8], index: 0, kind: input, shape index: {}]   ;;  %s679_s1 = inlined_call_operand.vmem [shape: bf16[2,8,8], index: 1, kind: input, shape index: {}]   ;;  %s680_s2 = inlined_call_operand.vmem [shape: f32[1,8], index: 2, kind: input, shape index: {}]   ;;  %s681_s3 = inlined_call_operand.vmem [shape: bf16[2,8,2,8,8], index: 3, kind: output, shape index: {}]  }
   0x1   :  { %s611_s14 = smov 0   ;;  %s613_s15 = smov 0  }
   0x2   :  { %s615_s16 = smov 0  }
   0x3 LB: > { %s22_s17 = sadd.s32 1, %s577_s14  ;;  %s25_s18 = sadd.s32 1, %s581_s15  ;;  %s585_s16 = sphi %s615_s16, %s13_s16   ;;  %s581_s15 = sphi %s613_s15, %s685_s15   ;;  %s577_s14 = sphi %s611_s14, %s684_s14   ;;  %s573_s13 = sphi %s609_s13, %s683_s13   ;;  %s569_s12 = sphi %s607_s12, %s682_s12  }
   0x4   : > { %p23_p0 = scmp.ge.s32.totalorder %s22_s17, 2  ;;  %p466_p1 = scmp.ge.s32.totalorder %s585_s16, 1 }
   0x5   : > { %p158_p2 = scmp.lt.s32.totalorder %s585_s16, 5 }
   0x6   : > { %s687_s17 = smov (%p23_p0, %s22_s17), 0  ;;  %s689_s18 = smov (!%p23_p0, %s25_s18), %s581_s15 }
   0x7   : > { %p159_p3 = pnand %p466_p1, %p158_p2  ;;  %p27_p4 = scmp.ge.s32.totalorder %s689_s18, 2 }
   0x8   : > { %v219_v0 = vld [vmem:[%s679_s1] sm:$0xf] (!%p159_p3)  ;;  %vm234_vm0 = vcmask (!%p159_p3), 1043456   ;;  %v477_v1 = vld [vmem:[%s679_s1 + $0x4] sm:$0xf] (!%p159_p3)  ;;  %s467_s23 = sshll.u32 (!%p159_p3), %s569_s12, 2 }
   0x9   : > { %s691_s18 = smov (%p27_p4, %s689_s18), 0  ;;  %162 = sbr.rel (%p159_p3) target bundleno = 245 (0xf5), region = 32 }
   0xa   : > { %505 = vmatprep.subr.msk.bf16.mxu0 (!%p159_p3), %vm234_vm0, %v219_v0  ;;  %506 = vmatprep.subr.msk.bf16.mxu1 (!%p159_p3), %vm234_vm0, %v477_v1  ;;  %v236_v2 = vsel (!%p159_p3), %vm234_vm0, %v219_v0, 0  ;;  %v306_v3 = vsel (!%p159_p3), %vm234_vm0, %v477_v1, 0  ;;  %p192_p5 = scmp.lt.s32.totalorder (!%p159_p3), %s573_s13, 1  ;;  %p194_p6 = scmp.lt.s32.totalorder (!%p159_p3), %s467_s23, 7  ;;  %vm227_vm1 = vcmask (!%p159_p3), 64512   ;;  %vm291_vm2 = vcmask (!%p159_p3), 60416  }
   0xb   : > { %494 = vmatpush3.bf16.msra.mxu0 (!%p159_p3), %v236_v2  ;;  %500 = vmatpush3.bf16.msra.mxu1 (!%p159_p3), %v306_v3  ;;  %v474_v10 = vld [vmem:[%s680_s2] ss:$0 sm:$0xff] (!%p159_p3) }
  0x10   : > { %s693_s13 = smov (!%p192_p5, %s573_s13), 1  ;;  %s695_s23 = smov (!%p194_p6, %s467_s23), 7 }
  0x11   : > { %s468_s24 = sshll.u32 %s693_s13, 3  ;;  %s472_s25 = sshll.u32 %s693_s13, 4 }
  0x12   : > { %s197_s26 = sadd.s32 %s468_s24, %s695_s23  ;;  %s471_s27 = sshll.u32 %s695_s23, 1 }
  0x13   : > { %s469_s28 = sshll.u32 %s197_s26, 3  ;;  %s208_s29 = sadd.s32 %s472_s25, %s471_s27 }
  0x14   : > { %s199_s5 = scalar_lea.vmem %s678_s0, %s469_s28  ;;  %s473_s8 = sshll.u32 %s208_s29, 2 }
  0x15   : > { %v213_v4 = vld [vmem:[%s199_s5] sm:$0xff]  ;;  %v214_v5 = vld [vmem:[%s199_s5 + $0x8] sm:$0xff]  ;;  %v215_v6 = vld [vmem:[%s199_s5 + $0x10] sm:$0xff]  ;;  %s210_s11 = scalar_lea.vmem %s681_s3, %s473_s8 }
  0x16   : > { %v217_v7 = vpack.c.bf16 %v214_v5, %v213_v4  ;;  %v216_v8 = vld [vmem:[%s199_s5 + $0x18] sm:$0xff] }
  0x17   : > { %v218_v9 = vpack.c.bf16 %v216_v8, %v215_v6 }
  0x18   : > { %495 = vmatprep.mubr.msk.bf16.mxu0 %vm227_vm1, %v217_v7  ;;  %501 = vmatprep.mubr.msk.bf16.mxu1 %vm227_vm1, %v217_v7 }
  0x19   : > { %496 = vmatmul.mubr.msk.bf16.vlgmr.msra.gmra.mrb[0].mxu0 %vm227_vm1, %v218_v9  ;;  %502 = vmatmul.mubr.msk.bf16.vlgmr.msra.gmra.mrb[0].mxu1 %vm227_vm1, %v218_v9 }
  0xec   : > { %v497_v11 = vpop.f32.mrb[0].mxu0  ;;  %v503_v12 = vpop.f32.mrb[0].mxu1 }
  0xed   : > { %v281_v13 = vadd.f32 %v497_v11, %v474_v10  ;;  %v351_v14 = vadd.f32 %v503_v12, %v474_v10  ;;  %v272_v15 = vpop.f32.mrb[1].mxu0  ;;  %v342_v16 = vpop.f32.mrb[1].mxu1 }
  0xee   : > { %v273_v17 = vadd.f32 %v474_v10, %v272_v15  ;;  %v343_v18 = vadd.f32 %v474_v10, %v342_v16  ;;  %v498_v19 = vpop.f32.mrb[2].mxu0  ;;  %v504_v20 = vpop.f32.mrb[2].mxu1 }
  0xef   : > { %v289_v21 = vpack.c.bf16 %v281_v13, %v281_v13  ;;  %v359_v22 = vpack.c.bf16 %v351_v14, %v351_v14  ;;  %v284_v23 = vadd.f32 %v498_v19, %v474_v10  ;;  %v354_v24 = vadd.f32 %v504_v20, %v474_v10  ;;  %v275_v25 = vpop.f32.mrb[3].mxu0  ;;  %v345_v26 = vpop.f32.mrb[3].mxu1 }
  0xf0   : > { %v287_v27 = vpack.c.bf16 %v273_v17, %v273_v17  ;;  %v357_v28 = vpack.c.bf16 %v343_v18, %v343_v18  ;;  %v276_v29 = vadd.f32 %v474_v10, %v275_v25  ;;  %v346_v30 = vadd.f32 %v474_v10, %v345_v26 }
  0xf1   : > { %294 = vst.msk [vmem:[%s210_s11 + $0x10] sm:$0xf] %vm291_vm2, %v289_v21  ;;  %483 = vst.msk [vmem:[%s210_s11 + $0x14] sm:$0xf] %vm291_vm2, %v359_v22  ;;  %v290_v31 = vpack.c.bf16 %v284_v23, %v284_v23  ;;  %v360_v32 = vpack.c.bf16 %v354_v24, %v354_v24 }
  0xf2   : > { %292 = vst.msk [vmem:[%s210_s11] sm:$0xf] %vm291_vm2, %v287_v27  ;;  %481 = vst.msk [vmem:[%s210_s11 + $0x4] sm:$0xf] %vm291_vm2, %v357_v28  ;;  %v288_v33 = vpack.c.bf16 %v276_v29, %v276_v29  ;;  %v358_v34 = vpack.c.bf16 %v346_v30, %v346_v30 }
  0xf3   : > { %295 = vst.msk [vmem:[%s210_s11 + $0x18] sm:$0xf] %vm291_vm2, %v290_v31  ;;  %484 = vst.msk [vmem:[%s210_s11 + $0x1c] sm:$0xf] %vm291_vm2, %v360_v32 }
  0xf4   : > { %293 = vst.msk [vmem:[%s210_s11 + $0x8] sm:$0xf] %vm291_vm2, %v288_v33  ;;  %482 = vst.msk [vmem:[%s210_s11 + $0xc] sm:$0xf] %vm291_vm2, %v358_v34 }
  0xf5 PF: > { %s13_s16 = sadd.s32 1, %s585_s16   ;;  %s682_s12 = smov %s577_s14 }
  0xf6   : > { %p10_p7 = scmp.ge.s32.totalorder %s13_s16, 6   ;;  %s683_s13 = smov %s581_s15 }
  0xf7   : > { %s684_s14 = smov %s687_s17  ;;  %s685_s15 = smov %s691_s18 }
  0xf8   :  { %12 = sbr.rel (!%p10_p7) target bundleno = 3 (0x3), region = 64 }

// kernel: up_block_forward.7
= control target key start
LH: loop header
LB: loop body
LE: loop exit
PB: predicated region body
PF: predicated region fallthrough
CT: control target
= control target key end

     0   :  { %s526_s12 = smov 0   ;;  %s528_s13 = smov 0   ;;  %s671_s0 = inlined_call_operand.vmem [shape: f32[2,16,16,8], index: 0, kind: input, shape index: {}]   ;;  %s672_s1 = inlined_call_operand.vmem [shape: f32[1,8], index: 1, kind: input, shape index: {}]   ;;  %s673_s2 = inlined_call_operand.vmem [shape: f32[1,8], index: 2, kind: input, shape index: {}]   ;;  %s674_s3 = inlined_call_operand.vmem [shape: f32[2,16,16,8], index: 3, kind: output, shape index: {}]  }
   0x1   :  { %s530_s14 = smov 0   ;;  %s532_s15 = smov 0  }
   0x2   :  { %s534_s16 = smov 0  }
   0x3 LB: > { %s22_s17 = sadd.s32 1, %s496_s14  ;;  %s25_s18 = sadd.s32 1, %s500_s15  ;;  %s504_s16 = sphi %s534_s16, %s13_s16   ;;  %s500_s15 = sphi %s532_s15, %s678_s15   ;;  %s496_s14 = sphi %s530_s14, %s677_s14   ;;  %s492_s13 = sphi %s528_s13, %s676_s13   ;;  %s488_s12 = sphi %s526_s12, %s675_s12  }
   0x4   : > { %p23_p0 = scmp.ge.s32.totalorder %s22_s17, 2  ;;  %p413_p1 = scmp.ge.s32.totalorder %s504_s16, 1 }
   0x5   : > { %p159_p2 = scmp.lt.s32.totalorder %s504_s16, 5 }
   0x6   : > { %s680_s17 = smov (%p23_p0, %s22_s17), 0  ;;  %s682_s18 = smov (!%p23_p0, %s25_s18), %s500_s15 }
   0x7   : > { %p160_p3 = pnand %p413_p1, %p159_p2  ;;  %p27_p4 = scmp.ge.s32.totalorder %s682_s18, 2 }
   0x8   : > { %s414_s19 = sshll.u32 (!%p160_p3), %s488_s12, 3  ;;  %p194_p5 = scmp.lt.s32.totalorder (!%p160_p3), %s492_s13, 1  ;;  %v559_v0 = vld [vmem:[%s672_s1] ss:$0 sm:$0xff] (!%p160_p3)  ;;  %vm293_vm0 = vcmask (!%p160_p3), 64512  }
   0x9   : > { %s684_s18 = smov (%p27_p4, %s682_s18), 0  ;;  %163 = sbr.rel (%p160_p3) target bundleno = 39 (0x27), region = 32 }
   0xa   : > { %p196_p6 = scmp.lt.s32.totalorder (!%p160_p3), %s414_s19, 15  ;;  %v569_v1 = vld [vmem:[%s673_s2] ss:$0 sm:$0xff] (!%p160_p3) }
  0x10   : > { %s686_s13 = smov (!%p194_p5, %s492_s13), 1  ;;  %s688_s19 = smov (!%p196_p6, %s414_s19), 15 }
  0x11   : > { %s416_s20 = sshll.u32 %s686_s13, 5  ;;  %s415_s21 = sshll.u32 %s688_s19, 1 }
  0x12   : > { %s200_s22 = sadd.s32 %s416_s20, %s415_s21 }
  0x13   : > { %s417_s23 = sshll.u32 %s200_s22, 3 }
  0x14   : > { %s564_s28 = scalar_lea.vmem %s671_s0, %s417_s23  ;;  %s592_s6 = scalar_lea.vmem %s674_s3, %s417_s23 }
  0x15   : > { %v215_v2 = vld [vmem:[%s564_s28] sm:$0xff]  ;;  %v216_v3 = vld [vmem:[%s564_s28 + $0x8] sm:$0xff]  ;;  %v217_v4 = vld [vmem:[%s564_s28 + $0x10] sm:$0xff] }
  0x16   : > { %v238_v5 = vmul.f32 %v559_v0, %v215_v2  ;;  %v239_v6 = vmul.f32 %v559_v0, %v216_v3  ;;  %v240_v7 = vmul.f32 %v559_v0, %v217_v4  ;;  %v218_v8 = vld [vmem:[%s564_s28 + $0x18] sm:$0xff]  ;;  %v219_v9 = vld [vmem:[%s564_s28 + $0x20] sm:$0xff]  ;;  %v220_v10 = vld [vmem:[%s564_s28 + $0x28] sm:$0xff] }
  0x17   : > { %v241_v11 = vmul.f32 %v559_v0, %v218_v8  ;;  %v242_v12 = vmul.f32 %v559_v0, %v219_v9  ;;  %v243_v13 = vmul.f32 %v559_v0, %v220_v10  ;;  %v221_v14 = vld [vmem:[%s564_s28 + $0x30] sm:$0xff]  ;;  %v222_v15 = vld [vmem:[%s564_s28 + $0x38] sm:$0xff]  ;;  %v223_v24 = vld [vmem:[%s564_s28 + $0x40] sm:$0xff] }
  0x18   : > { %v261_v16 = vadd.f32 %v569_v1, %v238_v5  ;;  %v262_v17 = vadd.f32 %v569_v1, %v239_v6  ;;  %v263_v18 = vadd.f32 %v569_v1, %v240_v7  ;;  %v244_v19 = vmul.f32 %v559_v0, %v221_v14  ;;  %v224_v25 = vld [vmem:[%s564_s28 + $0x48] sm:$0xff]  ;;  %v225_v26 = vld [vmem:[%s564_s28 + $0x50] sm:$0xff]  ;;  %v226_v31 = vld [vmem:[%s564_s28 + $0x58] sm:$0xff] }
  0x19   : > { %v264_v20 = vadd.f32 %v569_v1, %v241_v11  ;;  %v265_v21 = vadd.f32 %v569_v1, %v242_v12  ;;  %v266_v22 = vadd.f32 %v569_v1, %v243_v13  ;;  %v245_v23 = vmul.f32 %v559_v0, %v222_v15  ;;  %v227_v32 = vld [vmem:[%s564_s28 + $0x60] sm:$0xff]  ;;  %v228_v33 = vld [vmem:[%s564_s28 + $0x68] sm:$0xff]  ;;  %v229_v38 = vld [vmem:[%s564_s28 + $0x70] sm:$0xff] }
  0x1a   : > { %v277_v27 = vmax.f32 %v261_v16, 0.0  ;;  %v278_v28 = vmax.f32 %v262_v17, 0.0  ;;  %v279_v29 = vmax.f32 %v263_v18, 0.0  ;;  %v267_v30 = vadd.f32 %v569_v1, %v244_v19  ;;  %v230_v43 = vld [vmem:[%s564_s28 + $0x78] sm:$0xff] }
  0x1b   : > { %v280_v34 = vmax.f32 %v264_v20, 0.0  ;;  %v281_v35 = vmax.f32 %v265_v21, 0.0  ;;  %v282_v36 = vmax.f32 %v266_v22, 0.0  ;;  %v268_v37 = vadd.f32 %v569_v1, %v245_v23 }
  0x1c   : > { %294 = vst.msk [vmem:[%s592_s6] sm:$0xff] %vm293_vm0, %v277_v27  ;;  %295 = vst.msk [vmem:[%s592_s6 + $0x8] sm:$0xff] %vm293_vm0, %v278_v28  ;;  %v283_v39 = vmax.f32 %v267_v30, 0.0  ;;  %v246_v40 = vmul.f32 %v559_v0, %v223_v24  ;;  %v247_v41 = vmul.f32 %v559_v0, %v224_v25  ;;  %v248_v42 = vmul.f32 %v559_v0, %v225_v26 }
  0x1d   : > { %296 = vst.msk [vmem:[%s592_s6 + $0x10] sm:$0xff] %vm293_vm0, %v279_v29  ;;  %297 = vst.msk [vmem:[%s592_s6 + $0x18] sm:$0xff] %vm293_vm0, %v280_v34  ;;  %v284_v44 = vmax.f32 %v268_v37, 0.0  ;;  %v249_v45 = vmul.f32 %v559_v0, %v226_v31  ;;  %v250_v46 = vmul.f32 %v559_v0, %v227_v32  ;;  %v251_v47 = vmul.f32 %v559_v0, %v228_v33 }
  0x1e   : > { %298 = vst.msk [vmem:[%s592_s6 + $0x20] sm:$0xff] %vm293_vm0, %v281_v35  ;;  %299 = vst.msk [vmem:[%s592_s6 + $0x28] sm:$0xff] %vm293_vm0, %v282_v36  ;;  %v269_v48 = vadd.f32 %v569_v1, %v246_v40  ;;  %v270_v49 = vadd.f32 %v569_v1, %v247_v41  ;;  %v271_v50 = vadd.f32 %v569_v1, %v248_v42 }
  0x1f   : > { %300 = vst.msk [vmem:[%s592_s6 + $0x30] sm:$0xff] %vm293_vm0, %v283_v39  ;;  %v252_v51 = vmul.f32 %v559_v0, %v229_v38  ;;  %301 = vst.msk [vmem:[%s592_s6 + $0x38] sm:$0xff] %vm293_vm0, %v284_v44  ;;  %v272_v52 = vadd.f32 %v569_v1, %v249_v45  ;;  %v273_v53 = vadd.f32 %v569_v1, %v250_v46 }
  0x20   : > { %v274_v54 = vadd.f32 %v569_v1, %v251_v47  ;;  %v253_v55 = vmul.f32 %v559_v0, %v230_v43  ;;  %v285_v56 = vmax.f32 %v269_v48, 0.0  ;;  %v286_v57 = vmax.f32 %v270_v49, 0.0 }
  0x21   : > { %v287_v58 = vmax.f32 %v271_v50, 0.0  ;;  %v275_v59 = vadd.f32 %v569_v1, %v252_v51  ;;  %v288_v60 = vmax.f32 %v272_v52, 0.0  ;;  %v289_v61 = vmax.f32 %v273_v53, 0.0 }
  0x22   : > { %v290_v62 = vmax.f32 %v274_v54, 0.0  ;;  %v276_v63 = vadd.f32 %v569_v1, %v253_v55  ;;  %302 = vst.msk [vmem:[%s592_s6 + $0x40] sm:$0xff] %vm293_vm0, %v285_v56  ;;  %303 = vst.msk [vmem:[%s592_s6 + $0x48] sm:$0xff] %vm293_vm0, %v286_v57 }
  0x23   : > { %304 = vst.msk [vmem:[%s592_s6 + $0x50] sm:$0xff] %vm293_vm0, %v287_v58  ;;  %v291_v2 = vmax.f32 %v275_v59, 0.0  ;;  %305 = vst.msk [vmem:[%s592_s6 + $0x58] sm:$0xff] %vm293_vm0, %v288_v60 }
  0x24   : > { %306 = vst.msk [vmem:[%s592_s6 + $0x60] sm:$0xff] %vm293_vm0, %v289_v61  ;;  %307 = vst.msk [vmem:[%s592_s6 + $0x68] sm:$0xff] %vm293_vm0, %v290_v62  ;;  %v292_v0 = vmax.f32 %v276_v63, 0.0 }
  0x25   : > { %308 = vst.msk [vmem:[%s592_s6 + $0x70] sm:$0xff] %vm293_vm0, %v291_v2 }
  0x26   : > { %309 = vst.msk [vmem:[%s592_s6 + $0x78] sm:$0xff] %vm293_vm0, %v292_v0 }
  0x27 PF: > { %s13_s16 = sadd.s32 1, %s504_s16   ;;  %s675_s12 = smov %s496_s14 }
  0x28   : > { %p10_p7 = scmp.ge.s32.totalorder %s13_s16, 6   ;;  %s676_s13 = smov %s500_s15 }
  0x29   : > { %s677_s14 = smov %s680_s17  ;;  %s678_s15 = smov %s684_s18 }
  0x2a   :  { %12 = sbr.rel (!%p10_p7) target bundleno = 3 (0x3), region = 62 }

// kernel: up_block_forward.6
= control target key start
LH: loop header
LB: loop body
LE: loop exit
PB: predicated region body
PF: predicated region fallthrough
CT: control target
= control target key end

     0   :  { %s1846_s24 = smov 0   ;;  %s1848_s25 = smov 0   ;;  %s2322_s0 = inlined_call_operand.vmem [shape: bf16[2,16,16,8], index: 0, kind: input, shape index: {}]   ;;  %s2323_s1 = inlined_call_operand.vmem [shape: bf16[2,2,2,16,8], index: 1, kind: input, shape index: {}]   ;;  %s2324_s2 = inlined_call_operand.vmem [shape: f32[1,8], index: 2, kind: input, shape index: {}]   ;;  %s2325_s3 = inlined_call_operand.vmem [shape: f32[1,8], index: 3, kind: input, shape index: {}]   ;;  %s2326_s4 = inlined_call_operand.vmem [shape: bf16[72,8], index: 4, kind: input, shape index: {}]   ;;  %s2327_s5 = inlined_call_operand.vmem [shape: f32[1,8], index: 5, kind: input, shape index: {}]   ;;  %s2328_s6 = inlined_call_operand.vmem [shape: f32[2,16,16,8], index: 6, kind: output, shape index: {0}]   ;;  %s2329_s7 = inlined_call_operand.vmem [shape: f32[2,2,2,8], index: 7, kind: output, shape index: {1}]  }
   0x1   :  { %s1850_s26 = smov 0   ;;  %s1852_s27 = smov 0  }
   0x2   :  { %s1854_s28 = smov 0  }
   0x3 LB: > { %s27_s29 = sadd.s32 1, %s1787_s26  ;;  %s30_s30 = sadd.s32 1, %s1791_s27  ;;  %s1795_s28 = sphi %s1854_s28, %s18_s28   ;;  %s1791_s27 = sphi %s1852_s27, %s2333_s27   ;;  %s1787_s26 = sphi %s1850_s26, %s2332_s26   ;;  %s1783_s25 = sphi %s1848_s25, %s2331_s25   ;;  %s1779_s24 = sphi %s1846_s24, %s2330_s24  }
   0x4   : > { %p28_p0 = scmp.ge.s32.totalorder %s27_s29, 2  ;;  %p1570_p1 = scmp.ge.s32.totalorder %s1795_s28, 1 }
   0x5   : > { %p280_p2 = scmp.lt.s32.totalorder %s1795_s28, 5 }
   0x6   : > { %s2335_s29 = smov (%p28_p0, %s27_s29), 0  ;;  %s2337_s30 = smov (!%p28_p0, %s30_s30), %s1791_s27 }
   0x7   : > { %p281_p3 = pnand %p1570_p1, %p280_p2  ;;  %p32_p4 = scmp.ge.s32.totalorder %s2337_s30, 2 }
   0x8   : > { %p340_p5 = scmp.lt.s32.totalorder (!%p281_p3), %s1783_s25, 1  ;;  %p352_p6 = scmp.lt.s32.totalorder (!%p281_p3), %s1779_s24, 1  ;;  %vm379_vm0 = vcmask (!%p281_p3), 64512   ;;  %vm382_vm1 = vcmask (!%p281_p3), 58368   ;;  %v1797_v0 = vmov (!%p281_p3), 0.0   ;;  %vm1189_vm4 = vcmask (!%p281_p3), 1043456  }
   0x9   : > { %s2339_s30 = smov (%p32_p4, %s2337_s30), 0  ;;  %284 = sbr.rel (%p281_p3) target bundleno = 530 (0x212), region = 44 }
   0xa   : > { %380 = vst.msk [vmem:[#allocation2] sm:$0xff] (!%p281_p3), %vm379_vm0, %v1797_v0  ;;  %381 = vst.msk [vmem:[#allocation2 + $0x8] sm:$0xff] (!%p281_p3), %vm379_vm0, %v1797_v0  ;;  %s1571_s10 = sshll.u32 (!%p281_p3), %s1779_s24, 3  ;;  %p526_p7 = scmp.gt.s32.totalorder (!%p281_p3), %s1779_s24, 0  ;;  %v1933_v1 = vld [vmem:[%s2324_s2] ss:$0 sm:$0xff] (!%p281_p3) }
   0xb   : > { %383 = vst.msk [vmem:[#allocation2 + $0x10] sm:$0x3] (!%p281_p3), %vm382_vm1, %v1797_v0  ;;  %386 = vst.msk [vmem:[#allocation2 + $0x28] sm:$0x3] (!%p281_p3), %vm382_vm1, %v1797_v0  ;;  %p342_p8 = scmp.lt.s32.totalorder (!%p281_p3), %s1571_s10, 15  ;;  %s1799_s15 = smov (!%p281_p3), 16  }
   0xc   : > { %384 = vst.msk [vmem:[#allocation2 + $0x18] sm:$0xff] (!%p281_p3), %vm379_vm0, %v1797_v0  ;;  %385 = vst.msk [vmem:[#allocation2 + $0x20] sm:$0xff] (!%p281_p3), %vm379_vm0, %v1797_v0  ;;  %v1938_v8 = vld [vmem:[%s2325_s3] ss:$0 sm:$0xff] (!%p281_p3)  ;;  %s1802_s18 = smov (!%p281_p3), 40   ;;  %s1805_s19 = smov (!%p281_p3), 64  }
   0xd   : > { %387 = vst.msk [vmem:[#allocation2 + $0x30] sm:$0xff] (!%p281_p3), %vm379_vm0, %v1797_v0  ;;  %388 = vst.msk [vmem:[#allocation2 + $0x38] sm:$0xff] (!%p281_p3), %vm379_vm0, %v1797_v0  ;;  %vm648_vm5 = vcmask (!%p281_p3), 130112   ;;  %vm713_vm6 = vcmask (!%p281_p3), 195712   ;;  %vm778_vm7 = vcmask (!%p281_p3), 261312   ;;  %vm843_vm8 = vcmask (!%p281_p3), 326912  }
   0xe   : > { %389 = vst.msk [vmem:[#allocation2 + $0x40] sm:$0x3] (!%p281_p3), %vm382_vm1, %v1797_v0  ;;  %392 = vst.msk [vmem:[#allocation2 + $0x58] sm:$0x3] (!%p281_p3), %vm382_vm1, %v1797_v0  ;;  %vm908_vm9 = vcmask (!%p281_p3), 392512   ;;  %vm974_vm10 = vcmask (!%p281_p3), 458112  }
   0xf   : > { %390 = vst.msk [vmem:[#allocation2 + $0x48] sm:$0xff] (!%p281_p3), %vm379_vm0, %v1797_v0  ;;  %391 = vst.msk [vmem:[#allocation2 + $0x50] sm:$0xff] (!%p281_p3), %vm379_vm0, %v1797_v0  ;;  %vm1039_vm11 = vcmask (!%p281_p3), 523712   ;;  %vm1104_vm12 = vcmask (!%p281_p3), 589312   ;;  %vm1164_vm13 = vcmask (!%p281_p3), 588800   ;;  %vm1343_vm14 = vcmask (!%p281_p3), 57344  }
  0x10   : > { %393 = vst.msk [vmem:[#allocation2 + $0x60] sm:$0xff] %vm379_vm0, %v1797_v0  ;;  %394 = vst.msk [vmem:[#allocation2 + $0x68] sm:$0xff] %vm379_vm0, %v1797_v0  ;;  %s2341_s25 = smov (!%p340_p5, %s1783_s25), 1  ;;  %s2343_s10 = smov (!%p342_p8, %s1571_s10), 15 }
  0x11   : > { %395 = vst.msk [vmem:[#allocation2 + $0x70] sm:$0x3] %vm382_vm1, %v1797_v0  ;;  %398 = vst.msk [vmem:[#allocation2 + $0x88] sm:$0x3] %vm382_vm1, %v1797_v0  ;;  %s1920_s8 = scalar_select %p352_p6, %s1779_s24, 1 }
  0x12   : > { %396 = vst.msk [vmem:[#allocation2 + $0x78] sm:$0xff] %vm379_vm0, %v1797_v0  ;;  %397 = vst.msk [vmem:[#allocation2 + $0x80] sm:$0xff] %vm379_vm0, %v1797_v0  ;;  %s1576_s9 = sshll.u32 %s2341_s25, 3  ;;  %s1573_s17 = sshll.u32 %s2341_s25, 5 }
  0x13   : > { %399 = vst.msk [vmem:[#allocation2 + $0x90] sm:$0xff] %vm379_vm0, %v1797_v0  ;;  %400 = vst.msk [vmem:[#allocation2 + $0x98] sm:$0xff] %vm379_vm0, %v1797_v0  ;;  %s1575_s11 = sshll.u32 %s1920_s8, 2  ;;  %s1572_s23 = sshll.u32 %s2343_s10, 1 }
  0x14   : > { %401 = vst.msk [vmem:[#allocation2 + $0xa0] sm:$0x3] %vm382_vm1, %v1797_v0  ;;  %404 = vst.msk [vmem:[#allocation2 + $0xb8] sm:$0x3] %vm382_vm1, %v1797_v0  ;;  %s356_s12 = sadd.s32 %s1576_s9, %s1575_s11  ;;  %s1943_s9 = sadd.s32 %s1573_s17, %s1572_s23 }
  0x15   : > { %402 = vst.msk [vmem:[#allocation2 + $0xa8] sm:$0xff] %vm379_vm0, %v1797_v0  ;;  %403 = vst.msk [vmem:[#allocation2 + $0xb0] sm:$0xff] %vm379_vm0, %v1797_v0  ;;  %s1577_s13 = sshll.u32 %s356_s12, 2  ;;  %s1574_s11 = sshll.u32 %s1943_s9, 2 }
  0x16   : > { %405 = vst.msk [vmem:[#allocation2 + $0xc0] sm:$0xff] %vm379_vm0, %v1797_v0  ;;  %406 = vst.msk [vmem:[#allocation2 + $0xc8] sm:$0xff] %vm379_vm0, %v1797_v0  ;;  %s358_s16 = scalar_lea.vmem %s2323_s1, %s1577_s13  ;;  %s1952_s14 = scalar_lea.vmem %s2322_s0, %s1574_s11 }
  0x17   : > { %407 = vst.msk [vmem:[#allocation2 + $0xd0] sm:$0x3] %vm382_vm1, %v1797_v0  ;;  %410 = vst.msk [vmem:[#allocation2 + $0xe8] sm:$0x3] %vm382_vm1, %v1797_v0  ;;  %v1637_v2 = vld [vmem:[%s358_s16] sm:$0xff]   ;;  %v1651_v3 = vld [vmem:[%s358_s16 + $0x8] sm:$0xff]  }
  0x18   : > { %408 = vst.msk [vmem:[#allocation2 + $0xd8] sm:$0xff] %vm379_vm0, %v1797_v0  ;;  %409 = vst.msk [vmem:[#allocation2 + $0xe0] sm:$0xff] %vm379_vm0, %v1797_v0  ;;  %s527_s20 = scalar_select %p526_p7, 1, 0  ;;  %v1638_v4 = vunpack.c.l.bf16 %v1637_v2  ;;  %v1639_v5 = vunpack.c.h.bf16 %v1637_v2  ;;  %v1642_v6 = vunpack.c.l.bf16 %v1651_v3  ;;  %v1643_v7 = vunpack.c.h.bf16 %v1651_v3  ;;  %v1605_v18 = vld [vmem:[%s1952_s14] sm:$0xff]   ;;  %v1644_v19 = vld [vmem:[%s1952_s14 + $0x8] sm:$0xff]  }
  0x19   : > { %v1645_v20 = vld [vmem:[%s1952_s14 + $0x10] sm:$0xff]   ;;  %v1606_v23 = vunpack.c.l.bf16 %v1605_v18  ;;  %v1607_v24 = vunpack.c.h.bf16 %v1605_v18  ;;  %v1610_v25 = vunpack.c.l.bf16 %v1644_v19  ;;  %v1611_v26 = vunpack.c.h.bf16 %v1644_v19  ;;  %v1646_v27 = vld [vmem:[%s1952_s14 + $0x18] sm:$0xff]   ;;  %v1647_v48 = vld [vmem:[%s1952_s14 + $0x20] sm:$0xff]   ;;  %s1798_s10 = smov 8   ;;  %s1800_s24 = smov 24  }
  0x1a   : > { %v509_v9 = vmul.f32 %v1638_v4, %v1933_v1  ;;  %v510_v10 = vmul.f32 %v1639_v5, %v1933_v1  ;;  %v528_v11 = vstv %s527_s20  ;;  %v520_v12 = vmul.f32 %v1642_v6, %v1933_v1  ;;  %v1648_v49 = vld [vmem:[%s1952_s14 + $0x28] sm:$0xff]   ;;  %v1649_v54 = vld [vmem:[%s1952_s14 + $0x30] sm:$0xff]   ;;  %v1650_v63 = vld [vmem:[%s1952_s14 + $0x38] sm:$0xff]   ;;  %s2011_s16 = scalar_select %p352_p6, 1, 0 }
  0x1b   : > { %v521_v13 = vmul.f32 %v1643_v7, %v1933_v1  ;;  %vm529_vm2 = vcmp.eq.s32.totalorder %v528_v11, 1  ;;  %v1614_v30 = vunpack.c.l.bf16 %v1645_v20  ;;  %v1615_v31 = vunpack.c.h.bf16 %v1645_v20  ;;  %s1801_s17 = smov 32   ;;  %s1803_s23 = smov 48  }
  0x1c   : > { %v511_v14 = vadd.f32 %v1938_v8, %v509_v9  ;;  %v512_v15 = vadd.f32 %v1938_v8, %v510_v10  ;;  %v1958_v21 = vadd.f32 %v1938_v8, %v520_v12  ;;  %v451_v32 = vmul.f32 %v1606_v23, %v1933_v1  ;;  %s1804_s13 = smov 56  }
  0x1d   : > { %v1961_v22 = vadd.f32 %v1938_v8, %v521_v13  ;;  %v452_v33 = vmul.f32 %v1607_v24, %v1933_v1  ;;  %v453_v34 = vmul.f32 %v1610_v25, %v1933_v1  ;;  %v454_v35 = vmul.f32 %v1611_v26, %v1933_v1 }
  0x1e   : > { %v513_v16 = vmax.f32 %v511_v14, 0.0  ;;  %v514_v17 = vmax.f32 %v512_v15, 0.0  ;;  %v455_v36 = vmul.f32 %v1614_v30, %v1933_v1  ;;  %v456_v37 = vmul.f32 %v1615_v31, %v1933_v1 }
  0x1f   : > { %v1618_v38 = vunpack.c.l.bf16 %v1646_v27  ;;  %v1619_v39 = vunpack.c.h.bf16 %v1646_v27  ;;  %v473_v40 = vadd.f32 %v1938_v8, %v451_v32  ;;  %v474_v41 = vadd.f32 %v1938_v8, %v452_v33 }
  0x20   : > { %v530_v28 = vsel %vm529_vm2, %v513_v16, 0.0  ;;  %v531_v29 = vsel %vm529_vm2, %v514_v17, 0.0  ;;  %v475_v42 = vadd.f32 %v1938_v8, %v453_v34  ;;  %v476_v43 = vadd.f32 %v1938_v8, %v454_v35 }
  0x21   : > { %555 = vst.msk [vmem:[#allocation2 + $0x1] sm:$0xff] %vm379_vm0, %v530_v28  ;;  %556 = vst.msk [vmem:[#allocation2 + $0x9] sm:$0xff] %vm379_vm0, %v531_v29  ;;  %v477_v44 = vadd.f32 %v1938_v8, %v455_v36  ;;  %v478_v45 = vadd.f32 %v1938_v8, %v456_v37  ;;  %v457_v46 = vmul.f32 %v1618_v38, %v1933_v1  ;;  %v489_v50 = vmax.f32 %v473_v40, 0.0 }
  0x22   : > { %v458_v47 = vmul.f32 %v1619_v39, %v1933_v1  ;;  %v490_v51 = vmax.f32 %v474_v41, 0.0  ;;  %v491_v52 = vmax.f32 %v475_v42, 0.0  ;;  %v492_v53 = vmax.f32 %v476_v43, 0.0 }
  0x23   : > { %v493_v55 = vmax.f32 %v477_v44, 0.0  ;;  %v494_v56 = vmax.f32 %v478_v45, 0.0  ;;  %v479_v57 = vadd.f32 %v1938_v8, %v457_v46  ;;  %539 = vst.msk [vmem:[#allocation2 + $0x19] sm:$0xff] %vm379_vm0, %v489_v50  ;;  %v1622_v59 = vunpack.c.l.bf16 %v1647_v48 }
  0x24   : > { %v480_v58 = vadd.f32 %v1938_v8, %v458_v47  ;;  %540 = vst.msk [vmem:[#allocation2 + $0x21] sm:$0xff] %vm379_vm0, %v490_v51  ;;  %541 = vst.msk [vmem:[#allocation2 + $0x31] sm:$0xff] %vm379_vm0, %v491_v52  ;;  %v1623_v60 = vunpack.c.h.bf16 %v1647_v48  ;;  %v1626_v61 = vunpack.c.l.bf16 %v1648_v49  ;;  %v1627_v62 = vunpack.c.h.bf16 %v1648_v49 }
  0x25   : > { %542 = vst.msk [vmem:[#allocation2 + $0x39] sm:$0xff] %vm379_vm0, %v492_v53  ;;  %543 = vst.msk [vmem:[#allocation2 + $0x49] sm:$0xff] %vm379_vm0, %v493_v55  ;;  %v495_v4 = vmax.f32 %v479_v57, 0.0  ;;  %v1630_v6 = vunpack.c.l.bf16 %v1649_v54  ;;  %v1631_v7 = vunpack.c.h.bf16 %v1649_v54  ;;  %v459_v11 = vmul.f32 %v1622_v59, %v1933_v1 }
  0x26   : > { %544 = vst.msk [vmem:[#allocation2 + $0x51] sm:$0xff] %vm379_vm0, %v494_v56  ;;  %v496_v5 = vmax.f32 %v480_v58, 0.0  ;;  %v460_v12 = vmul.f32 %v1623_v60, %v1933_v1  ;;  %v461_v13 = vmul.f32 %v1626_v61, %v1933_v1  ;;  %v462_v15 = vmul.f32 %v1627_v62, %v1933_v1 }
  0x27   : > { %545 = vst.msk [vmem:[#allocation2 + $0x61] sm:$0xff] %vm379_vm0, %v495_v4  ;;  %v463_v16 = vmul.f32 %v1630_v6, %v1933_v1  ;;  %v464_v17 = vmul.f32 %v1631_v7, %v1933_v1  ;;  %v481_v18 = vadd.f32 %v1938_v8, %v459_v11  ;;  %v1634_v23 = vunpack.c.l.bf16 %v1650_v63 }
  0x28   : > { %v592_v0 = vld [vmem:[#allocation2 + $0x1] sm:$0xff]  ;;  %v593_v2 = vld [vmem:[#allocation2 + $0x9] sm:$0xff]  ;;  %546 = vst.msk [vmem:[#allocation2 + $0x69] sm:$0xff] %vm379_vm0, %v496_v5  ;;  %v482_v19 = vadd.f32 %v1938_v8, %v460_v12  ;;  %v483_v20 = vadd.f32 %v1938_v8, %v461_v13  ;;  %v484_v24 = vadd.f32 %v1938_v8, %v462_v15  ;;  %v1635_v27 = vunpack.c.h.bf16 %v1650_v63 }
  0x29   : > { %v657_v3 = vld [vmem:[#allocation2 + $0x2] sm:$0xff]  ;;  %v608_v9 = vpack.c.bf16 %v593_v2, %v592_v0  ;;  %v658_v10 = vld [vmem:[#allocation2 + $0xa] sm:$0xff]  ;;  %v485_v25 = vadd.f32 %v1938_v8, %v463_v16  ;;  %v486_v26 = vadd.f32 %v1938_v8, %v464_v17  ;;  %v497_v30 = vmax.f32 %v481_v18, 0.0 }
  0x2a   : > { %v673_v14 = vpack.c.bf16 %v658_v10, %v657_v3  ;;  %v560_v28 = vld [vmem:[#allocation2] sm:$0xff]  ;;  %v561_v29 = vld [vmem:[#allocation2 + $0x8] sm:$0xff]  ;;  %v498_v31 = vmax.f32 %v482_v19, 0.0  ;;  %v499_v32 = vmax.f32 %v483_v20, 0.0  ;;  %v465_v33 = vmul.f32 %v1634_v23, %v1933_v1  ;;  %v722_v43 = vld [vmem:[#allocation2 + $0x18] sm:$0xff] }
  0x2b   : > { %624 = vrot.lane.b32.xlu0 %v608_v9, %s1798_s10  ;;  %v594_v34 = vld [vmem:[#allocation2 + $0x19] sm:$0xff]  ;;  %v595_v35 = vld [vmem:[#allocation2 + $0x21] sm:$0xff]  ;;  %v500_v37 = vmax.f32 %v484_v24, 0.0  ;;  %v501_v38 = vmax.f32 %v485_v25, 0.0  ;;  %v502_v39 = vmax.f32 %v486_v26, 0.0  ;;  %v466_v40 = vmul.f32 %v1635_v27, %v1933_v1  ;;  %547 = vst.msk [vmem:[#allocation2 + $0x79] sm:$0xff] %vm379_vm0, %v497_v30 }
  0x2c   : > { %689 = vrot.lane.b32.xlu1 %v673_v14, %s1799_s15  ;;  %v659_v36 = vld [vmem:[#allocation2 + $0x1a] sm:$0xff]  ;;  %v609_v41 = vpack.c.bf16 %v595_v35, %v594_v34  ;;  %v660_v42 = vld [vmem:[#allocation2 + $0x22] sm:$0xff]  ;;  %548 = vst.msk [vmem:[#allocation2 + $0x81] sm:$0xff] %vm379_vm0, %v498_v31  ;;  %549 = vst.msk [vmem:[#allocation2 + $0x91] sm:$0xff] %vm379_vm0, %v499_v32  ;;  %v487_v45 = vadd.f32 %v1938_v8, %v465_v33  ;;  %v576_v46 = vpack.c.bf16 %v561_v29, %v560_v28 }
  0x2d   : > { %v723_v44 = vld [vmem:[#allocation2 + $0x20] sm:$0xff]  ;;  %v674_v47 = vpack.c.bf16 %v660_v42, %v659_v36  ;;  %v724_v49 = vld [vmem:[#allocation2 + $0x30] sm:$0xff]  ;;  %v725_v50 = vld [vmem:[#allocation2 + $0x38] sm:$0xff]  ;;  %550 = vst.msk [vmem:[#allocation2 + $0x99] sm:$0xff] %vm379_vm0, %v500_v37  ;;  %v488_v1 = vadd.f32 %v1938_v8, %v466_v40  ;;  %v524_v53 = vmax.f32 %v1958_v21, 0.0  ;;  %v525_v54 = vmax.f32 %v1961_v22, 0.0 }
  0x2e   : > { %v738_v48 = vpack.c.bf16 %v723_v44, %v722_v43  ;;  %551 = vst.msk [vmem:[#allocation2 + $0xa9] sm:$0xff] %vm379_vm0, %v501_v38  ;;  %552 = vst.msk [vmem:[#allocation2 + $0xb1] sm:$0xff] %vm379_vm0, %v502_v39  ;;  %v739_v51 = vpack.c.bf16 %v725_v50, %v724_v49  ;;  %v503_v52 = vmax.f32 %v487_v45, 0.0  ;;  %v920_v55 = vld [vmem:[#allocation2 + $0x48] sm:$0xff]  ;;  %v921_v56 = vld [vmem:[#allocation2 + $0x50] sm:$0xff]  ;;  %v534_v58 = vstv %s2011_s16 }
  0x2f   : > { %626 = vrot.lane.b32.xlu0 %v609_v41, %s1798_s10  ;;  %584 = vst.msk [vmem:[#allocation3] sm:$0xff] %vm379_vm0, %v576_v46  ;;  %v504_v57 = vmax.f32 %v488_v1, 0.0  ;;  %v789_v59 = vld [vmem:[#allocation2 + $0x31] sm:$0xff]  ;;  %v790_v8 = vld [vmem:[#allocation2 + $0x39] sm:$0xff]  ;;  %v2029_v60 = vpack.c.bf16 %v921_v56, %v920_v55  ;;  %vm535_vm3 = vcmp.eq.s32.totalorder %v534_v58, 1  ;;  %v729_v61 = vld [vmem:[#allocation2 + $0x68] sm:$0xff] }
  0x30   : > { %691 = vrot.lane.b32.xlu1 %v674_v47, %s1799_s15  ;;  %585 = vst.msk [vmem:[#allocation3 + $0x8] sm:$0xff] %vm379_vm0, %v738_v48  ;;  %553 = vst.msk [vmem:[#allocation2 + $0xc1] sm:$0xff] %vm379_vm0, %v503_v52  ;;  %v728_v21 = vld [vmem:[#allocation2 + $0x60] sm:$0xff]  ;;  %v536_v22 = vsel %vm535_vm3, %v524_v53, 0.0  ;;  %v537_v62 = vsel %vm535_vm3, %v525_v54, 0.0  ;;  %v804_v0 = vpack.c.bf16 %v790_v8, %v789_v59  ;;  %v854_v4 = vld [vmem:[#allocation2 + $0x32] sm:$0xff] }
  0x31   : > { %586 = vst.msk [vmem:[#allocation3 + $0x10] sm:$0xff] %vm379_vm0, %v739_v51  ;;  %554 = vst.msk [vmem:[#allocation2 + $0xc9] sm:$0xff] %vm379_vm0, %v504_v57  ;;  %v2035_v63 = vpack.c.bf16 %v729_v61, %v728_v21  ;;  %v855_v5 = vld [vmem:[#allocation2 + $0x3a] sm:$0xff]  ;;  %v985_v15 = vld [vmem:[#allocation2 + $0x49] sm:$0xff] }
  0x32   : > { %558 = vst.msk [vmem:[#allocation2 + $0xd9] sm:$0xff] %vm379_vm0, %v536_v22  ;;  %559 = vst.msk [vmem:[#allocation2 + $0xe1] sm:$0xff] %vm379_vm0, %v537_v62  ;;  %v924_v2 = vld [vmem:[#allocation2 + $0x78] sm:$0xff]  ;;  %v869_v11 = vpack.c.bf16 %v855_v5, %v854_v4  ;;  %v1752_v17 = vld [vmem:[%s2326_s4] sm:$0xff]  }
  0x33   : > { %754 = vrot.lane.b32.xlu0 %v738_v48, %s1800_s24  ;;  %587 = vst.msk [vmem:[#allocation3 + $0x18] sm:$0xff] %vm379_vm0, %v2029_v60  ;;  %v925_v3 = vld [vmem:[#allocation2 + $0x80] sm:$0xff]  ;;  %588 = vst.msk [vmem:[#allocation3 + $0x20] sm:$0xff] %vm379_vm0, %v2035_v63  ;;  %v732_v7 = vld [vmem:[#allocation2 + $0x90] sm:$0xff]  ;;  %1665 = vmatprep.subr.bf16.mxu0 %v1752_v17 }
  0x34   : > { %756 = vrot.lane.b32.xlu1 %v739_v51, %s1800_s24  ;;  %v2042_v6 = vpack.c.bf16 %v925_v3, %v924_v2  ;;  %v733_v9 = vld [vmem:[#allocation2 + $0x98] sm:$0xff]  ;;  %v1753_v18 = vld [vmem:[%s2326_s4 + $0x8] sm:$0xff]   ;;  %1666 = vmatpush3.bf16.msra.mxu0 %v1752_v17  ;;  %v1754_v20 = vld [vmem:[%s2326_s4 + $0x10] sm:$0xff]  }
  0x35   : > { %v2047_v10 = vpack.c.bf16 %v733_v9, %v732_v7  ;;  %v928_v12 = vld [vmem:[#allocation2 + $0xa8] sm:$0xff]  ;;  %v929_v13 = vld [vmem:[#allocation2 + $0xb0] sm:$0xff]  ;;  %1691 = vmatprep.subr.bf16.mxu1 %v1752_v17  ;;  %1667 = vmatprep.subr.bf16.mxu0 %v1753_v18  ;;  %v1755_v25 = vld [vmem:[%s2326_s4 + $0x18] sm:$0xff]  }
  0x36   : > { %589 = vst.msk [vmem:[#allocation3 + $0x28] sm:$0xff] %vm379_vm0, %v2042_v6  ;;  %v2052_v14 = vpack.c.bf16 %v929_v13, %v928_v12  ;;  %v986_v16 = vld [vmem:[#allocation2 + $0x51] sm:$0xff]  ;;  %1696 = vmatpush3.bf16.msra.mxu1 %v1752_v17  ;;  %v1756_v27 = vld [vmem:[%s2326_s4 + $0x20] ss:$0 sps:$4 sm:$0xff]   ;;  %v793_v29 = vld [vmem:[#allocation2 + $0x61] sm:$0xff] }
  0x37   : > { %819 = vrot.lane.b32.xlu0 %v609_v41, %s1801_s17  ;;  %590 = vst.msk [vmem:[#allocation3 + $0x30] sm:$0xff] %vm379_vm0, %v2047_v10  ;;  %v1000_v19 = vpack.c.bf16 %v986_v16, %v985_v15  ;;  %1692 = vmatprep.subr.bf16.mxu1 %v1753_v18  ;;  %v1050_v23 = vld [vmem:[#allocation2 + $0x4a] sm:$0xff]  ;;  %v1051_v24 = vld [vmem:[#allocation2 + $0x52] sm:$0xff]  ;;  %v1191_v28 = vsel %vm1189_vm4, %v1756_v27, 0  ;;  %v858_v32 = vld [vmem:[#allocation2 + $0x62] sm:$0xff] }
  0x38   : > { %821 = vrot.lane.b32.xlu1 %v804_v0, %s1801_s17  ;;  %591 = vst.msk [vmem:[#allocation3 + $0x38] sm:$0xff] %vm379_vm0, %v2052_v14  ;;  %1668 = vmatpush3.bf16.msra.mxu0 %v1753_v18  ;;  %v1065_v26 = vpack.c.bf16 %v1051_v24, %v1050_v23  ;;  %v794_v30 = vld [vmem:[#allocation2 + $0x69] sm:$0xff]  ;;  %v989_v35 = vld [vmem:[#allocation2 + $0x79] sm:$0xff]  ;;  %v990_v36 = vld [vmem:[#allocation2 + $0x81] sm:$0xff] }
  0x39   : > { %1669 = vmatprep.subr.bf16.mxu0 %v1754_v20  ;;  %v806_v31 = vpack.c.bf16 %v794_v30, %v793_v29  ;;  %v859_v33 = vld [vmem:[#allocation2 + $0x6a] sm:$0xff]  ;;  %v1002_v37 = vpack.c.bf16 %v990_v36, %v989_v35  ;;  %v1054_v38 = vld [vmem:[#allocation2 + $0x7a] sm:$0xff]  ;;  %v1055_v39 = vld [vmem:[#allocation2 + $0x82] sm:$0xff] }
  0x3a   : > { %1697 = vmatpush3.bf16.msra.mxu1 %v1753_v18  ;;  %v871_v34 = vpack.c.bf16 %v859_v33, %v858_v32  ;;  %v1067_v40 = vpack.c.bf16 %v1055_v39, %v1054_v38  ;;  %v797_v41 = vld [vmem:[#allocation2 + $0x91] sm:$0xff]  ;;  %v798_v42 = vld [vmem:[#allocation2 + $0x99] sm:$0xff]  ;;  %v737_v53 = vld [vmem:[#allocation2 + $0xc8] sm:$0xff] }
  0x3b   : > { %884 = vrot.lane.b32.xlu0 %v674_v47, %s1802_s18  ;;  %1693 = vmatprep.subr.bf16.mxu1 %v1754_v20  ;;  %v808_v43 = vpack.c.bf16 %v798_v42, %v797_v41  ;;  %v862_v44 = vld [vmem:[#allocation2 + $0x92] sm:$0xff]  ;;  %v863_v45 = vld [vmem:[#allocation2 + $0x9a] sm:$0xff]  ;;  %v993_v47 = vld [vmem:[#allocation2 + $0xa9] sm:$0xff] }
  0x3c   : > { %886 = vrot.lane.b32.xlu1 %v869_v11, %s1802_s18  ;;  %1670 = vmatpush3.bf16.msra.mxu0 %v1754_v20  ;;  %v873_v46 = vpack.c.bf16 %v863_v45, %v862_v44  ;;  %v994_v48 = vld [vmem:[#allocation2 + $0xb1] sm:$0xff]  ;;  %v736_v52 = vld [vmem:[#allocation2 + $0xc0] sm:$0xff]  ;;  %v802_v56 = vld [vmem:[#allocation2 + $0xc9] sm:$0xff] }
  0x3d   : > { %1671 = vmatprep.subr.bf16.mxu0 %v1755_v25  ;;  %v1004_v49 = vpack.c.bf16 %v994_v48, %v993_v47  ;;  %v1058_v50 = vld [vmem:[#allocation2 + $0xaa] sm:$0xff]  ;;  %v1059_v1 = vld [vmem:[#allocation2 + $0xb2] sm:$0xff]  ;;  %v745_v54 = vpack.c.bf16 %v737_v53, %v736_v52  ;;  %v801_v55 = vld [vmem:[#allocation2 + $0xc1] sm:$0xff] }
  0x3e   : > { %1698 = vmatpush3.bf16.msra.mxu1 %v1754_v20  ;;  %v810_v57 = vpack.c.bf16 %v802_v56, %v801_v55  ;;  %v866_v58 = vld [vmem:[#allocation2 + $0xc2] sm:$0xff]  ;;  %v867_v59 = vld [vmem:[#allocation2 + $0xca] sm:$0xff]  ;;  %v1062_v4 = vld [vmem:[#allocation2 + $0xda] sm:$0xff] }
  0x3f   : > { %950 = vrot.lane.b32.xlu0 %v739_v51, %s1803_s23  ;;  %1694 = vmatprep.subr.bf16.mxu1 %v1755_v25  ;;  %v1069_v51 = vpack.c.bf16 %v1059_v1, %v1058_v50  ;;  %v875_v8 = vpack.c.bf16 %v867_v59, %v866_v58  ;;  %v933_v21 = vld [vmem:[#allocation2 + $0xe0] sm:$0xff] }
  0x40   : > { %952 = vrot.lane.b32.xlu1 %v2029_v60, %s1803_s23  ;;  %1672 = vmatpush3.bf16.msra.mxu0 %v1755_v25  ;;  %v1063_v5 = vld [vmem:[#allocation2 + $0xe2] sm:$0xff] }
  0x41   : > { %1701 = vmatprep.subr.msk.bf16.mxu0 %vm1189_vm4, %v1756_v27  ;;  %v1071_v7 = vpack.c.bf16 %v1063_v5, %v1062_v4 }
  0x42   : > { %1699 = vmatpush3.bf16.msra.mxu1 %v1755_v25 }
  0x43   : > { %1015 = vrot.lane.b32.xlu0 %v804_v0, %s1804_s13  ;;  %1702 = vmatprep.subr.msk.bf16.mxu1 %vm1189_vm4, %v1756_v27 }
  0x44   : > { %1017 = vrot.lane.b32.xlu1 %v1000_v19, %s1804_s13  ;;  %1674 = vmatpush3.bf16.msra.mxu0 %v1191_v28 }
  0x46   : > { %1700 = vmatpush3.bf16.msra.mxu1 %v1191_v28 }
  0x47   : > { %1080 = vrot.lane.b32.xlu0 %v869_v11, %s1805_s19 }
  0x48   : > { %628 = vrot.lane.b32.xlu1 %v804_v0, %s1798_s10  ;;  %v998_v0 = vld [vmem:[#allocation2 + $0xe1] sm:$0xff] }
  0x4b   : > { %1082 = vrot.lane.b32.xlu0 %v1065_v26, %s1805_s19 }
  0x4c   : > { %630 = vrot.lane.b32.xlu1 %v1000_v19, %s1798_s10 }
  0x4f   : > { %693 = vrot.lane.b32.xlu0 %v869_v11, %s1799_s15 }
  0x50   : > { %695 = vrot.lane.b32.xlu1 %v1065_v26, %s1799_s15 }
  0x53   : > { %758 = vrot.lane.b32.xlu0 %v2029_v60, %s1800_s24  ;;  %v932_v60 = vld [vmem:[#allocation2 + $0xd8] sm:$0xff] }
  0x54   : > { %760 = vrot.lane.b32.xlu1 %v2035_v63, %s1800_s24  ;;  %v941_v62 = vpack.c.bf16 %v933_v21, %v932_v60 }
  0x57   : > { %823 = vrot.lane.b32.xlu0 %v1000_v19, %s1801_s17 }
  0x58   : > { %825 = vrot.lane.b32.xlu1 %v806_v31, %s1801_s17 }
  0x5b   : > { %888 = vrot.lane.b32.xlu0 %v1065_v26, %s1802_s18 }
  0x5c   : > { %890 = vrot.lane.b32.xlu1 %v871_v34, %s1802_s18 }
  0x5f   : > { %954 = vrot.lane.b32.xlu0 %v2035_v63, %s1803_s23  ;;  %v997_v63 = vld [vmem:[#allocation2 + $0xd9] sm:$0xff] }
  0x60   : > { %956 = vrot.lane.b32.xlu1 %v2042_v6, %s1803_s23  ;;  %v1006_v2 = vpack.c.bf16 %v998_v0, %v997_v63 }
  0x63   : > { %1019 = vrot.lane.b32.xlu0 %v806_v31, %s1804_s13 }
  0x64   : > { %1021 = vrot.lane.b32.xlu1 %v1002_v37, %s1804_s13 }
  0x67   : > { %1084 = vrot.lane.b32.xlu0 %v871_v34, %s1805_s19 }
  0x68   : > { %632 = vrot.lane.b32.xlu1 %v806_v31, %s1798_s10 }
  0x6b   : > { %1086 = vrot.lane.b32.xlu0 %v1067_v40, %s1805_s19 }
  0x6c   : > { %634 = vrot.lane.b32.xlu1 %v1002_v37, %s1798_s10 }
  0x6f   : > { %697 = vrot.lane.b32.xlu0 %v871_v34, %s1799_s15 }
  0x70   : > { %699 = vrot.lane.b32.xlu1 %v1067_v40, %s1799_s15 }
  0x73   : > { %762 = vrot.lane.b32.xlu0 %v2042_v6, %s1800_s24 }
  0x74   : > { %764 = vrot.lane.b32.xlu1 %v2047_v10, %s1800_s24 }
  0x77   : > { %827 = vrot.lane.b32.xlu0 %v1002_v37, %s1801_s17 }
  0x78   : > { %829 = vrot.lane.b32.xlu1 %v808_v43, %s1801_s17 }
  0x7b   : > { %892 = vrot.lane.b32.xlu0 %v1067_v40, %s1802_s18 }
  0x7c   : > { %894 = vrot.lane.b32.xlu1 %v873_v46, %s1802_s18 }
  0x7f   : > { %958 = vrot.lane.b32.xlu0 %v2047_v10, %s1803_s23 }
  0x80   : > { %960 = vrot.lane.b32.xlu1 %v2052_v14, %s1803_s23 }
  0x83   : > { %1023 = vrot.lane.b32.xlu0 %v808_v43, %s1804_s13 }
  0x84   : > { %1025 = vrot.lane.b32.xlu1 %v1004_v49, %s1804_s13 }
  0x87   : > { %1088 = vrot.lane.b32.xlu0 %v873_v46, %s1805_s19 }
  0x88   : > { %636 = vrot.lane.b32.xlu1 %v808_v43, %s1798_s10 }
  0x8b   : > { %1090 = vrot.lane.b32.xlu0 %v1069_v51, %s1805_s19 }
  0x8c   : > { %638 = vrot.lane.b32.xlu1 %v1004_v49, %s1798_s10  ;;  %s1581_s10 = sshll.u32 %s1943_s9, 3  ;;  %s1582_s9 = sshll.u32 %s2341_s25, 1 }
  0x8d   : > { %s2220_s22 = scalar_lea.vmem %s2328_s6, %s1581_s10 }
  0x8f   : > { %701 = vrot.lane.b32.xlu0 %v873_v46, %s1799_s15 }
  0x90   : > { %703 = vrot.lane.b32.xlu1 %v1069_v51, %s1799_s15 }
  0x93   : > { %766 = vrot.lane.b32.xlu0 %v2052_v14, %s1800_s24 }
  0x94   : > { %768 = vrot.lane.b32.xlu1 %v745_v54, %s1800_s24 }
  0x97   : > { %831 = vrot.lane.b32.xlu0 %v1004_v49, %s1801_s17 }
  0x98   : > { %833 = vrot.lane.b32.xlu1 %v810_v57, %s1801_s17 }
  0x9b   : > { %896 = vrot.lane.b32.xlu0 %v1069_v51, %s1802_s18 }
  0x9c   : > { %898 = vrot.lane.b32.xlu1 %v875_v8, %s1802_s18 }
  0x9d   : > { %v625_v61 = vpop.permute.xlu0 %624 }
  0x9e   : > { %649 = vst.msk [vmem:[#allocation3] sm:$0xff] %vm648_vm5, %v625_v61  ;;  %v690_v22 = vpop.permute.xlu1 %689 }
  0x9f   : > { %714 = vst.msk [vmem:[#allocation3] sm:$0xff] %vm713_vm6, %v690_v22  ;;  %962 = vrot.lane.b32.xlu0 %v745_v54, %s1803_s23 }
  0xa0   : > { %964 = vrot.lane.b32.xlu1 %v941_v62, %s1803_s23  ;;  %s375_s23 = sadd.s32 %s1582_s9, %s1920_s8 }
  0xa1   : > { %v627_v3 = vpop.permute.xlu0 %626  ;;  %s1583_s11 = sshll.u32 %s375_s23, 1 }
  0xa2   : > { %650 = vst.msk [vmem:[#allocation3 + $0x8] sm:$0xff] %vm648_vm5, %v627_v3  ;;  %v692_v6 = vpop.permute.xlu1 %691  ;;  %s377_s14 = scalar_lea.vmem %s2329_s7, %s1583_s11 }
  0xa3   : > { %715 = vst.msk [vmem:[#allocation3 + $0x8] sm:$0xff] %vm713_vm6, %v692_v6  ;;  %1027 = vrot.lane.b32.xlu0 %v810_v57, %s1804_s13 }
  0xa4   : > { %1029 = vrot.lane.b32.xlu1 %v1006_v2, %s1804_s13 }
  0xa5   : > { %v755_v9 = vpop.permute.xlu0 %754 }
  0xa6   : > { %779 = vst.msk [vmem:[#allocation3] sm:$0xff] %vm778_vm7, %v755_v9  ;;  %v757_v10 = vpop.permute.xlu1 %756 }
  0xa7   : > { %780 = vst.msk [vmem:[#allocation3 + $0x8] sm:$0xff] %vm778_vm7, %v757_v10  ;;  %1092 = vrot.lane.b32.xlu0 %v875_v8, %s1805_s19 }
  0xa8   : > { %1094 = vrot.lane.b32.xlu1 %v1071_v7, %s1805_s19 }
  0xa9   : > { %v820_v11 = vpop.permute.xlu0 %819 }
  0xaa   : > { %844 = vst.msk [vmem:[#allocation3] sm:$0xff] %vm843_vm8, %v820_v11  ;;  %v822_v12 = vpop.permute.xlu1 %821 }
  0xab   : > { %845 = vst.msk [vmem:[#allocation3 + $0x8] sm:$0xff] %vm843_vm8, %v822_v12 }
  0xad   : > { %v885_v13 = vpop.permute.xlu0 %884 }
  0xae   : > { %909 = vst.msk [vmem:[#allocation3] sm:$0xff] %vm908_vm9, %v885_v13  ;;  %v887_v14 = vpop.permute.xlu1 %886  ;;  %v2215_v13 = vld [vmem:[%s2327_s5] ss:$0 sm:$0xff] }
  0xaf   : > { %910 = vst.msk [vmem:[#allocation3 + $0x8] sm:$0xff] %vm908_vm9, %v887_v14 }
  0xb1   : > { %v951_v15 = vpop.permute.xlu0 %950 }
  0xb2   : > { %975 = vst.msk [vmem:[#allocation3] sm:$0xff] %vm974_vm10, %v951_v15  ;;  %v953_v16 = vpop.permute.xlu1 %952 }
  0xb3   : > { %976 = vst.msk [vmem:[#allocation3 + $0x8] sm:$0xff] %vm974_vm10, %v953_v16 }
  0xb5   : > { %v1016_v17 = vpop.permute.xlu0 %1015 }
  0xb6   : > { %1040 = vst.msk [vmem:[#allocation3] sm:$0xff] %vm1039_vm11, %v1016_v17  ;;  %v1018_v18 = vpop.permute.xlu1 %1017 }
  0xb7   : > { %1041 = vst.msk [vmem:[#allocation3 + $0x8] sm:$0xff] %vm1039_vm11, %v1018_v18 }
  0xb9   : > { %v1081_v19 = vpop.permute.xlu0 %1080 }
  0xba   : > { %1105 = vst.msk [vmem:[#allocation3] sm:$0xff] %vm1104_vm12, %v1081_v19  ;;  %v629_v20 = vpop.permute.xlu1 %628 }
  0xbb   : > { %651 = vst.msk [vmem:[#allocation3 + $0x10] sm:$0xff] %vm648_vm5, %v629_v20 }
  0xbd   : > { %v1083_v23 = vpop.permute.xlu0 %1082 }
  0xbe   : > { %1106 = vst.msk [vmem:[#allocation3 + $0x8] sm:$0xff] %vm1104_vm12, %v1083_v23  ;;  %v631_v24 = vpop.permute.xlu1 %630 }
  0xbf   : > { %652 = vst.msk [vmem:[#allocation3 + $0x18] sm:$0xff] %vm648_vm5, %v631_v24 }
  0xc1   : > { %v694_v25 = vpop.permute.xlu0 %693  ;;  %v1113_v26 = vld [vmem:[#allocation3] sm:$0xff] }
  0xc2   : > { %716 = vst.msk [vmem:[#allocation3 + $0x10] sm:$0xff] %vm713_vm6, %v694_v25  ;;  %v696_v27 = vpop.permute.xlu1 %695  ;;  %1675 = vmatprep.mubr.msk.bf16.mxu0 %vm1164_vm13, %v1113_v26 }
  0xc3   : > { %717 = vst.msk [vmem:[#allocation3 + $0x18] sm:$0xff] %vm713_vm6, %v696_v27 }
  0xc5   : > { %v759_v28 = vpop.permute.xlu0 %758  ;;  %v1114_v29 = vld [vmem:[#allocation3 + $0x8] sm:$0xff] }
  0xc6   : > { %781 = vst.msk [vmem:[#allocation3 + $0x10] sm:$0xff] %vm778_vm7, %v759_v28  ;;  %v761_v30 = vpop.permute.xlu1 %760  ;;  %1676 = vmatmul.mubr.msk.bf16.vlgmr.msra.gmra.mrb[0].mxu0 %vm1164_vm13, %v1114_v29 }
  0xc7   : > { %782 = vst.msk [vmem:[#allocation3 + $0x18] sm:$0xff] %vm778_vm7, %v761_v30 }
  0xc9   : > { %v824_v31 = vpop.permute.xlu0 %823 }
  0xca   : > { %846 = vst.msk [vmem:[#allocation3 + $0x10] sm:$0xff] %vm843_vm8, %v824_v31  ;;  %v826_v32 = vpop.permute.xlu1 %825 }
  0xcb   : > { %847 = vst.msk [vmem:[#allocation3 + $0x18] sm:$0xff] %vm843_vm8, %v826_v32 }
  0xcd   : > { %v889_v33 = vpop.permute.xlu0 %888 }
  0xce   : > { %911 = vst.msk [vmem:[#allocation3 + $0x10] sm:$0xff] %vm908_vm9, %v889_v33  ;;  %v891_v34 = vpop.permute.xlu1 %890 }
  0xcf   : > { %912 = vst.msk [vmem:[#allocation3 + $0x18] sm:$0xff] %vm908_vm9, %v891_v34 }
  0xd1   : > { %v955_v35 = vpop.permute.xlu0 %954 }
  0xd2   : > { %977 = vst.msk [vmem:[#allocation3 + $0x10] sm:$0xff] %vm974_vm10, %v955_v35  ;;  %v957_v36 = vpop.permute.xlu1 %956 }
  0xd3   : > { %978 = vst.msk [vmem:[#allocation3 + $0x18] sm:$0xff] %vm974_vm10, %v957_v36 }
  0xd5   : > { %v1020_v37 = vpop.permute.xlu0 %1019 }
  0xd6   : > { %1042 = vst.msk [vmem:[#allocation3 + $0x10] sm:$0xff] %vm1039_vm11, %v1020_v37  ;;  %v1022_v38 = vpop.permute.xlu1 %1021 }
  0xd7   : > { %1043 = vst.msk [vmem:[#allocation3 + $0x18] sm:$0xff] %vm1039_vm11, %v1022_v38 }
  0xd9   : > { %v1085_v39 = vpop.permute.xlu0 %1084 }
  0xda   : > { %1107 = vst.msk [vmem:[#allocation3 + $0x10] sm:$0xff] %vm1104_vm12, %v1085_v39  ;;  %v633_v40 = vpop.permute.xlu1 %632 }
  0xdb   : > { %653 = vst.msk [vmem:[#allocation3 + $0x20] sm:$0xff] %vm648_vm5, %v633_v40 }
  0xdd   : > { %v1087_v41 = vpop.permute.xlu0 %1086 }
  0xde   : > { %1108 = vst.msk [vmem:[#allocation3 + $0x18] sm:$0xff] %vm1104_vm12, %v1087_v41  ;;  %v635_v42 = vpop.permute.xlu1 %634 }
  0xdf   : > { %654 = vst.msk [vmem:[#allocation3 + $0x28] sm:$0xff] %vm648_vm5, %v635_v42 }
  0xe1   : > { %v698_v43 = vpop.permute.xlu0 %697  ;;  %v1115_v44 = vld [vmem:[#allocation3 + $0x10] sm:$0xff] }
  0xe2   : > { %718 = vst.msk [vmem:[#allocation3 + $0x20] sm:$0xff] %vm713_vm6, %v698_v43  ;;  %v700_v45 = vpop.permute.xlu1 %699  ;;  %1679 = vmatprep.mubr.msk.bf16.mxu0 %vm1164_vm13, %v1115_v44 }
  0xe3   : > { %719 = vst.msk [vmem:[#allocation3 + $0x28] sm:$0xff] %vm713_vm6, %v700_v45 }
  0xe5   : > { %v763_v46 = vpop.permute.xlu0 %762  ;;  %v1116_v47 = vld [vmem:[#allocation3 + $0x18] sm:$0xff] }
  0xe6   : > { %783 = vst.msk [vmem:[#allocation3 + $0x20] sm:$0xff] %vm778_vm7, %v763_v46  ;;  %v765_v48 = vpop.permute.xlu1 %764  ;;  %1680 = vmatmul.mubr.msk.bf16.gmra.mrb[4].mxu0 %vm1164_vm13, %v1116_v47 }
  0xe7   : > { %784 = vst.msk [vmem:[#allocation3 + $0x28] sm:$0xff] %vm778_vm7, %v765_v48 }
  0xe9   : > { %v828_v49 = vpop.permute.xlu0 %827 }
  0xea   : > { %848 = vst.msk [vmem:[#allocation3 + $0x20] sm:$0xff] %vm843_vm8, %v828_v49  ;;  %v830_v50 = vpop.permute.xlu1 %829 }
  0xeb   : > { %849 = vst.msk [vmem:[#allocation3 + $0x28] sm:$0xff] %vm843_vm8, %v830_v50 }
  0xed   : > { %v893_v1 = vpop.permute.xlu0 %892 }
  0xee   : > { %913 = vst.msk [vmem:[#allocation3 + $0x20] sm:$0xff] %vm908_vm9, %v893_v1  ;;  %v895_v51 = vpop.permute.xlu1 %894 }
  0xef   : > { %914 = vst.msk [vmem:[#allocation3 + $0x28] sm:$0xff] %vm908_vm9, %v895_v51 }
  0xf1   : > { %v959_v52 = vpop.permute.xlu0 %958 }
  0xf2   : > { %979 = vst.msk [vmem:[#allocation3 + $0x20] sm:$0xff] %vm974_vm10, %v959_v52  ;;  %v961_v53 = vpop.permute.xlu1 %960 }
  0xf3   : > { %980 = vst.msk [vmem:[#allocation3 + $0x28] sm:$0xff] %vm974_vm10, %v961_v53 }
  0xf5   : > { %v1024_v54 = vpop.permute.xlu0 %1023 }
  0xf6   : > { %1044 = vst.msk [vmem:[#allocation3 + $0x20] sm:$0xff] %vm1039_vm11, %v1024_v54  ;;  %v1026_v55 = vpop.permute.xlu1 %1025 }
  0xf7   : > { %1045 = vst.msk [vmem:[#allocation3 + $0x28] sm:$0xff] %vm1039_vm11, %v1026_v55 }
  0xf9   : > { %v1089_v56 = vpop.permute.xlu0 %1088 }
  0xfa   : > { %1109 = vst.msk [vmem:[#allocation3 + $0x20] sm:$0xff] %vm1104_vm12, %v1089_v56  ;;  %v637_v57 = vpop.permute.xlu1 %636 }
  0xfb   : > { %655 = vst.msk [vmem:[#allocation3 + $0x30] sm:$0xff] %vm648_vm5, %v637_v57 }
  0xfd   : > { %v1091_v58 = vpop.permute.xlu0 %1090 }
  0xfe   : > { %1110 = vst.msk [vmem:[#allocation3 + $0x28] sm:$0xff] %vm1104_vm12, %v1091_v58  ;;  %v639_v59 = vpop.permute.xlu1 %638 }
  0xff   : > { %656 = vst.msk [vmem:[#allocation3 + $0x38] sm:$0xff] %vm648_vm5, %v639_v59 }
 0x101   : > { %v702_v8 = vpop.permute.xlu0 %701  ;;  %v1117_v60 = vld [vmem:[#allocation3 + $0x20] sm:$0xff] }
 0x102   : > { %720 = vst.msk [vmem:[#allocation3 + $0x30] sm:$0xff] %vm713_vm6, %v702_v8  ;;  %v704_v21 = vpop.permute.xlu1 %703  ;;  %1683 = vmatprep.mubr.msk.bf16.mxu1 %vm1164_vm13, %v1117_v60 }
 0x103   : > { %721 = vst.msk [vmem:[#allocation3 + $0x38] sm:$0xff] %vm713_vm6, %v704_v21 }
 0x105   : > { %v767_v61 = vpop.permute.xlu0 %766  ;;  %v1118_v22 = vld [vmem:[#allocation3 + $0x28] sm:$0xff] }
 0x106   : > { %785 = vst.msk [vmem:[#allocation3 + $0x30] sm:$0xff] %vm778_vm7, %v767_v61  ;;  %v769_v62 = vpop.permute.xlu1 %768  ;;  %1684 = vmatmul.mubr.msk.bf16.vlgmr.msra.gmra.mrb[0].mxu1 %vm1164_vm13, %v1118_v22 }
 0x107   : > { %786 = vst.msk [vmem:[#allocation3 + $0x38] sm:$0xff] %vm778_vm7, %v769_v62 }
 0x109   : > { %v832_v63 = vpop.permute.xlu0 %831 }
 0x10a   : > { %850 = vst.msk [vmem:[#allocation3 + $0x30] sm:$0xff] %vm843_vm8, %v832_v63  ;;  %v834_v0 = vpop.permute.xlu1 %833 }
 0x10b   : > { %851 = vst.msk [vmem:[#allocation3 + $0x38] sm:$0xff] %vm843_vm8, %v834_v0 }
 0x10d   : > { %v897_v2 = vpop.permute.xlu0 %896 }
 0x10e   : > { %915 = vst.msk [vmem:[#allocation3 + $0x30] sm:$0xff] %vm908_vm9, %v897_v2  ;;  %v899_v3 = vpop.permute.xlu1 %898 }
 0x10f   : > { %916 = vst.msk [vmem:[#allocation3 + $0x38] sm:$0xff] %vm908_vm9, %v899_v3 }
 0x111   : > { %v963_v4 = vpop.permute.xlu0 %962 }
 0x112   : > { %981 = vst.msk [vmem:[#allocation3 + $0x30] sm:$0xff] %vm974_vm10, %v963_v4  ;;  %v965_v5 = vpop.permute.xlu1 %964 }
 0x113   : > { %982 = vst.msk [vmem:[#allocation3 + $0x38] sm:$0xff] %vm974_vm10, %v965_v5 }
 0x115   : > { %v1028_v6 = vpop.permute.xlu0 %1027 }
 0x116   : > { %1046 = vst.msk [vmem:[#allocation3 + $0x30] sm:$0xff] %vm1039_vm11, %v1028_v6  ;;  %v1030_v7 = vpop.permute.xlu1 %1029 }
 0x117   : > { %1047 = vst.msk [vmem:[#allocation3 + $0x38] sm:$0xff] %vm1039_vm11, %v1030_v7 }
 0x119   : > { %v1093_v9 = vpop.permute.xlu0 %1092 }
 0x11a   : > { %1111 = vst.msk [vmem:[#allocation3 + $0x30] sm:$0xff] %vm1104_vm12, %v1093_v9  ;;  %v1095_v10 = vpop.permute.xlu1 %1094 }
 0x11b   : > { %1112 = vst.msk [vmem:[#allocation3 + $0x38] sm:$0xff] %vm1104_vm12, %v1095_v10 }
 0x121   : > { %v1119_v11 = vld [vmem:[#allocation3 + $0x30] sm:$0xff] }
 0x122   : > { %1687 = vmatprep.mubr.msk.bf16.mxu1 %vm1164_vm13, %v1119_v11  ;;  %v1120_v12 = vld [vmem:[#allocation3 + $0x38] sm:$0xff] }
 0x123   : > { %1688 = vmatmul.mubr.msk.bf16.gmra.mrb[4].mxu1 %vm1164_vm13, %v1120_v12 }
 0x199   : > { %v1677_v14 = vpop.f32.mrb[0].mxu0 }
 0x19a   : > { %v1236_v15 = vadd.f32 %v1677_v14, %v2215_v13  ;;  %v1227_v16 = vpop.f32.mrb[1].mxu0 }
 0x19b   : > { %v1228_v17 = vadd.f32 %v2215_v13, %v1227_v16  ;;  %v1678_v18 = vpop.f32.mrb[2].mxu0 }
 0x19c   : > { %1292 = vst.msk [vmem:[%s2220_s22 + $0x10] sm:$0xff] %vm379_vm0, %v1236_v15  ;;  %v1239_v19 = vadd.f32 %v1678_v18, %v2215_v13  ;;  %v1230_v20 = vpop.f32.mrb[3].mxu0  ;;  %v1347_v25 = vmul.f32 %v1236_v15, %v1236_v15  ;;  %v1309_v30 = vsel %vm379_vm0, %v1236_v15, 0.0 }
 0x19d   : > { %1290 = vst.msk [vmem:[%s2220_s22] sm:$0xff] %vm379_vm0, %v1228_v17  ;;  %v1345_v23 = vmul.f32 %v1228_v17, %v1228_v17  ;;  %v1231_v24 = vadd.f32 %v2215_v13, %v1230_v20  ;;  %v1306_v26 = vsel %vm379_vm0, %v1228_v17, 0.0 }
 0x19e   : > { %1293 = vst.msk [vmem:[%s2220_s22 + $0x18] sm:$0xff] %vm379_vm0, %v1239_v19  ;;  %v1348_v32 = vmul.f32 %v1239_v19, %v1239_v19  ;;  %v1364_v36 = vsel %vm379_vm0, %v1347_v25, 0.0  ;;  %v1311_v37 = vsel %vm379_vm0, %v1239_v19, 0.0 }
 0x19f   : > { %1291 = vst.msk [vmem:[%s2220_s22 + $0x8] sm:$0xff] %vm379_vm0, %v1231_v24  ;;  %v1307_v27 = vsel %vm379_vm0, %v1231_v24, 0.0  ;;  %v1346_v28 = vmul.f32 %v1231_v24, %v1231_v24  ;;  %v1361_v31 = vsel %vm379_vm0, %v1345_v23, 0.0 }
 0x1a0   : > { %v1308_v29 = vadd.f32 %v1307_v27, %v1306_v26  ;;  %v1366_v40 = vsel %vm379_vm0, %v1348_v32, 0.0 }
 0x1a1   : > { %v1362_v33 = vsel %vm379_vm0, %v1346_v28, 0.0 }
 0x1a2   : > { %v1310_v34 = vadd.f32 %v1309_v30, %v1308_v29  ;;  %v1363_v35 = vadd.f32 %v1362_v33, %v1361_v31 }
 0x1a4   : > { %v1365_v38 = vadd.f32 %v1364_v36, %v1363_v35  ;;  %v1312_v39 = vadd.f32 %v1311_v37, %v1310_v34 }
 0x1a6   : > { %v1367_v41 = vadd.f32 %v1366_v40, %v1365_v38 }
 0x1b9   : > { %v1681_v42 = vpop.f32.mrb[4].mxu0 }
 0x1ba   : > { %v1252_v43 = vadd.f32 %v1681_v42, %v2215_v13  ;;  %v1243_v44 = vpop.f32.mrb[5].mxu0 }
 0x1bb   : > { %v1244_v45 = vadd.f32 %v2215_v13, %v1243_v44  ;;  %v1682_v46 = vpop.f32.mrb[6].mxu0 }
 0x1bc   : > { %1296 = vst.msk [vmem:[%s2220_s22 + $0x30] sm:$0xff] %vm379_vm0, %v1252_v43  ;;  %v1255_v47 = vadd.f32 %v1682_v46, %v2215_v13  ;;  %v1246_v48 = vpop.f32.mrb[7].mxu0  ;;  %v1351_v52 = vmul.f32 %v1252_v43, %v1252_v43  ;;  %v1317_v58 = vsel %vm379_vm0, %v1252_v43, 0.0 }
 0x1bd   : > { %1294 = vst.msk [vmem:[%s2220_s22 + $0x20] sm:$0xff] %vm379_vm0, %v1244_v45  ;;  %v1313_v49 = vsel %vm379_vm0, %v1244_v45, 0.0  ;;  %v1349_v50 = vmul.f32 %v1244_v45, %v1244_v45  ;;  %v1247_v1 = vadd.f32 %v2215_v13, %v1246_v48 }
 0x1be   : > { %v1314_v51 = vadd.f32 %v1313_v49, %v1312_v39  ;;  %1297 = vst.msk [vmem:[%s2220_s22 + $0x38] sm:$0xff] %vm379_vm0, %v1255_v47  ;;  %v1352_v59 = vmul.f32 %v1255_v47, %v1255_v47  ;;  %v1372_v61 = vsel %vm379_vm0, %v1351_v52, 0.0  ;;  %v1319_v22 = vsel %vm379_vm0, %v1255_v47, 0.0 }
 0x1bf   : > { %v1368_v53 = vsel %vm379_vm0, %v1349_v50, 0.0  ;;  %1295 = vst.msk [vmem:[%s2220_s22 + $0x28] sm:$0xff] %vm379_vm0, %v1247_v1  ;;  %v1315_v54 = vsel %vm379_vm0, %v1247_v1, 0.0  ;;  %v1350_v55 = vmul.f32 %v1247_v1, %v1247_v1 }
 0x1c0   : > { %v1369_v56 = vadd.f32 %v1368_v53, %v1367_v41  ;;  %v1316_v57 = vadd.f32 %v1315_v54, %v1314_v51  ;;  %v1374_v0 = vsel %vm379_vm0, %v1352_v59, 0.0 }
 0x1c1   : > { %v1370_v8 = vsel %vm379_vm0, %v1350_v55, 0.0 }
 0x1c2   : > { %v1318_v60 = vadd.f32 %v1317_v58, %v1316_v57  ;;  %v1371_v21 = vadd.f32 %v1370_v8, %v1369_v56 }
 0x1c4   : > { %v1373_v62 = vadd.f32 %v1372_v61, %v1371_v21  ;;  %v1320_v63 = vadd.f32 %v1319_v22, %v1318_v60 }
 0x1c6   : > { %v1375_v2 = vadd.f32 %v1374_v0, %v1373_v62 }
 0x1d9   : > { %v1685_v3 = vpop.f32.mrb[0].mxu1 }
 0x1da   : > { %v1268_v4 = vadd.f32 %v1685_v3, %v2215_v13  ;;  %v1259_v5 = vpop.f32.mrb[1].mxu1 }
 0x1db   : > { %v1260_v6 = vadd.f32 %v2215_v13, %v1259_v5  ;;  %v1686_v7 = vpop.f32.mrb[2].mxu1 }
 0x1dc   : > { %1300 = vst.msk [vmem:[%s2220_s22 + $0x50] sm:$0xff] %vm379_vm0, %v1268_v4  ;;  %v1271_v9 = vadd.f32 %v1686_v7, %v2215_v13  ;;  %v1262_v10 = vpop.f32.mrb[3].mxu1  ;;  %v1355_v16 = vmul.f32 %v1268_v4, %v1268_v4  ;;  %v1325_v24 = vsel %vm379_vm0, %v1268_v4, 0.0 }
 0x1dd   : > { %1298 = vst.msk [vmem:[%s2220_s22 + $0x40] sm:$0xff] %vm379_vm0, %v1260_v6  ;;  %v1321_v11 = vsel %vm379_vm0, %v1260_v6, 0.0  ;;  %v1353_v12 = vmul.f32 %v1260_v6, %v1260_v6  ;;  %v1263_v14 = vadd.f32 %v2215_v13, %v1262_v10 }
 0x1de   : > { %v1322_v15 = vadd.f32 %v1321_v11, %v1320_v63  ;;  %1301 = vst.msk [vmem:[%s2220_s22 + $0x58] sm:$0xff] %vm379_vm0, %v1271_v9  ;;  %v1356_v25 = vmul.f32 %v1271_v9, %v1271_v9  ;;  %v1380_v29 = vsel %vm379_vm0, %v1355_v16, 0.0  ;;  %v1327_v30 = vsel %vm379_vm0, %v1271_v9, 0.0 }
 0x1df   : > { %v1376_v17 = vsel %vm379_vm0, %v1353_v12, 0.0  ;;  %1299 = vst.msk [vmem:[%s2220_s22 + $0x48] sm:$0xff] %vm379_vm0, %v1263_v14  ;;  %v1323_v18 = vsel %vm379_vm0, %v1263_v14, 0.0  ;;  %v1354_v19 = vmul.f32 %v1263_v14, %v1263_v14 }
 0x1e0   : > { %v1377_v20 = vadd.f32 %v1376_v17, %v1375_v2  ;;  %v1324_v23 = vadd.f32 %v1323_v18, %v1322_v15  ;;  %v1382_v33 = vsel %vm379_vm0, %v1356_v25, 0.0 }
 0x1e1   : > { %v1378_v26 = vsel %vm379_vm0, %v1354_v19, 0.0 }
 0x1e2   : > { %v1326_v27 = vadd.f32 %v1325_v24, %v1324_v23  ;;  %v1379_v28 = vadd.f32 %v1378_v26, %v1377_v20 }
 0x1e4   : > { %v1381_v31 = vadd.f32 %v1380_v29, %v1379_v28  ;;  %v1328_v32 = vadd.f32 %v1327_v30, %v1326_v27 }
 0x1e6   : > { %v1383_v34 = vadd.f32 %v1382_v33, %v1381_v31 }
 0x1f6   : > { %v1689_v35 = vpop.f32.mrb[4].mxu1 }
 0x1f7   : > { %v1284_v36 = vadd.f32 %v1689_v35, %v2215_v13  ;;  %v1275_v37 = vpop.f32.mrb[5].mxu1 }
 0x1f8   : > { %v1276_v38 = vadd.f32 %v2215_v13, %v1275_v37  ;;  %v1690_v39 = vpop.f32.mrb[6].mxu1 }
 0x1f9   : > { %1304 = vst.msk [vmem:[%s2220_s22 + $0x70] sm:$0xff] %vm379_vm0, %v1284_v36  ;;  %v1287_v40 = vadd.f32 %v1690_v39, %v2215_v13  ;;  %v1278_v41 = vpop.f32.mrb[7].mxu1  ;;  %v1359_v46 = vmul.f32 %v1284_v36, %v1284_v36  ;;  %v1333_v51 = vsel %vm379_vm0, %v1284_v36, 0.0 }
 0x1fa   : > { %1302 = vst.msk [vmem:[%s2220_s22 + $0x60] sm:$0xff] %vm379_vm0, %v1276_v38  ;;  %v1329_v42 = vsel %vm379_vm0, %v1276_v38, 0.0  ;;  %v1357_v43 = vmul.f32 %v1276_v38, %v1276_v38  ;;  %v1279_v44 = vadd.f32 %v2215_v13, %v1278_v41 }
 0x1fb   : > { %v1330_v45 = vadd.f32 %v1329_v42, %v1328_v32  ;;  %1305 = vst.msk [vmem:[%s2220_s22 + $0x78] sm:$0xff] %vm379_vm0, %v1287_v40  ;;  %v1360_v52 = vmul.f32 %v1287_v40, %v1287_v40  ;;  %v1388_v55 = vsel %vm379_vm0, %v1359_v46, 0.0  ;;  %v1335_v56 = vsel %vm379_vm0, %v1287_v40, 0.0 }
 0x1fc   : > { %v1384_v47 = vsel %vm379_vm0, %v1357_v43, 0.0  ;;  %1303 = vst.msk [vmem:[%s2220_s22 + $0x68] sm:$0xff] %vm379_vm0, %v1279_v44  ;;  %v1331_v48 = vsel %vm379_vm0, %v1279_v44, 0.0  ;;  %v1358_v49 = vmul.f32 %v1279_v44, %v1279_v44 }
 0x1fd   : > { %v1385_v50 = vadd.f32 %v1384_v47, %v1383_v34  ;;  %v1332_v1 = vadd.f32 %v1331_v48, %v1330_v45  ;;  %v1390_v59 = vsel %vm379_vm0, %v1360_v52, 0.0 }
 0x1fe   : > { %v1386_v13 = vsel %vm379_vm0, %v1358_v49, 0.0 }
 0x1ff   : > { %v1334_v53 = vadd.f32 %v1333_v51, %v1332_v1  ;;  %v1387_v54 = vadd.f32 %v1386_v13, %v1385_v50 }
 0x201   : > { %v1336_v57 = vadd.f32 %v1335_v56, %v1334_v53  ;;  %v1389_v58 = vadd.f32 %v1388_v55, %v1387_v54 }
 0x203   : > { %v1337_v8 = vrot.slane %v1336_v57, 4  ;;  %v1391_v60 = vadd.f32 %v1390_v59, %v1389_v58 }
 0x205   : > { %v1338_v21 = vadd.f32 %v1337_v8, %v1336_v57  ;;  %v1392_v61 = vrot.slane %v1391_v60, 4 }
 0x207   : > { %v1339_v22 = vrot.slane %v1338_v21, 2  ;;  %v1393_v62 = vadd.f32 %v1392_v61, %v1391_v60 }
 0x209   : > { %v1340_v63 = vadd.f32 %v1339_v22, %v1338_v21  ;;  %v1394_v0 = vrot.slane %v1393_v62, 2 }
 0x20b   : > { %v1341_v2 = vrot.slane %v1340_v63, 1  ;;  %v1395_v3 = vadd.f32 %v1394_v0, %v1393_v62 }
 0x20d   : > { %v1342_v4 = vadd.f32 %v1341_v2, %v1340_v63  ;;  %v1396_v5 = vrot.slane %v1395_v3, 1 }
 0x20f   : > { %1344 = vst.msk [vmem:[%s377_s14] sm:$0x1] %vm1343_vm14, %v1342_v4  ;;  %v1397_v6 = vadd.f32 %v1396_v5, %v1395_v3 }
 0x211   : > { %1398 = vst.msk [vmem:[%s377_s14 + $0x1] sm:$0x1] %vm1343_vm14, %v1397_v6 }
 0x212 PF: > { %s18_s28 = sadd.s32 1, %s1795_s28   ;;  %s2330_s24 = smov %s1787_s26 }
 0x213   : > { %p15_p9 = scmp.ge.s32.totalorder %s18_s28, 6   ;;  %s2331_s25 = smov %s1791_s27 }
 0x214   : > { %s2332_s26 = smov %s2335_s29  ;;  %s2333_s27 = smov %s2339_s30 }
 0x215   :  { %17 = sbr.rel (!%p15_p9) target bundleno = 3 (0x3), region = 93 }

// kernel: up_block_forward.5
= control target key start
LH: loop header
LB: loop body
LE: loop exit
PB: predicated region body
PF: predicated region fallthrough
CT: control target
= control target key end

     0   :  { %s2657_s24 = smov 0   ;;  %s2659_s25 = smov 0   ;;  %s3417_s0 = inlined_call_operand.vmem [shape: bf16[2,16,16,4], index: 0, kind: input, shape index: {}]   ;;  %s3418_s1 = inlined_call_operand.vmem [shape: bf16[2,2,2,16,4], index: 1, kind: input, shape index: {}]   ;;  %s3419_s2 = inlined_call_operand.vmem [shape: f32[2,16,16,4], index: 2, kind: input, shape index: {}]   ;;  %s3420_s3 = inlined_call_operand.vmem [shape: f32[2,2,2,16,4], index: 3, kind: input, shape index: {}]   ;;  %s3421_s4 = inlined_call_operand.vmem [shape: bf16[72,8], index: 4, kind: input, shape index: {}]   ;;  %s3422_s5 = inlined_call_operand.vmem [shape: f32[1,8], index: 5, kind: input, shape index: {}]   ;;  %s3423_s6 = inlined_call_operand.vmem [shape: bf16[2,16,16,8], index: 6, kind: output, shape index: {0}]   ;;  %s3424_s7 = inlined_call_operand.vmem [shape: f32[2,2,2,8], index: 7, kind: output, shape index: {1}]  }
   0x1   :  { %s2661_s26 = smov 0   ;;  %s2663_s27 = smov 0  }
   0x2   :  { %s2665_s28 = smov 0  }
   0x3 LB: > { %s27_s29 = sadd.s32 1, %s2589_s26  ;;  %s30_s30 = sadd.s32 1, %s2593_s27  ;;  %s2597_s28 = sphi %s2665_s28, %s18_s28   ;;  %s2593_s27 = sphi %s2663_s27, %s3481_s27   ;;  %s2589_s26 = sphi %s2661_s26, %s3480_s26   ;;  %s2585_s25 = sphi %s2659_s25, %s3479_s25   ;;  %s2581_s24 = sphi %s2657_s24, %s3478_s24  }
   0x4   : > { %p28_p0 = scmp.ge.s32.totalorder %s27_s29, 2  ;;  %p2324_p1 = scmp.ge.s32.totalorder %s2597_s28, 1 }
   0x5   : > { %p314_p2 = scmp.lt.s32.totalorder %s2597_s28, 5 }
   0x6   : > { %s3483_s29 = smov (%p28_p0, %s27_s29), 0  ;;  %s3485_s30 = smov (!%p28_p0, %s30_s30), %s2593_s27 }
   0x7   : > { %p315_p3 = pnand %p2324_p1, %p314_p2  ;;  %p32_p4 = scmp.ge.s32.totalorder %s3485_s30, 2 }
   0x8   : > { %p393_p5 = scmp.lt.s32.totalorder (!%p315_p3), %s2585_s25, 1  ;;  %p405_p6 = scmp.lt.s32.totalorder (!%p315_p3), %s2581_s24, 1  ;;  %vm452_vm0 = vcmask (!%p315_p3), 31744   ;;  %vm455_vm1 = vcmask (!%p315_p3), 25600   ;;  %v2599_v0 = vmov (!%p315_p3), 0.0   ;;  %vm1835_vm2 = vcmask (!%p315_p3), 1043456  }
   0x9   : > { %s3487_s30 = smov (%p32_p4, %s3485_s30), 0  ;;  %318 = sbr.rel (%p315_p3) target bundleno = 682 (0x2aa), region = 44 }
   0xa   : > { %453 = vst.msk [vmem:[#allocation2] sm:$0xff] (!%p315_p3), %vm452_vm0, %v2599_v0  ;;  %454 = vst.msk [vmem:[#allocation2 + $0x8] sm:$0xff] (!%p315_p3), %vm452_vm0, %v2599_v0  ;;  %s2325_s8 = sshll.u32 (!%p315_p3), %s2581_s24, 3  ;;  %s3428_s22 = smov (!%p315_p3), 20   ;;  %vm3447_vm3 = vcmask (!%p315_p3), 64544   ;;  %vm700_vm4 = vcmask (!%p315_p3), 97344  }
   0xb   : > { %456 = vst.msk [vmem:[#allocation2 + $0x10] sm:$0x3] (!%p315_p3), %vm455_vm1, %v2599_v0  ;;  %459 = vst.msk [vmem:[#allocation2 + $0x28] sm:$0x3] (!%p315_p3), %vm455_vm1, %v2599_v0  ;;  %p395_p7 = scmp.lt.s32.totalorder (!%p315_p3), %s2325_s8, 15  ;;  %s3436_s23 = smov (!%p315_p3), 24  }
   0xc   : > { %457 = vst.msk [vmem:[#allocation2 + $0x18] sm:$0xff] (!%p315_p3), %vm452_vm0, %v2599_v0  ;;  %458 = vst.msk [vmem:[#allocation2 + $0x20] sm:$0xff] (!%p315_p3), %vm452_vm0, %v2599_v0  ;;  %s2609_s14 = smov (!%p315_p3), 40   ;;  %s3440_s15 = smov (!%p315_p3), 44   ;;  %vm765_vm5 = vcmask (!%p315_p3), 130144   ;;  %vm830_vm6 = vcmask (!%p315_p3), 162944  }
   0xd   : > { %460 = vst.msk [vmem:[#allocation2 + $0x30] sm:$0xff] (!%p315_p3), %vm452_vm0, %v2599_v0  ;;  %461 = vst.msk [vmem:[#allocation2 + $0x38] sm:$0xff] (!%p315_p3), %vm452_vm0, %v2599_v0  ;;  %vm895_vm7 = vcmask (!%p315_p3), 195744   ;;  %vm3448_vm8 = vcmask (!%p315_p3), 228544   ;;  %vm1026_vm9 = vcmask (!%p315_p3), 261344   ;;  %vm3446_vm10 = vcmask (!%p315_p3), 294144  }
   0xe   : > { %462 = vst.msk [vmem:[#allocation2 + $0x40] sm:$0x3] (!%p315_p3), %vm455_vm1, %v2599_v0  ;;  %465 = vst.msk [vmem:[#allocation2 + $0x58] sm:$0x3] (!%p315_p3), %vm455_vm1, %v2599_v0  ;;  %vm1229_vm11 = vcmask (!%p315_p3), 326944   ;;  %vm1294_vm12 = vcmask (!%p315_p3), 359744  }
   0xf   : > { %463 = vst.msk [vmem:[#allocation2 + $0x48] sm:$0xff] (!%p315_p3), %vm452_vm0, %v2599_v0  ;;  %464 = vst.msk [vmem:[#allocation2 + $0x50] sm:$0xff] (!%p315_p3), %vm452_vm0, %v2599_v0  ;;  %vm1359_vm13 = vcmask (!%p315_p3), 392544   ;;  %vm1424_vm14 = vcmask (!%p315_p3), 425344   ;;  %vm3450_vm15 = vcmask (!%p315_p3), 458144  }
  0x10   : > { %466 = vst.msk [vmem:[#allocation2 + $0x60] sm:$0xff] %vm452_vm0, %v2599_v0  ;;  %467 = vst.msk [vmem:[#allocation2 + $0x68] sm:$0xff] %vm452_vm0, %v2599_v0  ;;  %s3489_s25 = smov (!%p393_p5, %s2585_s25), 1  ;;  %s3491_s8 = smov (!%p395_p7, %s2325_s8), 15 }
  0x11   : > { %468 = vst.msk [vmem:[#allocation2 + $0x70] sm:$0x3] %vm455_vm1, %v2599_v0  ;;  %471 = vst.msk [vmem:[#allocation2 + $0x88] sm:$0x3] %vm455_vm1, %v2599_v0  ;;  %s2762_s9 = scalar_select %p405_p6, %s2581_s24, 1 }
  0x12   : > { %469 = vst.msk [vmem:[#allocation2 + $0x78] sm:$0xff] %vm452_vm0, %v2599_v0  ;;  %470 = vst.msk [vmem:[#allocation2 + $0x80] sm:$0xff] %vm452_vm0, %v2599_v0  ;;  %s2330_s10 = sshll.u32 %s3489_s25, 3  ;;  %s2327_s17 = sshll.u32 %s3489_s25, 5 }
  0x13   : > { %472 = vst.msk [vmem:[#allocation2 + $0x90] sm:$0xff] %vm452_vm0, %v2599_v0  ;;  %473 = vst.msk [vmem:[#allocation2 + $0x98] sm:$0xff] %vm452_vm0, %v2599_v0  ;;  %s2329_s11 = sshll.u32 %s2762_s9, 2  ;;  %s2326_s18 = sshll.u32 %s3491_s8, 1 }
  0x14   : > { %474 = vst.msk [vmem:[#allocation2 + $0xa0] sm:$0x3] %vm455_vm1, %v2599_v0  ;;  %477 = vst.msk [vmem:[#allocation2 + $0xb8] sm:$0x3] %vm455_vm1, %v2599_v0  ;;  %s2768_s12 = sadd.s32 %s2330_s10, %s2329_s11  ;;  %s2779_s19 = sadd.s32 %s2327_s17, %s2326_s18 }
  0x15   : > { %475 = vst.msk [vmem:[#allocation2 + $0xa8] sm:$0xff] %vm452_vm0, %v2599_v0  ;;  %476 = vst.msk [vmem:[#allocation2 + $0xb0] sm:$0xff] %vm452_vm0, %v2599_v0  ;;  %s2331_s13 = sshll.u32 %s2768_s12, 2  ;;  %s3425_s20 = sshll.u32 %s2779_s19, 2 }
  0x16   : > { %478 = vst.msk [vmem:[#allocation2 + $0xc0] sm:$0xff] %vm452_vm0, %v2599_v0  ;;  %479 = vst.msk [vmem:[#allocation2 + $0xc8] sm:$0xff] %vm452_vm0, %v2599_v0  ;;  %s411_s16 = scalar_lea.vmem %s3418_s1, %s2331_s13  ;;  %s2335_s21 = sshll.u32 %s2779_s19, 3 }
  0x17   : > { %480 = vst.msk [vmem:[#allocation2 + $0xd0] sm:$0x3] %vm455_vm1, %v2599_v0  ;;  %483 = vst.msk [vmem:[#allocation2 + $0xe8] sm:$0x3] %vm455_vm1, %v2599_v0  ;;  %v2430_v1 = vld [vmem:[%s411_s16] sm:$0xff]   ;;  %v2444_v2 = vld [vmem:[%s411_s16 + $0x8] sm:$0xff]   ;;  %s2790_s24 = scalar_lea.vmem %s3417_s0, %s3425_s20  ;;  %s2795_s11 = scalar_lea.vmem %s3419_s2, %s2335_s21 }
  0x18   : > { %481 = vst.msk [vmem:[#allocation2 + $0xd8] sm:$0xff] %vm452_vm0, %v2599_v0  ;;  %482 = vst.msk [vmem:[#allocation2 + $0xe0] sm:$0xff] %vm452_vm0, %v2599_v0  ;;  %v2431_v3 = vunpack.c.l.bf16 %v2430_v1  ;;  %v2432_v4 = vunpack.c.h.bf16 %v2430_v1  ;;  %v2435_v5 = vunpack.c.l.bf16 %v2444_v2  ;;  %v2436_v6 = vunpack.c.h.bf16 %v2444_v2  ;;  %v2398_v7 = vld [vmem:[%s2790_s24] sm:$0xff]   ;;  %v2437_v8 = vld [vmem:[%s2790_s24 + $0x8] sm:$0xff]   ;;  %s2338_s13 = sshll.u32 %s2768_s12, 3  ;;  %s2600_s12 = smov 8  }
  0x19   : > { %1100 = vst.msk [vmem:[#allocation3] sm:$0xff] %vm452_vm0, %v2599_v0  ;;  %1101 = vst.msk [vmem:[#allocation3 + $0x8] sm:$0xff] %vm452_vm0, %v2599_v0  ;;  %v2438_v9 = vld [vmem:[%s2790_s24 + $0x10] sm:$0xff]   ;;  %v2399_v10 = vunpack.c.l.bf16 %v2398_v7  ;;  %v2400_v11 = vunpack.c.h.bf16 %v2398_v7  ;;  %v2403_v12 = vunpack.c.l.bf16 %v2437_v8  ;;  %v2404_v13 = vunpack.c.h.bf16 %v2437_v8  ;;  %s2804_s16 = scalar_lea.vmem %s3420_s3, %s2338_s13  ;;  %v1130_v14 = vld [vmem:[%s2795_s11] sm:$0xff]  ;;  %s2601_s17 = smov 4  }
  0x1a   : > { %1102 = vst.msk [vmem:[#allocation3 + $0x10] sm:$0x3] %vm455_vm1, %v2599_v0  ;;  %1105 = vst.msk [vmem:[#allocation3 + $0x28] sm:$0x3] %vm455_vm1, %v2599_v0  ;;  %v1131_v15 = vld [vmem:[%s2795_s11 + $0x8] sm:$0xff]  ;;  %v2439_v16 = vld [vmem:[%s2790_s24 + $0x18] sm:$0xff]   ;;  %v2407_v17 = vunpack.c.l.bf16 %v2438_v9  ;;  %v2408_v18 = vunpack.c.h.bf16 %v2438_v9 }
  0x1b   : > { %1103 = vst.msk [vmem:[#allocation3 + $0x18] sm:$0xff] %vm452_vm0, %v2599_v0  ;;  %1104 = vst.msk [vmem:[#allocation3 + $0x20] sm:$0xff] %vm452_vm0, %v2599_v0  ;;  %v1146_v19 = vld [vmem:[%s2804_s16] sm:$0xff]  ;;  %v1147_v20 = vld [vmem:[%s2804_s16 + $0x8] sm:$0xff]  ;;  %v2411_v21 = vunpack.c.l.bf16 %v2439_v16  ;;  %v2412_v22 = vunpack.c.h.bf16 %v2439_v16  ;;  %s3442_s18 = smov 12   ;;  %s3426_s21 = smov 16  }
  0x1c   : > { %1106 = vst.msk [vmem:[#allocation3 + $0x30] sm:$0xff] %vm452_vm0, %v2599_v0  ;;  %1107 = vst.msk [vmem:[#allocation3 + $0x38] sm:$0xff] %vm452_vm0, %v2599_v0  ;;  %v1132_v23 = vld [vmem:[%s2795_s11 + $0x10] sm:$0xff]  ;;  %v1133_v24 = vld [vmem:[%s2795_s11 + $0x18] sm:$0xff]  ;;  %s2606_s8 = smov 28   ;;  %s2607_s10 = smov 32  }
  0x1d   : > { %1108 = vst.msk [vmem:[#allocation3 + $0x40] sm:$0x3] %vm455_vm1, %v2599_v0  ;;  %1111 = vst.msk [vmem:[#allocation3 + $0x58] sm:$0x3] %vm455_vm1, %v2599_v0  ;;  %v2440_v25 = vld [vmem:[%s2790_s24 + $0x20] sm:$0xff]   ;;  %v1135_v34 = vld [vmem:[%s2795_s11 + $0x28] sm:$0xff] }
  0x1e   : > { %1109 = vst.msk [vmem:[#allocation3 + $0x48] sm:$0xff] %vm452_vm0, %v2599_v0  ;;  %1110 = vst.msk [vmem:[#allocation3 + $0x50] sm:$0xff] %vm452_vm0, %v2599_v0  ;;  %v1134_v26 = vld [vmem:[%s2795_s11 + $0x20] sm:$0xff]  ;;  %v2415_v30 = vunpack.c.l.bf16 %v2440_v25  ;;  %v2416_v31 = vunpack.c.h.bf16 %v2440_v25  ;;  %v2441_v38 = vld [vmem:[%s2790_s24 + $0x28] sm:$0xff]   ;;  %s2608_s13 = smov 36   ;;  %s3430_s20 = smov 52  }
  0x1f   : > { %1112 = vst.msk [vmem:[#allocation3 + $0x60] sm:$0xff] %vm452_vm0, %v2599_v0  ;;  %1113 = vst.msk [vmem:[#allocation3 + $0x68] sm:$0xff] %vm452_vm0, %v2599_v0  ;;  %v1136_v39 = vld [vmem:[%s2795_s11 + $0x30] sm:$0xff]  ;;  %v2419_v41 = vunpack.c.l.bf16 %v2441_v38  ;;  %v2420_v42 = vunpack.c.h.bf16 %v2441_v38  ;;  %v1137_v43 = vld [vmem:[%s2795_s11 + $0x38] sm:$0xff] }
  0x20   : > { %1114 = vst.msk [vmem:[#allocation3 + $0x70] sm:$0x3] %vm455_vm1, %v2599_v0  ;;  %1117 = vst.msk [vmem:[#allocation3 + $0x88] sm:$0x3] %vm455_vm1, %v2599_v0 }
  0x21   : > { %1115 = vst.msk [vmem:[#allocation3 + $0x78] sm:$0xff] %vm452_vm0, %v2599_v0  ;;  %1116 = vst.msk [vmem:[#allocation3 + $0x80] sm:$0xff] %vm452_vm0, %v2599_v0 }
  0x22   : > { %1118 = vst.msk [vmem:[#allocation3 + $0x90] sm:$0xff] %vm452_vm0, %v2599_v0  ;;  %1119 = vst.msk [vmem:[#allocation3 + $0x98] sm:$0xff] %vm452_vm0, %v2599_v0 }
  0x23   : > { %1120 = vst.msk [vmem:[#allocation3 + $0xa0] sm:$0x3] %vm455_vm1, %v2599_v0  ;;  %1123 = vst.msk [vmem:[#allocation3 + $0xb8] sm:$0x3] %vm455_vm1, %v2599_v0 }
  0x24   : > { %1121 = vst.msk [vmem:[#allocation3 + $0xa8] sm:$0xff] %vm452_vm0, %v2599_v0  ;;  %1122 = vst.msk [vmem:[#allocation3 + $0xb0] sm:$0xff] %vm452_vm0, %v2599_v0 }
  0x25   : > { %1124 = vst.msk [vmem:[#allocation3 + $0xc0] sm:$0xff] %vm452_vm0, %v2599_v0  ;;  %1125 = vst.msk [vmem:[#allocation3 + $0xc8] sm:$0xff] %vm452_vm0, %v2599_v0 }
  0x26   : > { %1126 = vst.msk [vmem:[#allocation3 + $0xd0] sm:$0x3] %vm455_vm1, %v2599_v0  ;;  %1129 = vst.msk [vmem:[#allocation3 + $0xe8] sm:$0x3] %vm455_vm1, %v2599_v0  ;;  %vm1620_vm1 = vcmask 523744  }
  0x27   : > { %1127 = vst.msk [vmem:[#allocation3 + $0xd8] sm:$0xff] %vm452_vm0, %v2599_v0  ;;  %1128 = vst.msk [vmem:[#allocation3 + $0xe0] sm:$0xff] %vm452_vm0, %v2599_v0 }
  0x28   : > { %540 = vst.msk [vmem:[#allocation2 + $0x1] sm:$0xff] %vm452_vm0, %v2431_v3  ;;  %541 = vst.msk [vmem:[#allocation2 + $0x9] sm:$0xff] %vm452_vm0, %v2432_v4 }
  0x29   : > { %545 = vst.msk [vmem:[#allocation2 + $0xd9] sm:$0xff] %vm452_vm0, %v2435_v5  ;;  %546 = vst.msk [vmem:[#allocation2 + $0xe1] sm:$0xff] %vm452_vm0, %v2436_v6 }
  0x2a   : > { %1152 = vst.msk [vmem:[#allocation3 + $0x19] sm:$0xff] %vm452_vm0, %v1130_v14  ;;  %1153 = vst.msk [vmem:[#allocation3 + $0x21] sm:$0xff] %vm452_vm0, %v1131_v15  ;;  %v1139_v14 = vld [vmem:[%s2795_s11 + $0x48] sm:$0xff] }
  0x2b   : > { %522 = vst.msk [vmem:[#allocation2 + $0x19] sm:$0xff] %vm452_vm0, %v2399_v10  ;;  %523 = vst.msk [vmem:[#allocation2 + $0x21] sm:$0xff] %vm452_vm0, %v2400_v11  ;;  %v2442_v10 = vld [vmem:[%s2790_s24 + $0x30] sm:$0xff]  }
  0x2c   : > { %524 = vst.msk [vmem:[#allocation2 + $0x31] sm:$0xff] %vm452_vm0, %v2403_v12  ;;  %525 = vst.msk [vmem:[#allocation2 + $0x39] sm:$0xff] %vm452_vm0, %v2404_v13  ;;  %v2423_v11 = vunpack.c.l.bf16 %v2442_v10  ;;  %v2424_v12 = vunpack.c.h.bf16 %v2442_v10  ;;  %v1138_v13 = vld [vmem:[%s2795_s11 + $0x40] sm:$0xff] }
  0x2d   : > { %1168 = vst.msk [vmem:[#allocation3 + $0x1] sm:$0xff] %vm452_vm0, %v1146_v19  ;;  %1169 = vst.msk [vmem:[#allocation3 + $0x9] sm:$0xff] %vm452_vm0, %v1147_v20 }
  0x2e   : > { %1154 = vst.msk [vmem:[#allocation3 + $0x31] sm:$0xff] %vm452_vm0, %v1132_v23  ;;  %526 = vst.msk [vmem:[#allocation2 + $0x49] sm:$0xff] %vm452_vm0, %v2407_v17 }
  0x2f   : > { %v644_v27 = vld [vmem:[#allocation2 + $0x2] sm:$0xff]  ;;  %v645_v28 = vld [vmem:[#allocation2 + $0xa] sm:$0xff]  ;;  %527 = vst.msk [vmem:[#allocation2 + $0x51] sm:$0xff] %vm452_vm0, %v2408_v18  ;;  %528 = vst.msk [vmem:[#allocation2 + $0x61] sm:$0xff] %vm452_vm0, %v2411_v21 }
  0x30   : > { %v579_v29 = vld [vmem:[#allocation2 + $0x1] sm:$0xff]  ;;  %529 = vst.msk [vmem:[#allocation2 + $0x69] sm:$0xff] %vm452_vm0, %v2412_v22  ;;  %1155 = vst.msk [vmem:[#allocation3 + $0x39] sm:$0xff] %vm452_vm0, %v1133_v24  ;;  %v660_v32 = vpack.c.bf16 %v645_v28, %v644_v27  ;;  %v580_v33 = vld [vmem:[#allocation2 + $0x9] sm:$0xff] }
  0x31   : > { %1156 = vst.msk [vmem:[#allocation3 + $0x49] sm:$0xff] %vm452_vm0, %v1134_v26  ;;  %v547_v35 = vld [vmem:[#allocation2] sm:$0xff]  ;;  %v595_v36 = vpack.c.bf16 %v580_v33, %v579_v29  ;;  %530 = vst.msk [vmem:[#allocation2 + $0x79] sm:$0xff] %vm452_vm0, %v2415_v30  ;;  %v548_v37 = vld [vmem:[#allocation2 + $0x8] sm:$0xff] }
  0x32   : > { %531 = vst.msk [vmem:[#allocation2 + $0x81] sm:$0xff] %vm452_vm0, %v2416_v31  ;;  %1157 = vst.msk [vmem:[#allocation3 + $0x51] sm:$0xff] %vm452_vm0, %v1135_v34  ;;  %676 = vrot.lane.b32.xlu1 %v660_v32, %s2600_s12  ;;  %v563_v40 = vpack.c.bf16 %v548_v37, %v547_v35  ;;  %v646_v44 = vld [vmem:[#allocation2 + $0x1a] sm:$0xff]  ;;  %v647_v45 = vld [vmem:[#allocation2 + $0x22] sm:$0xff] }
  0x33   : > { %1158 = vst.msk [vmem:[#allocation3 + $0x61] sm:$0xff] %vm452_vm0, %v1136_v39  ;;  %611 = vrot.lane.b32.xlu0 %v595_v36, %s2601_s17  ;;  %1159 = vst.msk [vmem:[#allocation3 + $0x69] sm:$0xff] %vm452_vm0, %v1137_v43  ;;  %v581_v46 = vld [vmem:[#allocation2 + $0x19] sm:$0xff]  ;;  %v661_v47 = vpack.c.bf16 %v647_v45, %v646_v44  ;;  %v582_v48 = vld [vmem:[#allocation2 + $0x21] sm:$0xff] }
  0x34   : > { %571 = vst.msk [vmem:[#allocation4] sm:$0xff] %vm452_vm0, %v563_v40  ;;  %532 = vst.msk [vmem:[#allocation2 + $0x91] sm:$0xff] %vm452_vm0, %v2419_v41  ;;  %v711_v49 = vld [vmem:[#allocation2 + $0x30] sm:$0xff]  ;;  %v712_v50 = vld [vmem:[#allocation2 + $0x38] sm:$0xff]  ;;  %v596_v51 = vpack.c.bf16 %v582_v48, %v581_v46 }
  0x35   : > { %533 = vst.msk [vmem:[#allocation2 + $0x99] sm:$0xff] %vm452_vm0, %v2420_v42  ;;  %v726_v52 = vpack.c.bf16 %v712_v50, %v711_v49  ;;  %v709_v53 = vld [vmem:[#allocation2 + $0x18] sm:$0xff]  ;;  %v710_v54 = vld [vmem:[#allocation2 + $0x20] sm:$0xff]  ;;  %v907_v58 = vld [vmem:[#allocation2 + $0x48] sm:$0xff] }
  0x36   : > { %678 = vrot.lane.b32.xlu1 %v661_v47, %s2600_s12  ;;  %v725_v55 = vpack.c.bf16 %v710_v54, %v709_v53  ;;  %v776_v56 = vld [vmem:[#allocation2 + $0x31] sm:$0xff]  ;;  %v777_v57 = vld [vmem:[#allocation2 + $0x39] sm:$0xff]  ;;  %v972_v7 = vld [vmem:[#allocation2 + $0x49] sm:$0xff]  ;;  %1160 = vst.msk [vmem:[#allocation3 + $0x79] sm:$0xff] %vm452_vm0, %v1138_v13 }
  0x37   : > { %613 = vrot.lane.b32.xlu0 %v596_v51, %s2601_s17  ;;  %v908_v59 = vld [vmem:[#allocation2 + $0x50] sm:$0xff]  ;;  %573 = vst.msk [vmem:[#allocation4 + $0x10] sm:$0xff] %vm452_vm0, %v726_v52  ;;  %v791_v61 = vpack.c.bf16 %v777_v57, %v776_v56  ;;  %v842_v63 = vld [vmem:[#allocation2 + $0x3a] sm:$0xff]  ;;  %v716_v1 = vld [vmem:[#allocation2 + $0x68] sm:$0xff] }
  0x38   : > { %v2847_v60 = vpack.c.bf16 %v908_v59, %v907_v58  ;;  %572 = vst.msk [vmem:[#allocation4 + $0x8] sm:$0xff] %vm452_vm0, %v725_v55  ;;  %v841_v62 = vld [vmem:[#allocation2 + $0x32] sm:$0xff]  ;;  %v715_v0 = vld [vmem:[#allocation2 + $0x60] sm:$0xff]  ;;  %1161 = vst.msk [vmem:[#allocation3 + $0x81] sm:$0xff] %vm452_vm0, %v1139_v14 }
  0x39   : > { %v2854_v2 = vpack.c.bf16 %v716_v1, %v715_v0  ;;  %v856_v3 = vpack.c.bf16 %v842_v63, %v841_v62  ;;  %v911_v4 = vld [vmem:[#allocation2 + $0x78] sm:$0xff]  ;;  %v912_v5 = vld [vmem:[#allocation2 + $0x80] sm:$0xff]  ;;  %534 = vst.msk [vmem:[#allocation2 + $0xa9] sm:$0xff] %vm452_vm0, %v2423_v11  ;;  %535 = vst.msk [vmem:[#allocation2 + $0xb1] sm:$0xff] %vm452_vm0, %v2424_v12 }
  0x3a   : > { %743 = vrot.lane.b32.xlu1 %v726_v52, %s3442_s18  ;;  %574 = vst.msk [vmem:[#allocation4 + $0x18] sm:$0xff] %vm452_vm0, %v2847_v60  ;;  %v2860_v6 = vpack.c.bf16 %v912_v5, %v911_v4  ;;  %v973_v8 = vld [vmem:[#allocation2 + $0x51] sm:$0xff]  ;;  %v1239_v25 = vld [vmem:[#allocation3 + $0x9] sm:$0xff]  ;;  %v1175_v26 = vld [vmem:[#allocation3 + $0x18] sm:$0xff] }
  0x3b   : > { %741 = vrot.lane.b32.xlu0 %v725_v55, %s3442_s18  ;;  %575 = vst.msk [vmem:[#allocation4 + $0x20] sm:$0xff] %vm452_vm0, %v2854_v2  ;;  %v987_v9 = vpack.c.bf16 %v973_v8, %v972_v7  ;;  %v1173_v15 = vld [vmem:[#allocation3] sm:$0xff]  ;;  %v1174_v16 = vld [vmem:[#allocation3 + $0x8] sm:$0xff]  ;;  %v780_v42 = vld [vmem:[#allocation2 + $0x61] sm:$0xff] }
  0x3c   : > { %576 = vst.msk [vmem:[#allocation4 + $0x28] sm:$0xff] %vm452_vm0, %v2860_v6  ;;  %v1037_v17 = vld [vmem:[#allocation2 + $0x4a] sm:$0xff]  ;;  %v1038_v18 = vld [vmem:[#allocation2 + $0x52] sm:$0xff]  ;;  %v1189_v19 = vpack.c.bf16 %v1174_v16, %v1173_v15  ;;  %v1304_v31 = vld [vmem:[#allocation3 + $0xa] sm:$0xff] }
  0x3d   : > { %v1052_v20 = vpack.c.bf16 %v1038_v18, %v1037_v17  ;;  %v1238_v24 = vld [vmem:[#allocation3 + $0x1] sm:$0xff]  ;;  %v1240_v32 = vld [vmem:[#allocation3 + $0x19] sm:$0xff]  ;;  %v1370_v45 = vld [vmem:[#allocation3 + $0x30] sm:$0xff] }
  0x3e   : > { %808 = vrot.lane.b32.xlu1 %v791_v61, %s3426_s21  ;;  %v1176_v27 = vld [vmem:[#allocation3 + $0x20] sm:$0xff]  ;;  %v1254_v28 = vpack.c.bf16 %v1239_v25, %v1238_v24  ;;  %v2443_v36 = vld [vmem:[%s2790_s24 + $0x38] sm:$0xff]   ;;  %s3432_s24 = smov 48   ;;  %v1371_v46 = vld [vmem:[#allocation3 + $0x38] sm:$0xff] }
  0x3f   : > { %806 = vrot.lane.b32.xlu0 %v596_v51, %s3426_s21  ;;  %v1190_v29 = vpack.c.bf16 %v1176_v27, %v1175_v26  ;;  %v1303_v30 = vld [vmem:[#allocation3 + $0x2] sm:$0xff]  ;;  %v2427_v37 = vunpack.c.l.bf16 %v2443_v36  ;;  %v2428_v38 = vunpack.c.h.bf16 %v2443_v36  ;;  %v1305_v39 = vld [vmem:[#allocation3 + $0x1a] sm:$0xff]  ;;  %v845_v48 = vld [vmem:[#allocation2 + $0x62] sm:$0xff] }
  0x40   : > { %v915_v21 = vld [vmem:[#allocation2 + $0xa8] sm:$0xff]  ;;  %v916_v22 = vld [vmem:[#allocation2 + $0xb0] sm:$0xff]  ;;  %v1319_v34 = vpack.c.bf16 %v1304_v31, %v1303_v30  ;;  %v1141_v51 = vld [vmem:[%s2795_s11 + $0x58] sm:$0xff] }
  0x41   : > { %v2881_v23 = vpack.c.bf16 %v916_v22, %v915_v21  ;;  %v1241_v33 = vld [vmem:[#allocation3 + $0x21] sm:$0xff]  ;;  %536 = vst.msk [vmem:[#allocation2 + $0xc1] sm:$0xff] %vm452_vm0, %v2427_v37  ;;  %537 = vst.msk [vmem:[#allocation2 + $0xc9] sm:$0xff] %vm452_vm0, %v2428_v38  ;;  %v781_v43 = vld [vmem:[#allocation2 + $0x69] sm:$0xff] }
  0x42   : > { %873 = vrot.lane.b32.xlu1 %v856_v3, %s3428_s22  ;;  %v1255_v35 = vpack.c.bf16 %v1241_v33, %v1240_v32  ;;  %v1306_v40 = vld [vmem:[#allocation3 + $0x22] sm:$0xff]  ;;  %v2903_v44 = vpack.c.bf16 %v781_v43, %v780_v42  ;;  %v846_v49 = vld [vmem:[#allocation2 + $0x6a] sm:$0xff]  ;;  %1163 = vst.msk [vmem:[#allocation3 + $0x99] sm:$0xff] %vm452_vm0, %v1141_v51  ;;  %v1435_v53 = vld [vmem:[#allocation3 + $0x31] sm:$0xff] }
  0x43   : > { %871 = vrot.lane.b32.xlu0 %v661_v47, %s3428_s22  ;;  %578 = vst.msk [vmem:[#allocation4 + $0x38] sm:$0xff] %vm452_vm0, %v2881_v23  ;;  %v1320_v41 = vpack.c.bf16 %v1306_v40, %v1305_v39  ;;  %v2908_v47 = vpack.c.bf16 %v1371_v46, %v1370_v45  ;;  %v1140_v50 = vld [vmem:[%s2795_s11 + $0x50] sm:$0xff]  ;;  %v1500_v56 = vld [vmem:[#allocation3 + $0x32] sm:$0xff]  ;;  %v976_v59 = vld [vmem:[#allocation2 + $0x79] sm:$0xff] }
  0x44   : > { %1162 = vst.msk [vmem:[#allocation3 + $0x91] sm:$0xff] %vm452_vm0, %v1140_v50  ;;  %v1436_v54 = vld [vmem:[#allocation3 + $0x39] sm:$0xff]  ;;  %v1566_v62 = vld [vmem:[#allocation3 + $0x48] sm:$0xff]  ;;  %v1567_v63 = vld [vmem:[#allocation3 + $0x50] sm:$0xff] }
  0x45   : > { %v2923_v55 = vpack.c.bf16 %v1436_v54, %v1435_v53  ;;  %v1501_v57 = vld [vmem:[#allocation3 + $0x3a] sm:$0xff]  ;;  %v2554_v0 = vld [vmem:[%s3421_s4] sm:$0xff]   ;;  %v2947_v1 = vpack.c.bf16 %v1567_v63, %v1566_v62  ;;  %v2557_v13 = vld [vmem:[%s3421_s4 + $0x18] sm:$0xff]  }
  0x46   : > { %939 = vrot.lane.b32.xlu1 %v2847_v60, %s3436_s23  ;;  %v2932_v58 = vpack.c.bf16 %v1501_v57, %v1500_v56  ;;  %2458 = vmatprep.subr.bf16.mxu0 %v2554_v0  ;;  %v2555_v4 = vld [vmem:[%s3421_s4 + $0x8] sm:$0xff]   ;;  %v1142_v5 = vld [vmem:[%s2795_s11 + $0x60] sm:$0xff]  ;;  %v2556_v11 = vld [vmem:[%s3421_s4 + $0x10] sm:$0xff]  }
  0x47   : > { %937 = vrot.lane.b32.xlu0 %v726_v52, %s3436_s23  ;;  %v2917_v52 = vpack.c.bf16 %v846_v49, %v845_v48  ;;  %2459 = vmatpush3.bf16.msra.mxu0 %v2554_v0  ;;  %v1143_v7 = vld [vmem:[%s2795_s11 + $0x68] sm:$0xff]  ;;  %1164 = vst.msk [vmem:[#allocation3 + $0xa9] sm:$0xff] %vm452_vm0, %v1142_v5  ;;  %v2558_v14 = vld [vmem:[%s3421_s4 + $0x20] ss:$0 sps:$4 sm:$0xff]   ;;  %v719_v24 = vld [vmem:[#allocation2 + $0x90] sm:$0xff] }
  0x48   : > { %2484 = vmatprep.subr.bf16.mxu1 %v2554_v0  ;;  %2460 = vmatprep.subr.bf16.mxu0 %v2555_v4  ;;  %1165 = vst.msk [vmem:[#allocation3 + $0xb1] sm:$0xff] %vm452_vm0, %v1143_v7  ;;  %v1632_v10 = vld [vmem:[#allocation3 + $0x51] sm:$0xff]  ;;  %v1837_v15 = vsel %vm1835_vm2, %v2558_v14, 0  ;;  %v720_v25 = vld [vmem:[#allocation2 + $0x98] sm:$0xff]  ;;  %v2347_v32 = vld [vmem:[%s2804_s16 + $0x10] sm:$0xff] }
  0x49   : > { %2489 = vmatpush3.bf16.msra.mxu1 %v2554_v0  ;;  %v1696_v16 = vld [vmem:[#allocation3 + $0x4a] sm:$0xff]  ;;  %v1697_v17 = vld [vmem:[#allocation3 + $0x52] sm:$0xff]  ;;  %1171 = vst.msk [vmem:[#allocation3 + $0xd9] sm:$0xff] %vm452_vm0, %v2347_v32  ;;  %v1374_v36 = vld [vmem:[#allocation3 + $0x60] sm:$0xff] }
  0x4a   : > { %1004 = vrot.lane.b32.xlu1 %v987_v9, %s2606_s8  ;;  %2485 = vmatprep.subr.bf16.mxu1 %v2555_v4  ;;  %v2987_v18 = vpack.c.bf16 %v1697_v17, %v1696_v16  ;;  %v785_v30 = vld [vmem:[#allocation2 + $0x99] sm:$0xff]  ;;  %v1439_v46 = vld [vmem:[#allocation3 + $0x61] sm:$0xff]  ;;  %v724_v32 = vld [vmem:[#allocation2 + $0xc8] sm:$0xff] }
  0x4b   : > { %1002 = vrot.lane.b32.xlu0 %v791_v61, %s2606_s8  ;;  %2461 = vmatpush3.bf16.msra.mxu0 %v2555_v4  ;;  %v2348_v33 = vld [vmem:[%s2804_s16 + $0x18] sm:$0xff]  ;;  %s3454_s16 = smov 52   ;;  %v559_v56 = vld [vmem:[#allocation2 + $0x90] sm:$0xff] }
  0x4c   : > { %2462 = vmatprep.subr.bf16.mxu0 %v2556_v11  ;;  %1172 = vst.msk [vmem:[#allocation3 + $0xe1] sm:$0xff] %vm452_vm0, %v2348_v33  ;;  %v1375_v37 = vld [vmem:[#allocation3 + $0x68] sm:$0xff]  ;;  %v1045_v7 = vld [vmem:[#allocation2 + $0xaa] sm:$0xff] }
  0x4d   : > { %2490 = vmatpush3.bf16.msra.mxu1 %v2555_v4  ;;  %v3032_v39 = vpack.c.bf16 %v1375_v37, %v1374_v36  ;;  %v850_v42 = vld [vmem:[#allocation2 + $0x9a] sm:$0xff]  ;;  %v1504_v53 = vld [vmem:[#allocation3 + $0x62] sm:$0xff] }
  0x4e   : > { %615 = vrot.lane.b32.xlu1 %v791_v61, %s2601_s17  ;;  %2486 = vmatprep.subr.bf16.mxu1 %v2556_v11  ;;  %v1505_v54 = vld [vmem:[#allocation3 + $0x6a] sm:$0xff]  ;;  %v981_v62 = vld [vmem:[#allocation2 + $0xb1] sm:$0xff] }
  0x4f   : > { %1067 = vrot.lane.b32.xlu0 %v856_v3, %s2607_s10  ;;  %2463 = vmatpush3.bf16.msra.mxu0 %v2556_v11  ;;  %v560_v57 = vld [vmem:[#allocation2 + $0x98] sm:$0xff]  ;;  %v788_v37 = vld [vmem:[#allocation2 + $0xc1] sm:$0xff] }
  0x50   : > { %2464 = vmatprep.subr.bf16.mxu0 %v2557_v13 }
  0x51   : > { %2491 = vmatpush3.bf16.msra.mxu1 %v2556_v11 }
  0x52   : > { %1205 = vrot.lane.b32.xlu1 %v1189_v19, %s2608_s13  ;;  %2487 = vmatprep.subr.bf16.mxu1 %v2557_v13  ;;  %v1144_v19 = vld [vmem:[%s2795_s11 + $0x70] sm:$0xff] }
  0x53   : > { %1069 = vrot.lane.b32.xlu0 %v1052_v20, %s2607_s10  ;;  %2465 = vmatpush3.bf16.msra.mxu0 %v2557_v13  ;;  %1166 = vst.msk [vmem:[#allocation3 + $0xc1] sm:$0xff] %vm452_vm0, %v1144_v19 }
  0x54   : > { %2494 = vmatprep.subr.msk.bf16.mxu0 %vm1835_vm2, %v2558_v14 }
  0x55   : > { %2492 = vmatpush3.bf16.msra.mxu1 %v2557_v13  ;;  %v1636_v13 = vld [vmem:[#allocation3 + $0x81] sm:$0xff] }
  0x56   : > { %680 = vrot.lane.b32.xlu1 %v856_v3, %s2600_s12  ;;  %v1042_v3 = vld [vmem:[#allocation2 + $0x82] sm:$0xff]  ;;  %2495 = vmatprep.subr.msk.bf16.mxu1 %vm1835_vm2, %v2558_v14  ;;  %vm1685_vm2 = vcmask 556544  }
  0x57   : > { %617 = vrot.lane.b32.xlu0 %v987_v9, %s2601_s17  ;;  %2467 = vmatpush3.bf16.msra.mxu0 %v1837_v15 }
  0x59   : > { %2493 = vmatpush3.bf16.msra.mxu1 %v1837_v15 }
  0x5a   : > { %1270 = vrot.lane.b32.xlu1 %v1254_v28, %s2609_s14 }
  0x5b   : > { %1207 = vrot.lane.b32.xlu0 %v1190_v29, %s2608_s13 }
  0x5e   : > { %745 = vrot.lane.b32.xlu1 %v2847_v60, %s3442_s18  ;;  %v977_v60 = vld [vmem:[#allocation2 + $0x81] sm:$0xff] }
  0x5f   : > { %682 = vrot.lane.b32.xlu0 %v1052_v20, %s2600_s12  ;;  %v2938_v61 = vpack.c.bf16 %v977_v60, %v976_v59  ;;  %v569_v59 = vpack.c.bf16 %v560_v57, %v559_v56  ;;  %v919_v57 = vld [vmem:[#allocation2 + $0xd8] sm:$0xff] }
  0x61   : > { %577 = vst.msk [vmem:[#allocation4 + $0x30] sm:$0xff] %vm452_vm0, %v569_v59 }
  0x62   : > { %1335 = vrot.lane.b32.xlu1 %v1319_v34, %s3440_s15 }
  0x63   : > { %1272 = vrot.lane.b32.xlu0 %v1255_v35, %s2609_s14 }
  0x66   : > { %810 = vrot.lane.b32.xlu1 %v987_v9, %s3426_s21  ;;  %v1631_v9 = vld [vmem:[#allocation3 + $0x49] sm:$0xff] }
  0x67   : > { %747 = vrot.lane.b32.xlu0 %v2854_v2, %s3442_s18  ;;  %v2967_v12 = vpack.c.bf16 %v1632_v10, %v1631_v9 }
  0x6a   : > { %1400 = vrot.lane.b32.xlu1 %v1190_v29, %s3432_s24  ;;  %v784_v29 = vld [vmem:[#allocation2 + $0x91] sm:$0xff] }
  0x6b   : > { %1337 = vrot.lane.b32.xlu0 %v1320_v41, %s3440_s15  ;;  %v3023_v34 = vpack.c.bf16 %v785_v30, %v784_v29 }
  0x6e   : > { %875 = vrot.lane.b32.xlu1 %v1052_v20, %s3428_s22  ;;  %v1145_v20 = vld [vmem:[%s2795_s11 + $0x78] sm:$0xff]  ;;  %s3451_s11 = smov 16  }
  0x6f   : > { %812 = vrot.lane.b32.xlu0 %v2903_v44, %s3426_s21  ;;  %s3434_s21 = smov 56   ;;  %1167 = vst.msk [vmem:[#allocation3 + $0xc9] sm:$0xff] %vm452_vm0, %v1145_v20  ;;  %vm3449_vm0 = vcmask 490944  }
  0x72   : > { %1465 = vrot.lane.b32.xlu1 %v1255_v35, %s3430_s20 }
  0x73   : > { %1402 = vrot.lane.b32.xlu0 %v2908_v47, %s3432_s24  ;;  %s3452_s24 = smov 48  }
  0x76   : > { %941 = vrot.lane.b32.xlu1 %v2854_v2, %s3436_s23  ;;  %v1041_v2 = vld [vmem:[#allocation2 + $0x7a] sm:$0xff] }
  0x77   : > { %877 = vrot.lane.b32.xlu0 %v2917_v52, %s3428_s22  ;;  %s3438_s22 = smov 60   ;;  %v2956_v8 = vpack.c.bf16 %v1042_v3, %v1041_v2  ;;  %v1570_v2 = vld [vmem:[#allocation3 + $0x78] sm:$0xff]  ;;  %v1571_v3 = vld [vmem:[#allocation3 + $0x80] sm:$0xff] }
  0x78   : > { %v3078_v5 = vpack.c.bf16 %v1571_v3, %v1570_v2  ;;  %v984_v3 = vld [vmem:[#allocation2 + $0xd9] sm:$0xff] }
  0x7a   : > { %1530 = vrot.lane.b32.xlu1 %v1320_v41, %s3434_s21  ;;  %v849_v41 = vld [vmem:[#allocation2 + $0x92] sm:$0xff] }
  0x7b   : > { %1467 = vrot.lane.b32.xlu0 %v2923_v55, %s3430_s20  ;;  %s2615_s20 = smov 64  }
  0x7e   : > { %1006 = vrot.lane.b32.xlu1 %v2903_v44, %s2606_s8 }
  0x7f   : > { %943 = vrot.lane.b32.xlu0 %v2860_v6, %s3436_s23  ;;  %s3455_s23 = smov 24  }
  0x82   : > { %1596 = vrot.lane.b32.xlu1 %v2908_v47, %s3438_s22 }
  0x83   : > { %1532 = vrot.lane.b32.xlu0 %v2932_v58, %s3434_s21  ;;  %s3453_s21 = smov 20  }
  0x86   : > { %1071 = vrot.lane.b32.xlu1 %v2917_v52, %s2607_s10 }
  0x87   : > { %1008 = vrot.lane.b32.xlu0 %v2938_v61, %s2606_s8 }
  0x8a   : > { %1661 = vrot.lane.b32.xlu1 %v2923_v55, %s2615_s20 }
  0x8b   : > { %1598 = vrot.lane.b32.xlu0 %v2947_v1, %s3438_s22  ;;  %s3444_s22 = smov 68  }
  0x8e   : > { %1073 = vrot.lane.b32.xlu1 %v2956_v8, %s2607_s10 }
  0x8f   : > { %619 = vrot.lane.b32.xlu0 %v2903_v44, %s2601_s17  ;;  %v3040_v44 = vpack.c.bf16 %v850_v42, %v849_v41  ;;  %v1378_v42 = vld [vmem:[#allocation3 + $0x90] sm:$0xff] }
  0x92   : > { %1663 = vrot.lane.b32.xlu1 %v2967_v12, %s2615_s20 }
  0x93   : > { %1209 = vrot.lane.b32.xlu0 %v2908_v47, %s2608_s13  ;;  %v1440_v47 = vld [vmem:[#allocation3 + $0x69] sm:$0xff] }
  0x94   : > { %v3047_v49 = vpack.c.bf16 %v1440_v47, %v1439_v46  ;;  %v853_v47 = vld [vmem:[#allocation2 + $0xc2] sm:$0xff] }
  0x96   : > { %621 = vrot.lane.b32.xlu1 %v2938_v61, %s2601_s17 }
  0x97   : > { %1726 = vrot.lane.b32.xlu0 %v2932_v58, %s3444_s22 }
  0x9a   : > { %1211 = vrot.lane.b32.xlu1 %v2947_v1, %s2608_s13 }
  0x9b   : > { %684 = vrot.lane.b32.xlu0 %v2917_v52, %s2600_s12 }
  0x9e   : > { %1728 = vrot.lane.b32.xlu1 %v2987_v18, %s3444_s22 }
  0x9f   : > { %1274 = vrot.lane.b32.xlu0 %v2923_v55, %s2609_s14 }
  0xa2   : > { %749 = vrot.lane.b32.xlu1 %v2860_v6, %s3442_s18  ;;  %v730_v6 = vpack.c.bf16 %v720_v25, %v719_v24 }
  0xa3   : > { %686 = vrot.lane.b32.xlu0 %v2956_v8, %s2600_s12 }
  0xa4   : > { %v677_v21 = vpop.permute.xlu1 %676 }
  0xa5   : > { %v612_v22 = vpop.permute.xlu0 %611 }
  0xa6   : > { %636 = vst.msk [vmem:[#allocation4] sm:$0xff] %vm3447_vm3, %v612_v22  ;;  %1339 = vrot.lane.b32.xlu1 %v2932_v58, %s3440_s15  ;;  %v3061_v58 = vpack.c.bf16 %v1505_v54, %v1504_v53  ;;  %v1701_v22 = vld [vmem:[#allocation3 + $0x82] sm:$0xff]  ;;  %v1444_v53 = vld [vmem:[#allocation3 + $0x99] sm:$0xff] }
  0xa7   : > { %701 = vst.msk [vmem:[#allocation4] sm:$0xff] %vm700_vm4, %v677_v21  ;;  %1276 = vrot.lane.b32.xlu0 %v2967_v12, %s2609_s14  ;;  %v1700_v21 = vld [vmem:[#allocation3 + $0x7a] sm:$0xff] }
  0xa8   : > { %v679_v26 = vpop.permute.xlu1 %678 }
  0xa9   : > { %v614_v27 = vpop.permute.xlu0 %613 }
  0xaa   : > { %637 = vst.msk [vmem:[#allocation4 + $0x8] sm:$0xff] %vm3447_vm3, %v614_v27  ;;  %814 = vrot.lane.b32.xlu1 %v2938_v61, %s3451_s11  ;;  %v980_v61 = vld [vmem:[#allocation2 + $0xa9] sm:$0xff] }
  0xab   : > { %751 = vrot.lane.b32.xlu0 %v730_v6, %s3442_s18  ;;  %702 = vst.msk [vmem:[#allocation4 + $0x8] sm:$0xff] %vm700_vm4, %v679_v26  ;;  %s3457_s18 = smov 60   ;;  %v3070_v0 = vpack.c.bf16 %v981_v62, %v980_v61  ;;  %v1508_v62 = vld [vmem:[#allocation3 + $0x92] sm:$0xff] }
  0xac   : > { %v744_v28 = vpop.permute.xlu1 %743 }
  0xad   : > { %767 = vst.msk [vmem:[#allocation4 + $0x8] sm:$0xff] %vm765_vm5, %v744_v28  ;;  %v742_v31 = vpop.permute.xlu0 %741 }
  0xae   : > { %766 = vst.msk [vmem:[#allocation4] sm:$0xff] %vm765_vm5, %v742_v31  ;;  %1404 = vrot.lane.b32.xlu1 %v2947_v1, %s3452_s24  ;;  %v723_v31 = vld [vmem:[#allocation2 + $0xc0] sm:$0xff] }
  0xaf   : > { %1341 = vrot.lane.b32.xlu0 %v2987_v18, %s3440_s15  ;;  %s3456_s15 = smov 56  }
  0xb0   : > { %v809_v35 = vpop.permute.xlu1 %808 }
  0xb1   : > { %832 = vst.msk [vmem:[#allocation4 + $0x8] sm:$0xff] %vm830_vm6, %v809_v35  ;;  %v807_v38 = vpop.permute.xlu0 %806 }
  0xb2   : > { %831 = vst.msk [vmem:[#allocation4] sm:$0xff] %vm830_vm6, %v807_v38  ;;  %879 = vrot.lane.b32.xlu1 %v2956_v8, %s3453_s21  ;;  %v1046_v8 = vld [vmem:[#allocation2 + $0xb2] sm:$0xff]  ;;  %v789_v38 = vld [vmem:[#allocation2 + $0xc9] sm:$0xff] }
  0xb3   : > { %816 = vrot.lane.b32.xlu0 %v3023_v34, %s3451_s11  ;;  %v3084_v11 = vpack.c.bf16 %v1046_v8, %v1045_v7 }
  0xb4   : > { %v874_v40 = vpop.permute.xlu1 %873 }
  0xb5   : > { %897 = vst.msk [vmem:[#allocation4 + $0x8] sm:$0xff] %vm895_vm7, %v874_v40  ;;  %v872_v43 = vpop.permute.xlu0 %871  ;;  %v797_v40 = vpack.c.bf16 %v789_v38, %v788_v37  ;;  %v1447_v38 = vld [vmem:[#allocation3 + $0xc1] sm:$0xff] }
  0xb6   : > { %896 = vst.msk [vmem:[#allocation4] sm:$0xff] %vm895_vm7, %v872_v43  ;;  %1469 = vrot.lane.b32.xlu1 %v2967_v12, %s3454_s16  ;;  %v1635_v12 = vld [vmem:[#allocation3 + $0x79] sm:$0xff] }
  0xb7   : > { %1406 = vrot.lane.b32.xlu0 %v3032_v39, %s3452_s24  ;;  %v3092_v16 = vpack.c.bf16 %v1636_v13, %v1635_v12  ;;  %v1379_v43 = vld [vmem:[#allocation3 + $0x98] sm:$0xff] }
  0xb8   : > { %v940_v45 = vpop.permute.xlu1 %939 }
  0xb9   : > { %963 = vst.msk [vmem:[#allocation4 + $0x8] sm:$0xff] %vm3448_vm8, %v940_v45  ;;  %v938_v48 = vpop.permute.xlu0 %937  ;;  %v3150_v45 = vpack.c.bf16 %v1379_v43, %v1378_v42  ;;  %v1512_v43 = vld [vmem:[#allocation3 + $0xc2] sm:$0xff] }
  0xba   : > { %962 = vst.msk [vmem:[#allocation4] sm:$0xff] %vm3448_vm8, %v938_v48  ;;  %945 = vrot.lane.b32.xlu1 %v730_v6, %s3455_s23  ;;  %v3112_v6 = vpack.c.bf16 %v1701_v22, %v1700_v21  ;;  %v854_v48 = vld [vmem:[#allocation2 + $0xca] sm:$0xff]  ;;  %v1640_v21 = vld [vmem:[#allocation3 + $0xb1] sm:$0xff] }
  0xbb   : > { %881 = vrot.lane.b32.xlu0 %v3040_v44, %s3453_s21 }
  0xbc   : > { %v1005_v50 = vpop.permute.xlu1 %1004 }
  0xbd   : > { %1028 = vst.msk [vmem:[#allocation4 + $0x8] sm:$0xff] %vm1026_vm9, %v1005_v50  ;;  %v1003_v51 = vpop.permute.xlu0 %1002  ;;  %v862_v50 = vpack.c.bf16 %v854_v48, %v853_v47  ;;  %v1578_v48 = vld [vmem:[#allocation3 + $0xd8] sm:$0xff] }
  0xbe   : > { %1027 = vst.msk [vmem:[#allocation4] sm:$0xff] %vm1026_vm9, %v1003_v51  ;;  %1534 = vrot.lane.b32.xlu1 %v2987_v18, %s3456_s15 }
  0xbf   : > { %1471 = vrot.lane.b32.xlu0 %v3047_v49, %s3454_s16 }
  0xc0   : > { %v616_v52 = vpop.permute.xlu1 %615 }
  0xc1   : > { %638 = vst.msk [vmem:[#allocation4 + $0x10] sm:$0xff] %vm3447_vm3, %v616_v52  ;;  %v1068_v55 = vpop.permute.xlu0 %1067  ;;  %v1443_v52 = vld [vmem:[#allocation3 + $0x91] sm:$0xff] }
  0xc2   : > { %1092 = vst.msk [vmem:[#allocation4] sm:$0xff] %vm3446_vm10, %v1068_v55  ;;  %1010 = vrot.lane.b32.xlu1 %v3023_v34, %s2606_s8  ;;  %v3162_v55 = vpack.c.bf16 %v1444_v53, %v1443_v52  ;;  %v1643_v53 = vld [vmem:[#allocation3 + $0xd9] sm:$0xff] }
  0xc3   : > { %947 = vrot.lane.b32.xlu0 %v2881_v23, %s3455_s23 }
  0xc4   : > { %v1206_v60 = vpop.permute.xlu1 %1205 }
  0xc5   : > { %1230 = vst.msk [vmem:[#allocation4] sm:$0xff] %vm1229_vm11, %v1206_v60  ;;  %v1070_v63 = vpop.permute.xlu0 %1069 }
  0xc6   : > { %1093 = vst.msk [vmem:[#allocation4 + $0x8] sm:$0xff] %vm3446_vm10, %v1070_v63  ;;  %1600 = vrot.lane.b32.xlu1 %v3032_v39, %s3457_s18  ;;  %v1509_v63 = vld [vmem:[#allocation3 + $0x9a] sm:$0xff] }
  0xc7   : > { %1536 = vrot.lane.b32.xlu0 %v3061_v58, %s3456_s15 }
  0xc8   : > { %v681_v1 = vpop.permute.xlu1 %680 }
  0xc9   : > { %703 = vst.msk [vmem:[#allocation4 + $0x10] sm:$0xff] %vm700_vm4, %v681_v1  ;;  %v618_v4 = vpop.permute.xlu0 %617  ;;  %v3174_v1 = vpack.c.bf16 %v1509_v63, %v1508_v62 }
  0xca   : > { %639 = vst.msk [vmem:[#allocation4 + $0x18] sm:$0xff] %vm3447_vm3, %v618_v4  ;;  %1075 = vrot.lane.b32.xlu1 %v3040_v44, %s2607_s10  ;;  %v985_v4 = vld [vmem:[#allocation2 + $0xe1] sm:$0xff] }
  0xcb   : > { %1012 = vrot.lane.b32.xlu0 %v3070_v0, %s2606_s8  ;;  %v993_v7 = vpack.c.bf16 %v985_v4, %v984_v3 }
  0xcc   : > { %v1271_v9 = vpop.permute.xlu1 %1270 }
  0xcd   : > { %1295 = vst.msk [vmem:[#allocation4] sm:$0xff] %vm1294_vm12, %v1271_v9  ;;  %v1208_v10 = vpop.permute.xlu0 %1207  ;;  %v1574_v9 = vld [vmem:[#allocation3 + $0xa8] sm:$0xff] }
  0xce   : > { %1231 = vst.msk [vmem:[#allocation4 + $0x8] sm:$0xff] %vm1229_vm11, %v1208_v10  ;;  %1665 = vrot.lane.b32.xlu1 %v3047_v49, %s2615_s20  ;;  %v1575_v10 = vld [vmem:[#allocation3 + $0xb0] sm:$0xff] }
  0xcf   : > { %1602 = vrot.lane.b32.xlu0 %v3078_v5, %s3457_s18  ;;  %v1585_v12 = vpack.c.bf16 %v1575_v10, %v1574_v9 }
  0xd0   : > { %v746_v14 = vpop.permute.xlu1 %745 }
  0xd1   : > { %768 = vst.msk [vmem:[#allocation4 + $0x10] sm:$0xff] %vm765_vm5, %v746_v14  ;;  %v683_v15 = vpop.permute.xlu0 %682  ;;  %v1049_v14 = vld [vmem:[#allocation2 + $0xda] sm:$0xff] }
  0xd2   : > { %704 = vst.msk [vmem:[#allocation4 + $0x18] sm:$0xff] %vm700_vm4, %v683_v15  ;;  %1077 = vrot.lane.b32.xlu1 %v3084_v11, %s2607_s10  ;;  %v1050_v15 = vld [vmem:[#allocation2 + $0xe2] sm:$0xff] }
  0xd3   : > { %623 = vrot.lane.b32.xlu0 %v3023_v34, %s2601_s17  ;;  %v732_v34 = vpack.c.bf16 %v724_v32, %v723_v31 }
  0xd4   : > { %v1336_v17 = vpop.permute.xlu1 %1335 }
  0xd5   : > { %1360 = vst.msk [vmem:[#allocation4] sm:$0xff] %vm1359_vm13, %v1336_v17  ;;  %v1273_v18 = vpop.permute.xlu0 %1272 }
  0xd6   : > { %1296 = vst.msk [vmem:[#allocation4 + $0x8] sm:$0xff] %vm1294_vm12, %v1273_v18  ;;  %1667 = vrot.lane.b32.xlu1 %v3092_v16, %s2615_s20  ;;  %v1058_v18 = vpack.c.bf16 %v1050_v15, %v1049_v14 }
  0xd7   : > { %1213 = vrot.lane.b32.xlu0 %v3032_v39, %s2608_s13 }
  0xd8   : > { %v811_v19 = vpop.permute.xlu1 %810 }
  0xd9   : > { %833 = vst.msk [vmem:[#allocation4 + $0x10] sm:$0xff] %vm830_vm6, %v811_v19  ;;  %v748_v20 = vpop.permute.xlu0 %747 }
  0xda   : > { %769 = vst.msk [vmem:[#allocation4 + $0x18] sm:$0xff] %vm765_vm5, %v748_v20  ;;  %625 = vrot.lane.b32.xlu1 %v3070_v0, %s2601_s17  ;;  %s3458_s17 = smov 12   ;;  %v1639_v20 = vld [vmem:[#allocation3 + $0xa9] sm:$0xff] }
  0xdb   : > { %1730 = vrot.lane.b32.xlu0 %v3061_v58, %s3444_s22 }
  0xdc   : > { %v1401_v24 = vpop.permute.xlu1 %1400 }
  0xdd   : > { %1425 = vst.msk [vmem:[#allocation4] sm:$0xff] %vm1424_vm14, %v1401_v24  ;;  %v1338_v25 = vpop.permute.xlu0 %1337  ;;  %v1650_v24 = vpack.c.bf16 %v1640_v21, %v1639_v20 }
  0xde   : > { %1361 = vst.msk [vmem:[#allocation4 + $0x8] sm:$0xff] %vm1359_vm13, %v1338_v25  ;;  %1215 = vrot.lane.b32.xlu1 %v3078_v5, %s2608_s13 }
  0xdf   : > { %688 = vrot.lane.b32.xlu0 %v3040_v44, %s2600_s12 }
  0xe0   : > { %v876_v26 = vpop.permute.xlu1 %875 }
  0xe1   : > { %898 = vst.msk [vmem:[#allocation4 + $0x10] sm:$0xff] %vm895_vm7, %v876_v26  ;;  %v813_v27 = vpop.permute.xlu0 %812 }
  0xe2   : > { %834 = vst.msk [vmem:[#allocation4 + $0x18] sm:$0xff] %vm830_vm6, %v813_v27  ;;  %1732 = vrot.lane.b32.xlu1 %v3112_v6, %s3444_s22  ;;  %s3459_s22 = smov 44  }
  0xe3   : > { %1278 = vrot.lane.b32.xlu0 %v3047_v49, %s2609_s14 }
  0xe4   : > { %v1466_v28 = vpop.permute.xlu1 %1465 }
  0xe5   : > { %1490 = vst.msk [vmem:[#allocation4] sm:$0xff] %vm3450_vm15, %v1466_v28  ;;  %v1403_v29 = vpop.permute.xlu0 %1402  ;;  %v1704_v28 = vld [vmem:[#allocation3 + $0xaa] sm:$0xff] }
  0xe6   : > { %1426 = vst.msk [vmem:[#allocation4 + $0x8] sm:$0xff] %vm1424_vm14, %v1403_v29  ;;  %753 = vrot.lane.b32.xlu1 %v2881_v23, %s3458_s17  ;;  %v1705_v29 = vld [vmem:[#allocation3 + $0xb2] sm:$0xff] }
  0xe7   : > { %690 = vrot.lane.b32.xlu0 %v3084_v11, %s2600_s12  ;;  %s3460_s12 = smov 68   ;;  %v1715_v31 = vpack.c.bf16 %v1705_v29, %v1704_v28 }
  0xe8   : > { %v942_v30 = vpop.permute.xlu1 %941 }
  0xe9   : > { %964 = vst.msk [vmem:[#allocation4 + $0x10] sm:$0xff] %vm3448_vm8, %v942_v30  ;;  %v878_v33 = vpop.permute.xlu0 %877 }
  0xea   : > { %899 = vst.msk [vmem:[#allocation4 + $0x18] sm:$0xff] %vm895_vm7, %v878_v33  ;;  %1343 = vrot.lane.b32.xlu1 %v3061_v58, %s3459_s22  ;;  %v920_v58 = vld [vmem:[#allocation2 + $0xe0] sm:$0xff] }
  0xeb   : > { %1280 = vrot.lane.b32.xlu0 %v3092_v16, %s2609_s14  ;;  %v928_v60 = vpack.c.bf16 %v920_v58, %v919_v57  ;;  %v1708_v58 = vld [vmem:[#allocation3 + $0xda] sm:$0xff] }
  0xec   : > { %v1531_v23 = vpop.permute.xlu1 %1530 }
  0xed   : > { %1555 = vst.msk [vmem:[#allocation4] sm:$0xff] %vm3449_vm0, %v1531_v23  ;;  %v1468_v35 = vpop.permute.xlu0 %1467  ;;  %v1383_v23 = vld [vmem:[#allocation3 + $0xc8] sm:$0xff] }
  0xee   : > { %1491 = vst.msk [vmem:[#allocation4 + $0x8] sm:$0xff] %vm3450_vm15, %v1468_v35  ;;  %818 = vrot.lane.b32.xlu1 %v3070_v0, %s3451_s11 }
  0xef   : > { %755 = vrot.lane.b32.xlu0 %v732_v34, %s3458_s17 }
  0xf0   : > { %v1007_v36 = vpop.permute.xlu1 %1006 }
  0xf1   : > { %1029 = vst.msk [vmem:[#allocation4 + $0x10] sm:$0xff] %vm1026_vm9, %v1007_v36  ;;  %v944_v39 = vpop.permute.xlu0 %943 }
  0xf2   : > { %965 = vst.msk [vmem:[#allocation4 + $0x18] sm:$0xff] %vm3448_vm8, %v944_v39  ;;  %1408 = vrot.lane.b32.xlu1 %v3078_v5, %s3452_s24  ;;  %v1448_v39 = vld [vmem:[#allocation3 + $0xc9] sm:$0xff] }
  0xf3   : > { %1345 = vrot.lane.b32.xlu0 %v3112_v6, %s3459_s22  ;;  %v1456_v42 = vpack.c.bf16 %v1448_v39, %v1447_v38 }
  0xf4   : > { %v1597_v41 = vpop.permute.xlu1 %1596 }
  0xf5   : > { %1621 = vst.msk [vmem:[#allocation4] sm:$0xff] %vm1620_vm1, %v1597_v41  ;;  %v1533_v44 = vpop.permute.xlu0 %1532 }
  0xf6   : > { %1556 = vst.msk [vmem:[#allocation4 + $0x8] sm:$0xff] %vm3449_vm0, %v1533_v44  ;;  %883 = vrot.lane.b32.xlu1 %v3084_v11, %s3453_s21  ;;  %v1513_v44 = vld [vmem:[#allocation3 + $0xca] sm:$0xff] }
  0xf7   : > { %820 = vrot.lane.b32.xlu0 %v797_v40, %s3451_s11  ;;  %v1521_v47 = vpack.c.bf16 %v1513_v44, %v1512_v43 }
  0xf8   : > { %v1072_v46 = vpop.permute.xlu1 %1071 }
  0xf9   : > { %1094 = vst.msk [vmem:[#allocation4 + $0x10] sm:$0xff] %vm3446_vm10, %v1072_v46  ;;  %v1009_v49 = vpop.permute.xlu0 %1008 }
  0xfa   : > { %1030 = vst.msk [vmem:[#allocation4 + $0x18] sm:$0xff] %vm1026_vm9, %v1009_v49  ;;  %1473 = vrot.lane.b32.xlu1 %v3092_v16, %s3454_s16  ;;  %v1579_v49 = vld [vmem:[#allocation3 + $0xe0] sm:$0xff] }
  0xfb   : > { %1410 = vrot.lane.b32.xlu0 %v3150_v45, %s3452_s24  ;;  %v1587_v52 = vpack.c.bf16 %v1579_v49, %v1578_v48 }
  0xfc   : > { %v1662_v51 = vpop.permute.xlu1 %1661 }
  0xfd   : > { %1686 = vst.msk [vmem:[#allocation4] sm:$0xff] %vm1685_vm2, %v1662_v51  ;;  %v1599_v54 = vpop.permute.xlu0 %1598 }
  0xfe   : > { %1622 = vst.msk [vmem:[#allocation4 + $0x8] sm:$0xff] %vm1620_vm1, %v1599_v54  ;;  %949 = vrot.lane.b32.xlu1 %v732_v34, %s3455_s23  ;;  %v1382_v34 = vld [vmem:[#allocation3 + $0xc0] sm:$0xff] }
  0xff   : > { %885 = vrot.lane.b32.xlu0 %v862_v50, %s3453_s21  ;;  %v1391_v37 = vpack.c.bf16 %v1383_v23, %v1382_v34  ;;  %v1644_v54 = vld [vmem:[#allocation3 + $0xe1] sm:$0xff] }
 0x100   : > { %v1074_v56 = vpop.permute.xlu1 %1073  ;;  %v1652_v57 = vpack.c.bf16 %v1644_v54, %v1643_v53 }
 0x101   : > { %1095 = vst.msk [vmem:[#allocation4 + $0x18] sm:$0xff] %vm3446_vm10, %v1074_v56  ;;  %v620_v59 = vpop.permute.xlu0 %619  ;;  %vm1750_vm10 = vcmask 589344  }
 0x102   : > { %640 = vst.msk [vmem:[#allocation4 + $0x20] sm:$0xff] %vm3447_vm3, %v620_v59  ;;  %1538 = vrot.lane.b32.xlu1 %v3112_v6, %s3456_s15  ;;  %v1709_v59 = vld [vmem:[#allocation3 + $0xe2] sm:$0xff] }
 0x103   : > { %1475 = vrot.lane.b32.xlu0 %v3162_v55, %s3454_s16  ;;  %v1717_v62 = vpack.c.bf16 %v1709_v59, %v1708_v58 }
 0x104   : > { %v1664_v61 = vpop.permute.xlu1 %1663 }
 0x105   : > { %1687 = vst.msk [vmem:[#allocation4 + $0x8] sm:$0xff] %vm1685_vm2, %v1664_v61  ;;  %v1210_v0 = vpop.permute.xlu0 %1209 }
 0x106   : > { %1232 = vst.msk [vmem:[#allocation4 + $0x10] sm:$0xff] %vm1229_vm11, %v1210_v0  ;;  %1014 = vrot.lane.b32.xlu1 %v797_v40, %s2606_s8 }
 0x107   : > { %951 = vrot.lane.b32.xlu0 %v928_v60, %s3455_s23 }
 0x108   : > { %v622_v2 = vpop.permute.xlu1 %621 }
 0x109   : > { %641 = vst.msk [vmem:[#allocation4 + $0x28] sm:$0xff] %vm3447_vm3, %v622_v2  ;;  %v1727_v5 = vpop.permute.xlu0 %1726  ;;  %vm1810_vm3 = vcmask 588800  }
 0x10a   : > { %1751 = vst.msk [vmem:[#allocation4] sm:$0xff] %vm1750_vm10, %v1727_v5  ;;  %1604 = vrot.lane.b32.xlu1 %v3150_v45, %s3457_s18 }
 0x10b   : > { %1540 = vrot.lane.b32.xlu0 %v3174_v1, %s3456_s15 }
 0x10c   : > { %v1212_v8 = vpop.permute.xlu1 %1211 }
 0x10d   : > { %1233 = vst.msk [vmem:[#allocation4 + $0x18] sm:$0xff] %vm1229_vm11, %v1212_v8  ;;  %v685_v11 = vpop.permute.xlu0 %684 }
 0x10e   : > { %705 = vst.msk [vmem:[#allocation4 + $0x20] sm:$0xff] %vm700_vm4, %v685_v11  ;;  %1079 = vrot.lane.b32.xlu1 %v862_v50, %s2607_s10 }
 0x10f   : > { %1016 = vrot.lane.b32.xlu0 %v993_v7, %s2606_s8 }
 0x110   : > { %v1729_v13 = vpop.permute.xlu1 %1728 }
 0x111   : > { %1752 = vst.msk [vmem:[#allocation4 + $0x8] sm:$0xff] %vm1750_vm10, %v1729_v13  ;;  %v1275_v16 = vpop.permute.xlu0 %1274  ;;  %v1759_v17 = vld [vmem:[#allocation4] sm:$0xff] }
 0x112   : > { %1297 = vst.msk [vmem:[#allocation4 + $0x10] sm:$0xff] %vm1294_vm12, %v1275_v16  ;;  %2468 = vmatprep.mubr.msk.bf16.mxu0 %vm1810_vm3, %v1759_v17  ;;  %1669 = vrot.lane.b32.xlu1 %v3162_v55, %s2615_s20 }
 0x113   : > { %1606 = vrot.lane.b32.xlu0 %v1585_v12, %s3457_s18 }
 0x114   : > { %v750_v19 = vpop.permute.xlu1 %749 }
 0x115   : > { %770 = vst.msk [vmem:[#allocation4 + $0x20] sm:$0xff] %vm765_vm5, %v750_v19  ;;  %v687_v22 = vpop.permute.xlu0 %686 }
 0x116   : > { %706 = vst.msk [vmem:[#allocation4 + $0x28] sm:$0xff] %vm700_vm4, %v687_v22  ;;  %1217 = vrot.lane.b32.xlu1 %v3150_v45, %s2608_s13 }
 0x117   : > { %1081 = vrot.lane.b32.xlu0 %v1058_v18, %s2607_s10  ;;  %s3477_s10 = sshll.u32 %s2779_s19, 2  ;;  %s2343_s19 = sshll.u32 %s3489_s25, 1 }
 0x118   : > { %v1340_v25 = vpop.permute.xlu1 %1339  ;;  %v1760_v6 = vld [vmem:[#allocation4 + $0x8] sm:$0xff] }
 0x119   : > { %1362 = vst.msk [vmem:[#allocation4 + $0x10] sm:$0xff] %vm1359_vm13, %v1340_v25  ;;  %v1277_v26 = vpop.permute.xlu0 %1276  ;;  %2469 = vmatmul.mubr.msk.bf16.vlgmr.msra.gmra.mrb[0].mxu0 %vm1810_vm3, %v1760_v6 }
 0x11a   : > { %1298 = vst.msk [vmem:[#allocation4 + $0x18] sm:$0xff] %vm1294_vm12, %v1277_v26  ;;  %1734 = vrot.lane.b32.xlu1 %v3174_v1, %s3460_s12 }
 0x11b   : > { %1671 = vrot.lane.b32.xlu0 %v1650_v24, %s2615_s20 }
 0x11c   : > { %v815_v27 = vpop.permute.xlu1 %814 }
 0x11d   : > { %835 = vst.msk [vmem:[#allocation4 + $0x20] sm:$0xff] %vm830_vm6, %v815_v27  ;;  %v752_v30 = vpop.permute.xlu0 %751 }
 0x11e   : > { %771 = vst.msk [vmem:[#allocation4 + $0x28] sm:$0xff] %vm765_vm5, %v752_v30  ;;  %1282 = vrot.lane.b32.xlu1 %v3162_v55, %s2609_s14 }
 0x11f   : > { %1219 = vrot.lane.b32.xlu0 %v1585_v12, %s2608_s13 }
 0x120   : > { %v1405_v32 = vpop.permute.xlu1 %1404 }
 0x121   : > { %1427 = vst.msk [vmem:[#allocation4 + $0x10] sm:$0xff] %vm1424_vm14, %v1405_v32  ;;  %v1342_v33 = vpop.permute.xlu0 %1341 }
 0x122   : > { %1363 = vst.msk [vmem:[#allocation4 + $0x18] sm:$0xff] %vm1359_vm13, %v1342_v33  ;;  %1284 = vrot.lane.b32.xlu1 %v1650_v24, %s2609_s14 }
 0x123   : > { %1736 = vrot.lane.b32.xlu0 %v1715_v31, %s3460_s12 }
 0x124   : > { %v880_v35 = vpop.permute.xlu1 %879 }
 0x125   : > { %900 = vst.msk [vmem:[#allocation4 + $0x20] sm:$0xff] %vm895_vm7, %v880_v35  ;;  %v817_v36 = vpop.permute.xlu0 %816 }
 0x126   : > { %836 = vst.msk [vmem:[#allocation4 + $0x28] sm:$0xff] %vm830_vm6, %v817_v36  ;;  %1349 = vrot.lane.b32.xlu1 %v1715_v31, %s3459_s22 }
 0x127   : > { %1347 = vrot.lane.b32.xlu0 %v3174_v1, %s3459_s22 }
 0x128   : > { %v1470_v40 = vpop.permute.xlu1 %1469 }
 0x129   : > { %1492 = vst.msk [vmem:[#allocation4 + $0x10] sm:$0xff] %vm3450_vm15, %v1470_v40  ;;  %v1407_v41 = vpop.permute.xlu0 %1406 }
 0x12a   : > { %1428 = vst.msk [vmem:[#allocation4 + $0x18] sm:$0xff] %vm1424_vm14, %v1407_v41  ;;  %1414 = vrot.lane.b32.xlu1 %v1391_v37, %s3452_s24 }
 0x12b   : > { %1412 = vrot.lane.b32.xlu0 %v1585_v12, %s3452_s24 }
 0x12c   : > { %v946_v45 = vpop.permute.xlu1 %945 }
 0x12d   : > { %966 = vst.msk [vmem:[#allocation4 + $0x20] sm:$0xff] %vm3448_vm8, %v946_v45  ;;  %v882_v46 = vpop.permute.xlu0 %881 }
 0x12e   : > { %901 = vst.msk [vmem:[#allocation4 + $0x28] sm:$0xff] %vm895_vm7, %v882_v46  ;;  %1479 = vrot.lane.b32.xlu1 %v1456_v42, %s3454_s16 }
 0x12f   : > { %1477 = vrot.lane.b32.xlu0 %v1650_v24, %s3454_s16 }
 0x130   : > { %v1535_v50 = vpop.permute.xlu1 %1534 }
 0x131   : > { %1557 = vst.msk [vmem:[#allocation4 + $0x10] sm:$0xff] %vm3449_vm0, %v1535_v50  ;;  %v1472_v51 = vpop.permute.xlu0 %1471 }
 0x132   : > { %1493 = vst.msk [vmem:[#allocation4 + $0x18] sm:$0xff] %vm3450_vm15, %v1472_v51  ;;  %1544 = vrot.lane.b32.xlu1 %v1521_v47, %s3456_s15  ;;  %vm3463_vm15 = vcmask 64544  }
 0x133   : > { %1542 = vrot.lane.b32.xlu0 %v1715_v31, %s3456_s15  ;;  %s3316_s15 = scalar_lea.vmem %s3423_s6, %s3477_s10 }
 0x134   : > { %v1011_v55 = vpop.permute.xlu1 %1010 }
 0x135   : > { %1031 = vst.msk [vmem:[#allocation4 + $0x20] sm:$0xff] %vm1026_vm9, %v1011_v55  ;;  %v948_v56 = vpop.permute.xlu0 %947 }
 0x136   : > { %967 = vst.msk [vmem:[#allocation4 + $0x28] sm:$0xff] %vm3448_vm8, %v948_v56  ;;  %1610 = vrot.lane.b32.xlu1 %v1587_v52, %s3457_s18  ;;  %vm3461_vm8 = vcmask 294144  }
 0x137   : > { %1608 = vrot.lane.b32.xlu0 %v1391_v37, %s3457_s18 }
 0x138   : > { %v1601_v60 = vpop.permute.xlu1 %1600 }
 0x139   : > { %1623 = vst.msk [vmem:[#allocation4 + $0x10] sm:$0xff] %vm1620_vm1, %v1601_v60  ;;  %v1537_v61 = vpop.permute.xlu0 %1536 }
 0x13a   : > { %1558 = vst.msk [vmem:[#allocation4 + $0x18] sm:$0xff] %vm3449_vm0, %v1537_v61  ;;  %1675 = vrot.lane.b32.xlu1 %v1652_v57, %s2615_s20  ;;  %vm3462_vm0 = vmmov %vm3461_vm8 }
 0x13b   : > { %1673 = vrot.lane.b32.xlu0 %v1456_v42, %s2615_s20  ;;  %s448_s20 = sadd.s32 %s2343_s19, %s2762_s9 }
 0x13c   : > { %v1076_v63 = vpop.permute.xlu1 %1075  ;;  %s2344_s22 = sshll.u32 %s448_s20, 1 }
 0x13d   : > { %1096 = vst.msk [vmem:[#allocation4 + $0x20] sm:$0xff] %vm3461_vm8, %v1076_v63  ;;  %v1013_v0 = vpop.permute.xlu0 %1012  ;;  %vm3464_vm8 = vmmov %vm3463_vm15  ;;  %s450_s21 = scalar_lea.vmem %s3424_s7, %s2344_s22 }
 0x13e   : > { %1032 = vst.msk [vmem:[#allocation4 + $0x28] sm:$0xff] %vm1026_vm9, %v1013_v0  ;;  %1740 = vrot.lane.b32.xlu1 %v1717_v62, %s3460_s12 }
 0x13f   : > { %1738 = vrot.lane.b32.xlu0 %v1521_v47, %s3460_s12 }
 0x140   : > { %v1666_v1 = vpop.permute.xlu1 %1665 }
 0x141   : > { %1688 = vst.msk [vmem:[#allocation4 + $0x10] sm:$0xff] %vm1685_vm2, %v1666_v1  ;;  %v1603_v2 = vpop.permute.xlu0 %1602  ;;  %v3308_v1 = vld [vmem:[%s3422_s5] ss:$0 sm:$0xff] }
 0x142   : > { %1624 = vst.msk [vmem:[#allocation4 + $0x18] sm:$0xff] %vm1620_vm1, %v1603_v2 }
 0x144   : > { %v1078_v3 = vpop.permute.xlu1 %1077 }
 0x145   : > { %1097 = vst.msk [vmem:[#allocation4 + $0x28] sm:$0xff] %vm3462_vm0, %v1078_v3  ;;  %v624_v4 = vpop.permute.xlu0 %623 }
 0x146   : > { %642 = vst.msk [vmem:[#allocation4 + $0x30] sm:$0xff] %vm3463_vm15, %v624_v4  ;;  %vm3467_vm15 = vcmask 490944  }
 0x148   : > { %v1668_v5 = vpop.permute.xlu1 %1667 }
 0x149   : > { %1689 = vst.msk [vmem:[#allocation4 + $0x18] sm:$0xff] %vm1685_vm2, %v1668_v5  ;;  %v1214_v7 = vpop.permute.xlu0 %1213 }
 0x14a   : > { %1234 = vst.msk [vmem:[#allocation4 + $0x20] sm:$0xff] %vm1229_vm11, %v1214_v7 }
 0x14c   : > { %v626_v8 = vpop.permute.xlu1 %625 }
 0x14d   : > { %643 = vst.msk [vmem:[#allocation4 + $0x38] sm:$0xff] %vm3464_vm8, %v626_v8  ;;  %v1731_v9 = vpop.permute.xlu0 %1730  ;;  %vm3470_vm8 = vmmov %vm3467_vm15 }
 0x14e   : > { %1753 = vst.msk [vmem:[#allocation4 + $0x10] sm:$0xff] %vm1750_vm10, %v1731_v9 }
 0x150   : > { %v1216_v10 = vpop.permute.xlu1 %1215 }
 0x151   : > { %1235 = vst.msk [vmem:[#allocation4 + $0x28] sm:$0xff] %vm1229_vm11, %v1216_v10  ;;  %v689_v11 = vpop.permute.xlu0 %688 }
 0x152   : > { %707 = vst.msk [vmem:[#allocation4 + $0x30] sm:$0xff] %vm700_vm4, %v689_v11 }
 0x154   : > { %v1733_v12 = vpop.permute.xlu1 %1732 }
 0x155   : > { %1754 = vst.msk [vmem:[#allocation4 + $0x18] sm:$0xff] %vm1750_vm10, %v1733_v12  ;;  %v1279_v13 = vpop.permute.xlu0 %1278  ;;  %v1761_v14 = vld [vmem:[#allocation4 + $0x10] sm:$0xff] }
 0x156   : > { %1299 = vst.msk [vmem:[#allocation4 + $0x20] sm:$0xff] %vm1294_vm12, %v1279_v13  ;;  %2472 = vmatprep.mubr.msk.bf16.mxu0 %vm1810_vm3, %v1761_v14 }
 0x158   : > { %v754_v15 = vpop.permute.xlu1 %753 }
 0x159   : > { %v691_v16 = vpop.permute.xlu0 %690  ;;  %772 = vst.msk [vmem:[#allocation4 + $0x30] sm:$0xff] %vm765_vm5, %v754_v15 }
 0x15a   : > { %708 = vst.msk [vmem:[#allocation4 + $0x38] sm:$0xff] %vm700_vm4, %v691_v16  ;;  %vm3465_vm4 = vcmask 458144  }
 0x15b   : > { %vm3468_vm0 = vmmov %vm3465_vm4 }
 0x15c   : > { %v1344_v17 = vpop.permute.xlu1 %1343  ;;  %v1762_v18 = vld [vmem:[#allocation4 + $0x18] sm:$0xff] }
 0x15d   : > { %v1281_v19 = vpop.permute.xlu0 %1280  ;;  %1364 = vst.msk [vmem:[#allocation4 + $0x20] sm:$0xff] %vm1359_vm13, %v1344_v17  ;;  %2473 = vmatmul.mubr.msk.bf16.gmra.mrb[4].mxu0 %vm1810_vm3, %v1762_v18 }
 0x15e   : > { %1300 = vst.msk [vmem:[#allocation4 + $0x28] sm:$0xff] %vm1294_vm12, %v1281_v19 }
 0x160   : > { %v819_v20 = vpop.permute.xlu1 %818 }
 0x161   : > { %v756_v21 = vpop.permute.xlu0 %755  ;;  %837 = vst.msk [vmem:[#allocation4 + $0x30] sm:$0xff] %vm830_vm6, %v819_v20 }
 0x162   : > { %773 = vst.msk [vmem:[#allocation4 + $0x38] sm:$0xff] %vm765_vm5, %v756_v21  ;;  %vm3466_vm5 = vcmask 228544  }
 0x164   : > { %v1409_v22 = vpop.permute.xlu1 %1408 }
 0x165   : > { %v1346_v24 = vpop.permute.xlu0 %1345  ;;  %1429 = vst.msk [vmem:[#allocation4 + $0x20] sm:$0xff] %vm1424_vm14, %v1409_v22 }
 0x166   : > { %1365 = vst.msk [vmem:[#allocation4 + $0x28] sm:$0xff] %vm1359_vm13, %v1346_v24 }
 0x168   : > { %v884_v25 = vpop.permute.xlu1 %883 }
 0x169   : > { %v821_v6 = vpop.permute.xlu0 %820  ;;  %902 = vst.msk [vmem:[#allocation4 + $0x30] sm:$0xff] %vm895_vm7, %v884_v25 }
 0x16a   : > { %838 = vst.msk [vmem:[#allocation4 + $0x38] sm:$0xff] %vm830_vm6, %v821_v6  ;;  %vm3469_vm6 = vmmov %vm3466_vm5 }
 0x16c   : > { %v1474_v26 = vpop.permute.xlu1 %1473 }
 0x16d   : > { %v1411_v27 = vpop.permute.xlu0 %1410  ;;  %1494 = vst.msk [vmem:[#allocation4 + $0x20] sm:$0xff] %vm3465_vm4, %v1474_v26 }
 0x16e   : > { %1430 = vst.msk [vmem:[#allocation4 + $0x28] sm:$0xff] %vm1424_vm14, %v1411_v27 }
 0x170   : > { %v950_v28 = vpop.permute.xlu1 %949 }
 0x171   : > { %v886_v29 = vpop.permute.xlu0 %885  ;;  %968 = vst.msk [vmem:[#allocation4 + $0x30] sm:$0xff] %vm3466_vm5, %v950_v28 }
 0x172   : > { %903 = vst.msk [vmem:[#allocation4 + $0x38] sm:$0xff] %vm895_vm7, %v886_v29  ;;  %vm3471_vm7 = vcmask 294144  }
 0x173   : > { %vm3472_vm4 = vmmov %vm3471_vm7 }
 0x174   : > { %v1539_v30 = vpop.permute.xlu1 %1538 }
 0x175   : > { %v1476_v31 = vpop.permute.xlu0 %1475  ;;  %1559 = vst.msk [vmem:[#allocation4 + $0x20] sm:$0xff] %vm3467_vm15, %v1539_v30 }
 0x176   : > { %1495 = vst.msk [vmem:[#allocation4 + $0x28] sm:$0xff] %vm3468_vm0, %v1476_v31 }
 0x178   : > { %v1015_v32 = vpop.permute.xlu1 %1014 }
 0x179   : > { %v952_v33 = vpop.permute.xlu0 %951  ;;  %1033 = vst.msk [vmem:[#allocation4 + $0x30] sm:$0xff] %vm1026_vm9, %v1015_v32 }
 0x17a   : > { %969 = vst.msk [vmem:[#allocation4 + $0x38] sm:$0xff] %vm3469_vm6, %v952_v33 }
 0x17c   : > { %v1605_v34 = vpop.permute.xlu1 %1604 }
 0x17d   : > { %v1541_v23 = vpop.permute.xlu0 %1540  ;;  %1625 = vst.msk [vmem:[#allocation4 + $0x20] sm:$0xff] %vm1620_vm1, %v1605_v34 }
 0x17e   : > { %1560 = vst.msk [vmem:[#allocation4 + $0x28] sm:$0xff] %vm3470_vm8, %v1541_v23 }
 0x180   : > { %v1080_v35 = vpop.permute.xlu1 %1079 }
 0x181   : > { %v1017_v36 = vpop.permute.xlu0 %1016  ;;  %1098 = vst.msk [vmem:[#allocation4 + $0x30] sm:$0xff] %vm3471_vm7, %v1080_v35 }
 0x182   : > { %1034 = vst.msk [vmem:[#allocation4 + $0x38] sm:$0xff] %vm1026_vm9, %v1017_v36  ;;  %vm3473_vm9 = vmmov %vm3468_vm0 }
 0x184   : > { %v1670_v37 = vpop.permute.xlu1 %1669 }
 0x185   : > { %v1607_v38 = vpop.permute.xlu0 %1606  ;;  %1690 = vst.msk [vmem:[#allocation4 + $0x20] sm:$0xff] %vm1685_vm2, %v1670_v37 }
 0x186   : > { %1626 = vst.msk [vmem:[#allocation4 + $0x28] sm:$0xff] %vm1620_vm1, %v1607_v38 }
 0x188   : > { %v1218_v39 = vpop.permute.xlu1 %1217 }
 0x189   : > { %v1082_v40 = vpop.permute.xlu0 %1081  ;;  %1236 = vst.msk [vmem:[#allocation4 + $0x30] sm:$0xff] %vm1229_vm11, %v1218_v39 }
 0x18a   : > { %1099 = vst.msk [vmem:[#allocation4 + $0x38] sm:$0xff] %vm3472_vm4, %v1082_v40 }
 0x18c   : > { %v1735_v41 = vpop.permute.xlu1 %1734 }
 0x18d   : > { %v1672_v42 = vpop.permute.xlu0 %1671  ;;  %1755 = vst.msk [vmem:[#allocation4 + $0x20] sm:$0xff] %vm1750_vm10, %v1735_v41 }
 0x18e   : > { %1691 = vst.msk [vmem:[#allocation4 + $0x28] sm:$0xff] %vm1685_vm2, %v1672_v42 }
 0x190   : > { %v1283_v43 = vpop.permute.xlu1 %1282 }
 0x191   : > { %v1220_v44 = vpop.permute.xlu0 %1219  ;;  %1301 = vst.msk [vmem:[#allocation4 + $0x30] sm:$0xff] %vm1294_vm12, %v1283_v43 }
 0x192   : > { %1237 = vst.msk [vmem:[#allocation4 + $0x38] sm:$0xff] %vm1229_vm11, %v1220_v44  ;;  %vm3474_vm11 = vmmov %vm3468_vm0 }
 0x194   : > { %v1285_v45 = vpop.permute.xlu1 %1284  ;;  %v1763_v46 = vld [vmem:[#allocation4 + $0x20] sm:$0xff] }
 0x195   : > { %v1737_v47 = vpop.permute.xlu0 %1736  ;;  %1302 = vst.msk [vmem:[#allocation4 + $0x38] sm:$0xff] %vm1294_vm12, %v1285_v45  ;;  %2476 = vmatprep.mubr.msk.bf16.mxu1 %vm1810_vm3, %v1763_v46  ;;  %vm3475_vm12 = vmmov %vm3470_vm8 }
 0x196   : > { %1756 = vst.msk [vmem:[#allocation4 + $0x28] sm:$0xff] %vm1750_vm10, %v1737_v47 }
 0x198   : > { %v1350_v48 = vpop.permute.xlu1 %1349 }
 0x199   : > { %v1348_v49 = vpop.permute.xlu0 %1347  ;;  %1367 = vst.msk [vmem:[#allocation4 + $0x38] sm:$0xff] %vm1359_vm13, %v1350_v48 }
 0x19a   : > { %1366 = vst.msk [vmem:[#allocation4 + $0x30] sm:$0xff] %vm1359_vm13, %v1348_v49  ;;  %vm3476_vm13 = vmmov %vm3470_vm8 }
 0x19c   : > { %v1415_v50 = vpop.permute.xlu1 %1414 }
 0x19d   : > { %v1413_v51 = vpop.permute.xlu0 %1412  ;;  %1432 = vst.msk [vmem:[#allocation4 + $0x38] sm:$0xff] %vm1424_vm14, %v1415_v50  ;;  %v1764_v52 = vld [vmem:[#allocation4 + $0x28] sm:$0xff] }
 0x19e   : > { %1431 = vst.msk [vmem:[#allocation4 + $0x30] sm:$0xff] %vm1424_vm14, %v1413_v51  ;;  %2477 = vmatmul.mubr.msk.bf16.vlgmr.msra.gmra.mrb[0].mxu1 %vm1810_vm3, %v1764_v52  ;;  %vm2055_vm14 = vcmask 57344  }
 0x1a0   : > { %v1480_v53 = vpop.permute.xlu1 %1479 }
 0x1a1   : > { %v1478_v54 = vpop.permute.xlu0 %1477  ;;  %1497 = vst.msk [vmem:[#allocation4 + $0x38] sm:$0xff] %vm3473_vm9, %v1480_v53 }
 0x1a2   : > { %1496 = vst.msk [vmem:[#allocation4 + $0x30] sm:$0xff] %vm3474_vm11, %v1478_v54 }
 0x1a4   : > { %v1545_v55 = vpop.permute.xlu1 %1544 }
 0x1a5   : > { %v1543_v56 = vpop.permute.xlu0 %1542  ;;  %1562 = vst.msk [vmem:[#allocation4 + $0x38] sm:$0xff] %vm3475_vm12, %v1545_v55 }
 0x1a6   : > { %1561 = vst.msk [vmem:[#allocation4 + $0x30] sm:$0xff] %vm3476_vm13, %v1543_v56 }
 0x1a8   : > { %v1611_v57 = vpop.permute.xlu1 %1610 }
 0x1a9   : > { %v1609_v58 = vpop.permute.xlu0 %1608  ;;  %1628 = vst.msk [vmem:[#allocation4 + $0x38] sm:$0xff] %vm1620_vm1, %v1611_v57 }
 0x1aa   : > { %1627 = vst.msk [vmem:[#allocation4 + $0x30] sm:$0xff] %vm1620_vm1, %v1609_v58 }
 0x1ac   : > { %v1676_v59 = vpop.permute.xlu1 %1675 }
 0x1ad   : > { %v1674_v60 = vpop.permute.xlu0 %1673  ;;  %1693 = vst.msk [vmem:[#allocation4 + $0x38] sm:$0xff] %vm1685_vm2, %v1676_v59 }
 0x1ae   : > { %1692 = vst.msk [vmem:[#allocation4 + $0x30] sm:$0xff] %vm1685_vm2, %v1674_v60 }
 0x1b0   : > { %v1741_v61 = vpop.permute.xlu1 %1740 }
 0x1b1   : > { %v1739_v62 = vpop.permute.xlu0 %1738  ;;  %1758 = vst.msk [vmem:[#allocation4 + $0x38] sm:$0xff] %vm1750_vm10, %v1741_v61 }
 0x1b2   : > { %1757 = vst.msk [vmem:[#allocation4 + $0x30] sm:$0xff] %vm1750_vm10, %v1739_v62  ;;  %vm2000_vm10 = vcmask 60416  }
 0x1b8   : > { %v1766_v63 = vld [vmem:[#allocation4 + $0x38] sm:$0xff] }
 0x1b9   : > { %v1765_v0 = vld [vmem:[#allocation4 + $0x30] sm:$0xff] }
 0x1ba   : > { %2480 = vmatprep.mubr.msk.bf16.mxu1 %vm1810_vm3, %v1765_v0 }
 0x1bb   : > { %2481 = vmatmul.mubr.msk.bf16.gmra.mrb[4].mxu1 %vm1810_vm3, %v1766_v63  ;;  %vm2017_vm3 = vcmask 64512  }
 0x1ec   : > { %v2470_v2 = vpop.f32.mrb[0].mxu0 }
 0x1ed   : > { %v1882_v3 = vadd.f32 %v2470_v2, %v3308_v1  ;;  %v1873_v4 = vpop.f32.mrb[1].mxu0 }
 0x1ee   : > { %v1874_v5 = vadd.f32 %v3308_v1, %v1873_v4  ;;  %v2471_v7 = vpop.f32.mrb[2].mxu0 }
 0x1ef   : > { %v2383_v8 = vpack.c.bf16 %v1882_v3, %v1882_v3  ;;  %v1885_v9 = vadd.f32 %v2471_v7, %v3308_v1  ;;  %v1876_v10 = vpop.f32.mrb[3].mxu0  ;;  %v2059_v14 = vmul.f32 %v1882_v3, %v1882_v3  ;;  %v2021_v21 = vsel %vm2017_vm3, %v1882_v3, 0.0 }
 0x1f0   : > { %v2381_v11 = vpack.c.bf16 %v1874_v5, %v1874_v5  ;;  %v2057_v12 = vmul.f32 %v1874_v5, %v1874_v5  ;;  %v1877_v13 = vadd.f32 %v3308_v1, %v1876_v10  ;;  %v2018_v16 = vsel %vm2017_vm3, %v1874_v5, 0.0 }
 0x1f1   : > { %2003 = vst.msk [vmem:[%s3316_s15 + $0x8] sm:$0xf] %vm2000_vm10, %v2383_v8  ;;  %v2384_v15 = vpack.c.bf16 %v1885_v9, %v1885_v9  ;;  %v2060_v24 = vmul.f32 %v1885_v9, %v1885_v9  ;;  %v2076_v27 = vsel %vm2017_vm3, %v2059_v14, 0.0  ;;  %v2023_v28 = vsel %vm2017_vm3, %v1885_v9, 0.0 }
 0x1f2   : > { %2001 = vst.msk [vmem:[%s3316_s15] sm:$0xf] %vm2000_vm10, %v2381_v11  ;;  %v2382_v17 = vpack.c.bf16 %v1877_v13, %v1877_v13  ;;  %v2019_v18 = vsel %vm2017_vm3, %v1877_v13, 0.0  ;;  %v2058_v19 = vmul.f32 %v1877_v13, %v1877_v13  ;;  %v2073_v22 = vsel %vm2017_vm3, %v2057_v12, 0.0 }
 0x1f3   : > { %2004 = vst.msk [vmem:[%s3316_s15 + $0xc] sm:$0xf] %vm2000_vm10, %v2384_v15  ;;  %v2020_v20 = vadd.f32 %v2019_v18, %v2018_v16  ;;  %v2078_v31 = vsel %vm2017_vm3, %v2060_v24, 0.0 }
 0x1f4   : > { %2002 = vst.msk [vmem:[%s3316_s15 + $0x4] sm:$0xf] %vm2000_vm10, %v2382_v17  ;;  %v2074_v25 = vsel %vm2017_vm3, %v2058_v19, 0.0 }
 0x1f5   : > { %v2022_v6 = vadd.f32 %v2021_v21, %v2020_v20  ;;  %v2075_v26 = vadd.f32 %v2074_v25, %v2073_v22 }
 0x1f7   : > { %v2077_v29 = vadd.f32 %v2076_v27, %v2075_v26  ;;  %v2024_v30 = vadd.f32 %v2023_v28, %v2022_v6 }
 0x1f9   : > { %v2079_v32 = vadd.f32 %v2078_v31, %v2077_v29 }
 0x230   : > { %v2474_v33 = vpop.f32.mrb[4].mxu0 }
 0x231   : > { %v1898_v34 = vadd.f32 %v2474_v33, %v3308_v1  ;;  %v1889_v23 = vpop.f32.mrb[5].mxu0 }
 0x232   : > { %v1890_v35 = vadd.f32 %v3308_v1, %v1889_v23  ;;  %v2475_v36 = vpop.f32.mrb[6].mxu0 }
 0x233   : > { %v2387_v37 = vpack.c.bf16 %v1898_v34, %v1898_v34  ;;  %v1901_v38 = vadd.f32 %v2475_v36, %v3308_v1  ;;  %v1892_v39 = vpop.f32.mrb[7].mxu0  ;;  %v2063_v49 = vmul.f32 %v1898_v34, %v1898_v34  ;;  %v2029_v53 = vsel %vm2017_vm3, %v1898_v34, 0.0 }
 0x234   : > { %v2385_v40 = vpack.c.bf16 %v1890_v35, %v1890_v35  ;;  %v2025_v41 = vsel %vm2017_vm3, %v1890_v35, 0.0  ;;  %v2061_v42 = vmul.f32 %v1890_v35, %v1890_v35  ;;  %v1893_v43 = vadd.f32 %v3308_v1, %v1892_v39 }
 0x235   : > { %2007 = vst.msk [vmem:[%s3316_s15 + $0x18] sm:$0xf] %vm2000_vm10, %v2387_v37  ;;  %v2026_v44 = vadd.f32 %v2025_v41, %v2024_v30  ;;  %v2388_v45 = vpack.c.bf16 %v1901_v38, %v1901_v38  ;;  %v2064_v54 = vmul.f32 %v1901_v38, %v1901_v38  ;;  %v2031_v57 = vsel %vm2017_vm3, %v1901_v38, 0.0 }
 0x236   : > { %2005 = vst.msk [vmem:[%s3316_s15 + $0x10] sm:$0xf] %vm2000_vm10, %v2385_v40  ;;  %v2080_v46 = vsel %vm2017_vm3, %v2061_v42, 0.0  ;;  %v2386_v47 = vpack.c.bf16 %v1893_v43, %v1893_v43  ;;  %v2027_v48 = vsel %vm2017_vm3, %v1893_v43, 0.0  ;;  %v2062_v52 = vmul.f32 %v1893_v43, %v1893_v43 }
 0x237   : > { %v2081_v50 = vadd.f32 %v2080_v46, %v2079_v32  ;;  %2008 = vst.msk [vmem:[%s3316_s15 + $0x1c] sm:$0xf] %vm2000_vm10, %v2388_v45  ;;  %v2028_v51 = vadd.f32 %v2027_v48, %v2026_v44  ;;  %v2084_v59 = vsel %vm2017_vm3, %v2063_v49, 0.0  ;;  %v2086_v62 = vsel %vm2017_vm3, %v2064_v54, 0.0 }
 0x238   : > { %2006 = vst.msk [vmem:[%s3316_s15 + $0x14] sm:$0xf] %vm2000_vm10, %v2386_v47  ;;  %v2082_v56 = vsel %vm2017_vm3, %v2062_v52, 0.0 }
 0x239   : > { %v2030_v55 = vadd.f32 %v2029_v53, %v2028_v51  ;;  %v2083_v58 = vadd.f32 %v2082_v56, %v2081_v50 }
 0x23b   : > { %v2032_v60 = vadd.f32 %v2031_v57, %v2030_v55  ;;  %v2085_v61 = vadd.f32 %v2084_v59, %v2083_v58 }
 0x23d   : > { %v2087_v63 = vadd.f32 %v2086_v62, %v2085_v61 }
 0x271   : > { %v2478_v0 = vpop.f32.mrb[0].mxu1 }
 0x272   : > { %v1914_v2 = vadd.f32 %v2478_v0, %v3308_v1  ;;  %v1905_v3 = vpop.f32.mrb[1].mxu1 }
 0x273   : > { %v1906_v4 = vadd.f32 %v3308_v1, %v1905_v3  ;;  %v2479_v5 = vpop.f32.mrb[2].mxu1 }
 0x274   : > { %v2391_v7 = vpack.c.bf16 %v1914_v2, %v1914_v2  ;;  %v1917_v8 = vadd.f32 %v2479_v5, %v3308_v1  ;;  %v1908_v9 = vpop.f32.mrb[3].mxu1  ;;  %v2067_v19 = vmul.f32 %v1914_v2, %v1914_v2  ;;  %v2037_v24 = vsel %vm2017_vm3, %v1914_v2, 0.0 }
 0x275   : > { %v2389_v10 = vpack.c.bf16 %v1906_v4, %v1906_v4  ;;  %v2033_v11 = vsel %vm2017_vm3, %v1906_v4, 0.0  ;;  %v2065_v12 = vmul.f32 %v1906_v4, %v1906_v4  ;;  %v1909_v13 = vadd.f32 %v3308_v1, %v1908_v9 }
 0x276   : > { %2011 = vst.msk [vmem:[%s3316_s15 + $0x28] sm:$0xf] %vm2000_vm10, %v2391_v7  ;;  %v2034_v14 = vadd.f32 %v2033_v11, %v2032_v60  ;;  %v2392_v15 = vpack.c.bf16 %v1917_v8, %v1917_v8  ;;  %v2068_v25 = vmul.f32 %v1917_v8, %v1917_v8  ;;  %v2039_v27 = vsel %vm2017_vm3, %v1917_v8, 0.0 }
 0x277   : > { %2009 = vst.msk [vmem:[%s3316_s15 + $0x20] sm:$0xf] %vm2000_vm10, %v2389_v10  ;;  %v2088_v16 = vsel %vm2017_vm3, %v2065_v12, 0.0  ;;  %v2390_v17 = vpack.c.bf16 %v1909_v13, %v1909_v13  ;;  %v2035_v18 = vsel %vm2017_vm3, %v1909_v13, 0.0  ;;  %v2066_v22 = vmul.f32 %v1909_v13, %v1909_v13 }
 0x278   : > { %v2089_v20 = vadd.f32 %v2088_v16, %v2087_v63  ;;  %2012 = vst.msk [vmem:[%s3316_s15 + $0x2c] sm:$0xf] %vm2000_vm10, %v2392_v15  ;;  %v2036_v21 = vadd.f32 %v2035_v18, %v2034_v14  ;;  %v2092_v29 = vsel %vm2017_vm3, %v2067_v19, 0.0  ;;  %v2094_v32 = vsel %vm2017_vm3, %v2068_v25, 0.0 }
 0x279   : > { %2010 = vst.msk [vmem:[%s3316_s15 + $0x24] sm:$0xf] %vm2000_vm10, %v2390_v17  ;;  %v2090_v26 = vsel %vm2017_vm3, %v2066_v22, 0.0 }
 0x27a   : > { %v2038_v6 = vadd.f32 %v2037_v24, %v2036_v21  ;;  %v2091_v28 = vadd.f32 %v2090_v26, %v2089_v20 }
 0x27c   : > { %v2040_v30 = vadd.f32 %v2039_v27, %v2038_v6  ;;  %v2093_v31 = vadd.f32 %v2092_v29, %v2091_v28 }
 0x27e   : > { %v2095_v33 = vadd.f32 %v2094_v32, %v2093_v31 }
 0x28e   : > { %v2482_v34 = vpop.f32.mrb[4].mxu1 }
 0x28f   : > { %v1930_v23 = vadd.f32 %v2482_v34, %v3308_v1  ;;  %v1921_v35 = vpop.f32.mrb[5].mxu1 }
 0x290   : > { %v1922_v36 = vadd.f32 %v3308_v1, %v1921_v35  ;;  %v2483_v37 = vpop.f32.mrb[6].mxu1 }
 0x291   : > { %v2395_v38 = vpack.c.bf16 %v1930_v23, %v1930_v23  ;;  %v1933_v39 = vadd.f32 %v2483_v37, %v3308_v1  ;;  %v1924_v40 = vpop.f32.mrb[7].mxu1  ;;  %v2071_v50 = vmul.f32 %v1930_v23, %v1930_v23 }
 0x292   : > { %v2393_v41 = vpack.c.bf16 %v1922_v36, %v1922_v36  ;;  %v2041_v42 = vsel %vm2017_vm3, %v1922_v36, 0.0  ;;  %v2069_v43 = vmul.f32 %v1922_v36, %v1922_v36  ;;  %v1925_v44 = vadd.f32 %v3308_v1, %v1924_v40 }
 0x293   : > { %2015 = vst.msk [vmem:[%s3316_s15 + $0x38] sm:$0xf] %vm2000_vm10, %v2395_v38  ;;  %v2042_v45 = vadd.f32 %v2041_v42, %v2040_v30  ;;  %v2396_v46 = vpack.c.bf16 %v1933_v39, %v1933_v39  ;;  %v2045_v1 = vsel %vm2017_vm3, %v1930_v23, 0.0  ;;  %v2072_v54 = vmul.f32 %v1933_v39, %v1933_v39 }
 0x294   : > { %2013 = vst.msk [vmem:[%s3316_s15 + $0x30] sm:$0xf] %vm2000_vm10, %v2393_v41  ;;  %v2096_v47 = vsel %vm2017_vm3, %v2069_v43, 0.0  ;;  %v2394_v48 = vpack.c.bf16 %v1925_v44, %v1925_v44  ;;  %v2043_v49 = vsel %vm2017_vm3, %v1925_v44, 0.0  ;;  %v2070_v53 = vmul.f32 %v1925_v44, %v1925_v44 }
 0x295   : > { %v2097_v51 = vadd.f32 %v2096_v47, %v2095_v33  ;;  %2016 = vst.msk [vmem:[%s3316_s15 + $0x3c] sm:$0xf] %vm2000_vm10, %v2396_v46  ;;  %v2044_v52 = vadd.f32 %v2043_v49, %v2042_v45  ;;  %v2047_v57 = vsel %vm2017_vm3, %v1933_v39, 0.0  ;;  %v2100_v59 = vsel %vm2017_vm3, %v2071_v50, 0.0 }
 0x296   : > { %2014 = vst.msk [vmem:[%s3316_s15 + $0x34] sm:$0xf] %vm2000_vm10, %v2394_v48  ;;  %v2098_v56 = vsel %vm2017_vm3, %v2070_v53, 0.0  ;;  %v2102_v62 = vsel %vm2017_vm3, %v2072_v54, 0.0 }
 0x297   : > { %v2046_v55 = vadd.f32 %v2045_v1, %v2044_v52  ;;  %v2099_v58 = vadd.f32 %v2098_v56, %v2097_v51 }
 0x299   : > { %v2048_v60 = vadd.f32 %v2047_v57, %v2046_v55  ;;  %v2101_v61 = vadd.f32 %v2100_v59, %v2099_v58 }
 0x29b   : > { %v2049_v63 = vrot.slane %v2048_v60, 4  ;;  %v2103_v0 = vadd.f32 %v2102_v62, %v2101_v61 }
 0x29d   : > { %v2050_v2 = vadd.f32 %v2049_v63, %v2048_v60  ;;  %v2104_v3 = vrot.slane %v2103_v0, 4 }
 0x29f   : > { %v2051_v4 = vrot.slane %v2050_v2, 2  ;;  %v2105_v5 = vadd.f32 %v2104_v3, %v2103_v0 }
 0x2a1   : > { %v2052_v7 = vadd.f32 %v2051_v4, %v2050_v2  ;;  %v2106_v8 = vrot.slane %v2105_v5, 2 }
 0x2a3   : > { %v2053_v9 = vrot.slane %v2052_v7, 1  ;;  %v2107_v10 = vadd.f32 %v2106_v8, %v2105_v5 }
 0x2a5   : > { %v2054_v11 = vadd.f32 %v2053_v9, %v2052_v7  ;;  %v2108_v12 = vrot.slane %v2107_v10, 1 }
 0x2a7   : > { %2056 = vst.msk [vmem:[%s450_s21] sm:$0x1] %vm2055_vm14, %v2054_v11  ;;  %v2109_v13 = vadd.f32 %v2108_v12, %v2107_v10 }
 0x2a9   : > { %2110 = vst.msk [vmem:[%s450_s21 + $0x1] sm:$0x1] %vm2055_vm14, %v2109_v13 }
 0x2aa PF: > { %s18_s28 = sadd.s32 1, %s2597_s28   ;;  %s3478_s24 = smov %s2589_s26 }
 0x2ab   : > { %p15_p8 = scmp.ge.s32.totalorder %s18_s28, 6   ;;  %s3479_s25 = smov %s2593_s27 }
 0x2ac   : > { %s3480_s26 = smov %s3483_s29  ;;  %s3481_s27 = smov %s3487_s30 }
 0x2ad   :  { %17 = sbr.rel (!%p15_p8) target bundleno = 3 (0x3), region = 103 }

</bundles_post_ra>
